<compile_context>
chip_gen: v6e
topology: v6e:2x2x1
jax: 0.10.0
libtpu: 0.0.40
codegen_flags: <defaults>
</compile_context>

<pallas_src>
import functools
import math

import jax
import jax.numpy as jnp
from jax.experimental import pallas as pl
from jax.experimental.pallas import tpu as pltpu


# ----------------------------------------------------------------------------
# helpers
# ----------------------------------------------------------------------------
def _apply_act(x, act, neg_slope):
    if act == "leaky":
        return jnp.where(x >= 0, x, neg_slope * x)
    if act == "tanh":
        return jnp.tanh(x)
    return x


def _pick_tile(dim, max_tile, quantum):
    """Largest tile <= max_tile that divides `dim` and is a multiple of
    `quantum`; falls back to the full dim (single block)."""
    if dim <= max_tile:
        return dim
    t = (max_tile // quantum) * quantum
    while t >= quantum:
        if dim % t == 0:
            return t
        t -= quantum
    return dim


def _device_vmem_config():
    """Per-generation knobs for the streamed full-K-stripe kernel.

    v5e / v6e have 128 MiB VMEM: larger N stripes and a higher scoped-VMEM
    limit amortise per-grid-step overhead.  v7x has only 64 MiB, and the
    CPU/interpret harness has no TPU at all, so default conservatively.
    """
    try:
        kind = jax.devices()[0].device_kind.lower()
    except Exception:  # no device info available
        kind = ""
    if ("v5" in kind and "lite" in kind) or "v5e" in kind or "v6" in kind:
        return 1024, 96 * 1024 * 1024          # tn_max, vmem_limit_bytes
    return 512, 48 * 1024 * 1024               # v7x / unknown / interpret


# ----------------------------------------------------------------------------
# Streamed kernel (big layers): out = act(A @ W + b [+ level*noise])
# grid = (M_tiles, N_tiles); W is streamed as full-K stripes (K, tn).
# ----------------------------------------------------------------------------
def _stream_linear_kernel(a_ref, w_ref, b_ref, *rest, act, neg_slope,
                          noise_level):
    o_ref = rest[-1]
    # bf16 x bf16 -> f32 accumulation on the MXU (full-K stripe, no acc loop).
    acc = jnp.dot(a_ref[...], w_ref[...], preferred_element_type=jnp.float32)
    out = acc + b_ref[...]                                  # f32 epilogue
    if noise_level is not None:
        out = out + noise_level * rest[0][...]
    out = _apply_act(out, act, neg_slope)
    o_ref[...] = out.astype(o_ref.dtype)


def noise_linear(x, w, b, noise, *, noise_level, act, out_dtype,
                 neg_slope=0.2, tm_max=256, tn_max=512,
                 vmem_limit_bytes=48 * 1024 * 1024):
    """x:(M,K) bf16, w:(K,N) bf16, b:(1,N) f32, noise:(M,N) f32 or None."""
    m, kdim = x.shape
    kdim2, n = w.shape
    assert kdim == kdim2 and b.shape == (1, n)

    tm = _pick_tile(m, tm_max, 16)           # 16 quantum for bf16 sublanes
    tn = _pick_tile(n, tn_max, 128)          # lane-dense output stripes
    grid = (m // tm, n // tn)                # no K axis: full-K stripes

    in_specs = [
        pl.BlockSpec((tm, kdim), lambda i, j: (i, 0)),   # A: full-K row block
        pl.BlockSpec((kdim, tn), lambda i, j: (0, j)),   # W: full-K stripe
        pl.BlockSpec((1, tn), lambda i, j: (0, j)),      # bias
    ]
    inputs = [x, w, b]
    if noise_level is not None:
        in_specs.append(pl.BlockSpec((tm, tn), lambda i, j: (i, j)))
        inputs.append(noise)

    kern = functools.partial(_stream_linear_kernel, act=act,
                             neg_slope=neg_slope, noise_level=noise_level)
    return pl.pallas_call(
        kern,
        out_shape=jax.ShapeDtypeStruct((m, n), out_dtype),
        grid=grid,
        in_specs=in_specs,
        out_specs=pl.BlockSpec((tm, tn), lambda i, j: (i, j)),
        compiler_params=pltpu.CompilerParams(
            dimension_semantics=("parallel", "parallel"),
            vmem_limit_bytes=vmem_limit_bytes,
        ),
    )(*inputs)


# ----------------------------------------------------------------------------
# Fused kernel (narrow front): several layers in ONE pallas_call; weights,
# biases, noise and all intermediate activations stay in VMEM / vregs.
# ----------------------------------------------------------------------------
def _make_fused_kernel(layer_cfgs):
    def kernel(x_ref, *refs):
        o_ref = refs[-1]
        prm = refs[:-1]
        x = x_ref[...]
        idx = 0
        for cfg in layer_cfgs:
            w = prm[idx][...]
            b = prm[idx + 1][...]
            idx += 2
            out = jnp.dot(x.astype(jnp.bfloat16), w,
                          preferred_element_type=jnp.float32) + b
            if cfg["noise_level"] is not None:
                out = out + cfg["noise_level"] * prm[idx][...]
                idx += 1
            out = _apply_act(out, cfg["act"], cfg["neg_slope"])
            x = out
        o_ref[...] = x.astype(o_ref.dtype)
    return kernel


def fused_block(x, layer_params, layer_cfgs, *, out_dtype, tm_max=256,
                vmem_limit_bytes=48 * 1024 * 1024):
    """layer_params: list of (w:(K,N) bf16, b:(1,N) f32, noise:(M,N) f32|None)."""
    m, k0 = x.shape
    tm = _pick_tile(m, tm_max, 16)
    grid = (m // tm,)

    in_specs = [pl.BlockSpec((tm, k0), lambda i: (i, 0))]
    inputs = [x]
    for (w, b, noise), cfg in zip(layer_params, layer_cfgs):
        kdim, n = w.shape
        in_specs.append(pl.BlockSpec((kdim, n), lambda i: (0, 0)))
        in_specs.append(pl.BlockSpec((1, n), lambda i: (0, 0)))
        inputs += [w, b]
        if cfg["noise_level"] is not None:
            in_specs.append(pl.BlockSpec((tm, n), lambda i: (i, 0)))
            inputs.append(noise)

    n_out = layer_params[-1][0].shape[1]
    kern = _make_fused_kernel(tuple(layer_cfgs))
    return pl.pallas_call(
        kern,
        out_shape=jax.ShapeDtypeStruct((m, n_out), out_dtype),
        grid=grid,
        in_specs=in_specs,
        out_specs=pl.BlockSpec((tm, n_out), lambda i: (i, 0)),
        compiler_params=pltpu.CompilerParams(
            dimension_semantics=("parallel",),
            vmem_limit_bytes=vmem_limit_bytes,
        ),
    )(*inputs)


# ----------------------------------------------------------------------------
# Layer structure and parameters (deterministic, in-script)
# ----------------------------------------------------------------------------
def layer_dims(latent_dim, w1, w2, w3, out_dim):
    # Mirrors: latent->w1 (no BN), w1->w2, 3x w2->w2, w2->w3, 3x w3->w3, w3->out.
    return [(latent_dim, w1), (w1, w2), (w2, w2), (w2, w2), (w2, w2),
            (w2, w3), (w3, w3), (w3, w3), (w3, w3), (w3, out_dim)]


def init_params(key, dims):
    params = {"w": [], "b": []}
    for fan_in, fan_out in dims:
        key, kw, kb = jax.random.split(key, 3)
        bound = 1.0 / math.sqrt(fan_in)                       # torch Linear init
        w = jax.random.uniform(kw, (fan_in, fan_out), jnp.float32, -bound, bound)
        b = jax.random.uniform(kb, (1, fan_out), jnp.float32, -bound, bound)
        # TODO(synk): normalize=True layers' eval-mode BatchNorm1d is identity at
        # init (gamma=1, beta=0, running stats 0/1) and is folded into (w, b).
        params["w"].append(w.astype(jnp.bfloat16))            # bf16 weight stream
        params["b"].append(b)                                  # f32 bias
    return params


# ----------------------------------------------------------------------------
# Forward pass of NoiseGeneratorDeeperWider
# ----------------------------------------------------------------------------
def forward(z, params, noise_key, *, img_shape, noise_level=0.1,
            resident_weight_limit=4 * 1024 * 1024,
            segment_weight_limit=16 * 1024 * 1024,
            tn_max=512, vmem_limit_bytes=48 * 1024 * 1024):
    x = z.astype(jnp.bfloat16)
    n_layers = len(params["w"])
    m = z.shape[0]

    # Per-layer configs and host-generated Gaussian noise (decorrelated keys).
    cfgs, noises = [], []
    for i in range(n_layers):
        last = (i == n_layers - 1)
        level = None if last else noise_level       # final Linear: no noise
        cfgs.append(dict(noise_level=level,
                         act="tanh" if last else "leaky",
                         neg_slope=0.2))
        if level is not None:
            n_out = params["w"][i].shape[1]
            noises.append(jax.random.normal(jax.random.fold_in(noise_key, i),
                                            (m, n_out), jnp.float32))
        else:
            noises.append(None)

    # Group consecutive small-weight layers into fused VMEM-resident segments;
    # big layers go through the streamed full-K-stripe kernel one by one.
    segments, cur, cur_bytes = [], [], 0
    for i in range(n_layers):
        wbytes = params["w"][i].size * params["w"][i].dtype.itemsize
        if wbytes <= resident_weight_limit and (cur_bytes + wbytes) <= segment_weight_limit:
            cur.append(i)
            cur_bytes += wbytes
        else:
            if cur:
                segments.append(("fused", cur))
                cur, cur_bytes = [], 0
            if wbytes <= resident_weight_limit:
                cur, cur_bytes = [i], wbytes
            else:
                segments.append(("stream", [i]))
    if cur:
        segments.append(("fused", cur))

    for kind, idxs in segments:
        seg_last = (idxs[-1] == n_layers - 1)
        out_dtype = jnp.float32 if seg_last else jnp.bfloat16
        if kind == "fused":
            lp = [(params["w"][i], params["b"][i], noises[i]) for i in idxs]
            lc = [cfgs[i] for i in idxs]
            x = fused_block(x, lp, lc, out_dtype=out_dtype,
                            vmem_limit_bytes=vmem_limit_bytes)
        else:
            i = idxs[0]
            x = noise_linear(x, params["w"][i], params["b"][i], noises[i],
                             noise_level=cfgs[i]["noise_level"],
                             act=cfgs[i]["act"], out_dtype=out_dtype,
                             tn_max=tn_max,
                             vmem_limit_bytes=vmem_limit_bytes)
    return x.reshape(m, *img_shape)                 # img.view(B, C, H, W)


# ----------------------------------------------------------------------------
if __name__ == "__main__":
    # Non-mnist dataset -> 3 channels.  Widths scaled 128/1024/10240 ->
    # 128/256/512 and img_size -> 16 to keep the demo SMALL, same structure.
    latent_dim = 32
    channels = 3
    img_size = 16
    batch = 8
    w1, w2, w3 = 128, 256, 512
    img_shape = (channels, img_size, img_size)

    dims = layer_dims(latent_dim, w1, w2, w3, int(channels * img_size * img_size))
    params = init_params(jax.random.PRNGKey(42), dims)
    z = jax.random.normal(jax.random.PRNGKey(0), (batch, latent_dim), jnp.float32)
    noise_key = jax.random.PRNGKey(1)

    tn_max, vmem_limit = _device_vmem_config()
    # Demo residency limit 192 KiB so both code paths run: layers 0-4 fuse into
    # one VMEM-resident kernel, the wider 512-column layers use the streamed
    # full-K-stripe kernel.  Production default (4 MiB) fuses the narrow front
    # (latent->128->1024->...) and streams every 10240-wide layer.
    fwd = jax.jit(functools.partial(
        forward, img_shape=img_shape, noise_level=0.1,
        resident_weight_limit=192 * 1024, segment_weight_limit=16 * 1024 * 1024,
        tn_max=tn_max, vmem_limit_bytes=vmem_limit))

    img = fwd(z, params, noise_key)
    img = jax.block_until_ready(img)

    assert img.shape == (batch, channels, img_size, img_size), img.shape
    assert bool(jnp.all(jnp.isfinite(img)))
    assert bool(jnp.all(jnp.abs(img) <= 1.0 + 1e-5))      # tanh output range
    print("KERNEL_OK")
</pallas_src>

<mosaic_0001>
module attributes {stable_mosaic.version = 11 : i64} {
  func.func @kernel(%arg0: i32, %arg1: memref<8x32xbf16, #tpu.memory_space<vmem>>, %arg2: memref<32x128xbf16, #tpu.memory_space<vmem>>, %arg3: memref<1x128xf32, #tpu.memory_space<vmem>>, %arg4: memref<8x128xf32, #tpu.memory_space<vmem>>, %arg5: memref<128x256xbf16, #tpu.memory_space<vmem>>, %arg6: memref<1x256xf32, #tpu.memory_space<vmem>>, %arg7: memref<8x256xf32, #tpu.memory_space<vmem>>, %arg8: memref<256x256xbf16, #tpu.memory_space<vmem>>, %arg9: memref<1x256xf32, #tpu.memory_space<vmem>>, %arg10: memref<8x256xf32, #tpu.memory_space<vmem>>, %arg11: memref<256x256xbf16, #tpu.memory_space<vmem>>, %arg12: memref<1x256xf32, #tpu.memory_space<vmem>>, %arg13: memref<8x256xf32, #tpu.memory_space<vmem>>, %arg14: memref<256x256xbf16, #tpu.memory_space<vmem>>, %arg15: memref<1x256xf32, #tpu.memory_space<vmem>>, %arg16: memref<8x256xf32, #tpu.memory_space<vmem>>, %arg17: memref<8x256xbf16, #tpu.memory_space<vmem>>) attributes {dimension_semantics = [#tpu.dimension_semantics<parallel>], iteration_bounds = array<i64: 1>, scalar_prefetch = 0 : i64, scratch_operands = 0 : i64, tpu.core_type = #tpu.core_type<tc>, window_params = [{transform_indices = @transform_0, window_bounds = array<i64: 8, 32>}, {pipeline_mode = #tpu.pipeline_mode<synchronous>, transform_indices = @transform_1, window_bounds = array<i64: 32, 128>}, {pipeline_mode = #tpu.pipeline_mode<synchronous>, transform_indices = @transform_2, window_bounds = array<i64: 1, 128>}, {transform_indices = @transform_3, window_bounds = array<i64: 8, 128>}, {pipeline_mode = #tpu.pipeline_mode<synchronous>, transform_indices = @transform_4, window_bounds = array<i64: 128, 256>}, {pipeline_mode = #tpu.pipeline_mode<synchronous>, transform_indices = @transform_5, window_bounds = array<i64: 1, 256>}, {transform_indices = @transform_6, window_bounds = array<i64: 8, 256>}, {pipeline_mode = #tpu.pipeline_mode<synchronous>, transform_indices = @transform_7, window_bounds = array<i64: 256, 256>}, {pipeline_mode = #tpu.pipeline_mode<synchronous>, transform_indices = @transform_8, window_bounds = array<i64: 1, 256>}, {transform_indices = @transform_9, window_bounds = array<i64: 8, 256>}, {pipeline_mode = #tpu.pipeline_mode<synchronous>, transform_indices = @transform_10, window_bounds = array<i64: 256, 256>}, {pipeline_mode = #tpu.pipeline_mode<synchronous>, transform_indices = @transform_11, window_bounds = array<i64: 1, 256>}, {transform_indices = @transform_12, window_bounds = array<i64: 8, 256>}, {pipeline_mode = #tpu.pipeline_mode<synchronous>, transform_indices = @transform_13, window_bounds = array<i64: 256, 256>}, {pipeline_mode = #tpu.pipeline_mode<synchronous>, transform_indices = @transform_14, window_bounds = array<i64: 1, 256>}, {transform_indices = @transform_15, window_bounds = array<i64: 8, 256>}, {transform_indices = @transform_16, window_bounds = array<i64: 8, 256>}]} {
    %c0 = arith.constant 0 : index
    %c0_0 = arith.constant 0 : index
    %0 = vector.load %arg1[%c0, %c0_0] : memref<8x32xbf16, #tpu.memory_space<vmem>>, vector<8x32xbf16>
    %c0_1 = arith.constant 0 : index
    %c0_2 = arith.constant 0 : index
    %1 = vector.load %arg2[%c0_1, %c0_2] : memref<32x128xbf16, #tpu.memory_space<vmem>>, vector<32x128xbf16>
    %c0_3 = arith.constant 0 : index
    %c0_4 = arith.constant 0 : index
    %2 = vector.load %arg3[%c0_3, %c0_4] : memref<1x128xf32, #tpu.memory_space<vmem>>, vector<1x128xf32>
    %cst = arith.constant dense<0.000000e+00> : vector<8x128xf32>
    %3 = tpu.matmul %0, %1, %cst {dimension_numbers = #tpu.dot_dimension_numbers<[1], [0], [0], [1], [0, 0, 1, 1], [], []>} : vector<8x32xbf16>, vector<32x128xbf16>, vector<8x128xf32> -> vector<8x128xf32>
    %4 = vector.broadcast %2 : vector<1x128xf32> to vector<8x128xf32>
    %5 = arith.addf %3, %4 : vector<8x128xf32>
    %c0_5 = arith.constant 0 : index
    %c0_6 = arith.constant 0 : index
    %6 = vector.load %arg4[%c0_5, %c0_6] : memref<8x128xf32, #tpu.memory_space<vmem>>, vector<8x128xf32>
    %cst_7 = arith.constant 1.000000e-01 : f32
    %7 = vector.broadcast %cst_7 : f32 to vector<8x128xf32>
    %8 = arith.mulf %7, %6 : vector<8x128xf32>
    %9 = arith.addf %5, %8 : vector<8x128xf32>
    %cst_8 = arith.constant 0.000000e+00 : f32
    %10 = vector.broadcast %cst_8 : f32 to vector<8x128xf32>
    %11 = arith.cmpf oge, %9, %10 : vector<8x128xf32>
    %cst_9 = arith.constant 2.000000e-01 : f32
    %12 = vector.broadcast %cst_9 : f32 to vector<8x128xf32>
    %13 = arith.mulf %12, %9 : vector<8x128xf32>
    %14 = arith.select %11, %9, %13 : vector<8x128xi1>, vector<8x128xf32>
    %c0_10 = arith.constant 0 : index
    %c0_11 = arith.constant 0 : index
    %15 = vector.load %arg5[%c0_10, %c0_11] : memref<128x256xbf16, #tpu.memory_space<vmem>>, vector<128x256xbf16>
    %c0_12 = arith.constant 0 : index
    %c0_13 = arith.constant 0 : index
    %16 = vector.load %arg6[%c0_12, %c0_13] : memref<1x256xf32, #tpu.memory_space<vmem>>, vector<1x256xf32>
    %17 = arith.truncf %14 : vector<8x128xf32> to vector<8x128xbf16>
    %cst_14 = arith.constant dense<0.000000e+00> : vector<8x256xf32>
    %18 = tpu.matmul %17, %15, %cst_14 {dimension_numbers = #tpu.dot_dimension_numbers<[1], [0], [0], [1], [0, 0, 1, 1], [], []>} : vector<8x128xbf16>, vector<128x256xbf16>, vector<8x256xf32> -> vector<8x256xf32>
    %19 = vector.broadcast %16 : vector<1x256xf32> to vector<8x256xf32>
    %20 = arith.addf %18, %19 : vector<8x256xf32>
    %c0_15 = arith.constant 0 : index
    %c0_16 = arith.constant 0 : index
    %21 = vector.load %arg7[%c0_15, %c0_16] : memref<8x256xf32, #tpu.memory_space<vmem>>, vector<8x256xf32>
    %cst_17 = arith.constant 1.000000e-01 : f32
    %22 = vector.broadcast %cst_17 : f32 to vector<8x256xf32>
    %23 = arith.mulf %22, %21 : vector<8x256xf32>
    %24 = arith.addf %20, %23 : vector<8x256xf32>
    %cst_18 = arith.constant 0.000000e+00 : f32
    %25 = vector.broadcast %cst_18 : f32 to vector<8x256xf32>
    %26 = arith.cmpf oge, %24, %25 : vector<8x256xf32>
    %cst_19 = arith.constant 2.000000e-01 : f32
    %27 = vector.broadcast %cst_19 : f32 to vector<8x256xf32>
    %28 = arith.mulf %27, %24 : vector<8x256xf32>
    %29 = arith.select %26, %24, %28 : vector<8x256xi1>, vector<8x256xf32>
    %c0_20 = arith.constant 0 : index
    %c0_21 = arith.constant 0 : index
    %30 = vector.load %arg8[%c0_20, %c0_21] : memref<256x256xbf16, #tpu.memory_space<vmem>>, vector<256x256xbf16>
    %c0_22 = arith.constant 0 : index
    %c0_23 = arith.constant 0 : index
    %31 = vector.load %arg9[%c0_22, %c0_23] : memref<1x256xf32, #tpu.memory_space<vmem>>, vector<1x256xf32>
    %32 = arith.truncf %29 : vector<8x256xf32> to vector<8x256xbf16>
    %cst_24 = arith.constant dense<0.000000e+00> : vector<8x256xf32>
    %33 = tpu.matmul %32, %30, %cst_24 {dimension_numbers = #tpu.dot_dimension_numbers<[1], [0], [0], [1], [0, 0, 1, 1], [], []>} : vector<8x256xbf16>, vector<256x256xbf16>, vector<8x256xf32> -> vector<8x256xf32>
    %34 = vector.broadcast %31 : vector<1x256xf32> to vector<8x256xf32>
    %35 = arith.addf %33, %34 : vector<8x256xf32>
    %c0_25 = arith.constant 0 : index
    %c0_26 = arith.constant 0 : index
    %36 = vector.load %arg10[%c0_25, %c0_26] : memref<8x256xf32, #tpu.memory_space<vmem>>, vector<8x256xf32>
    %cst_27 = arith.constant 1.000000e-01 : f32
    %37 = vector.broadcast %cst_27 : f32 to vector<8x256xf32>
    %38 = arith.mulf %37, %36 : vector<8x256xf32>
    %39 = arith.addf %35, %38 : vector<8x256xf32>
    %cst_28 = arith.constant 0.000000e+00 : f32
    %40 = vector.broadcast %cst_28 : f32 to vector<8x256xf32>
    %41 = arith.cmpf oge, %39, %40 : vector<8x256xf32>
    %cst_29 = arith.constant 2.000000e-01 : f32
    %42 = vector.broadcast %cst_29 : f32 to vector<8x256xf32>
    %43 = arith.mulf %42, %39 : vector<8x256xf32>
    %44 = arith.select %41, %39, %43 : vector<8x256xi1>, vector<8x256xf32>
    %c0_30 = arith.constant 0 : index
    %c0_31 = arith.constant 0 : index
    %45 = vector.load %arg11[%c0_30, %c0_31] : memref<256x256xbf16, #tpu.memory_space<vmem>>, vector<256x256xbf16>
    %c0_32 = arith.constant 0 : index
    %c0_33 = arith.constant 0 : index
    %46 = vector.load %arg12[%c0_32, %c0_33] : memref<1x256xf32, #tpu.memory_space<vmem>>, vector<1x256xf32>
    %47 = arith.truncf %44 : vector<8x256xf32> to vector<8x256xbf16>
    %cst_34 = arith.constant dense<0.000000e+00> : vector<8x256xf32>
    %48 = tpu.matmul %47, %45, %cst_34 {dimension_numbers = #tpu.dot_dimension_numbers<[1], [0], [0], [1], [0, 0, 1, 1], [], []>} : vector<8x256xbf16>, vector<256x256xbf16>, vector<8x256xf32> -> vector<8x256xf32>
    %49 = vector.broadcast %46 : vector<1x256xf32> to vector<8x256xf32>
    %50 = arith.addf %48, %49 : vector<8x256xf32>
    %c0_35 = arith.constant 0 : index
    %c0_36 = arith.constant 0 : index
    %51 = vector.load %arg13[%c0_35, %c0_36] : memref<8x256xf32, #tpu.memory_space<vmem>>, vector<8x256xf32>
    %cst_37 = arith.constant 1.000000e-01 : f32
    %52 = vector.broadcast %cst_37 : f32 to vector<8x256xf32>
    %53 = arith.mulf %52, %51 : vector<8x256xf32>
    %54 = arith.addf %50, %53 : vector<8x256xf32>
    %cst_38 = arith.constant 0.000000e+00 : f32
    %55 = vector.broadcast %cst_38 : f32 to vector<8x256xf32>
    %56 = arith.cmpf oge, %54, %55 : vector<8x256xf32>
    %cst_39 = arith.constant 2.000000e-01 : f32
    %57 = vector.broadcast %cst_39 : f32 to vector<8x256xf32>
    %58 = arith.mulf %57, %54 : vector<8x256xf32>
    %59 = arith.select %56, %54, %58 : vector<8x256xi1>, vector<8x256xf32>
    %c0_40 = arith.constant 0 : index
    %c0_41 = arith.constant 0 : index
    %60 = vector.load %arg14[%c0_40, %c0_41] : memref<256x256xbf16, #tpu.memory_space<vmem>>, vector<256x256xbf16>
    %c0_42 = arith.constant 0 : index
    %c0_43 = arith.constant 0 : index
    %61 = vector.load %arg15[%c0_42, %c0_43] : memref<1x256xf32, #tpu.memory_space<vmem>>, vector<1x256xf32>
    %62 = arith.truncf %59 : vector<8x256xf32> to vector<8x256xbf16>
    %cst_44 = arith.constant dense<0.000000e+00> : vector<8x256xf32>
    %63 = tpu.matmul %62, %60, %cst_44 {dimension_numbers = #tpu.dot_dimension_numbers<[1], [0], [0], [1], [0, 0, 1, 1], [], []>} : vector<8x256xbf16>, vector<256x256xbf16>, vector<8x256xf32> -> vector<8x256xf32>
    %64 = vector.broadcast %61 : vector<1x256xf32> to vector<8x256xf32>
    %65 = arith.addf %63, %64 : vector<8x256xf32>
    %c0_45 = arith.constant 0 : index
    %c0_46 = arith.constant 0 : index
    %66 = vector.load %arg16[%c0_45, %c0_46] : memref<8x256xf32, #tpu.memory_space<vmem>>, vector<8x256xf32>
    %cst_47 = arith.constant 1.000000e-01 : f32
    %67 = vector.broadcast %cst_47 : f32 to vector<8x256xf32>
    %68 = arith.mulf %67, %66 : vector<8x256xf32>
    %69 = arith.addf %65, %68 : vector<8x256xf32>
    %cst_48 = arith.constant 0.000000e+00 : f32
    %70 = vector.broadcast %cst_48 : f32 to vector<8x256xf32>
    %71 = arith.cmpf oge, %69, %70 : vector<8x256xf32>
    %cst_49 = arith.constant 2.000000e-01 : f32
    %72 = vector.broadcast %cst_49 : f32 to vector<8x256xf32>
    %73 = arith.mulf %72, %69 : vector<8x256xf32>
    %74 = arith.select %71, %69, %73 : vector<8x256xi1>, vector<8x256xf32>
    %75 = arith.truncf %74 : vector<8x256xf32> to vector<8x256xbf16>
    %c0_50 = arith.constant 0 : index
    %c0_51 = arith.constant 0 : index
    %76 = vector.load %arg17[%c0_50, %c0_51] : memref<8x256xbf16, #tpu.memory_space<vmem>>, vector<8x256xbf16>
    tpu.vector_store %arg17[%c0_50, %c0_51], %75 {strides = array<i32>} : memref<8x256xbf16, #tpu.memory_space<vmem>>, vector<8x256xbf16>,
    return
  }
  func.func @transform_0(%arg0: i32) -> (i32, i32) {
    %c0_i32 = arith.constant 0 : i32
    %c0_i32_0 = arith.constant 0 : i32
    return %arg0, %c0_i32 : i32, i32
  }
  func.func @transform_1(%arg0: i32) -> (i32, i32) {
    %c0_i32 = arith.constant 0 : i32
    %c0_i32_0 = arith.constant 0 : i32
    %c0_i32_1 = arith.constant 0 : i32
    return %c0_i32, %c0_i32_0 : i32, i32
  }
  func.func @transform_2(%arg0: i32) -> (i32, i32) {
    %c0_i32 = arith.constant 0 : i32
    %c0_i32_0 = arith.constant 0 : i32
    %c0_i32_1 = arith.constant 0 : i32
    return %c0_i32, %c0_i32_0 : i32, i32
  }
  func.func @transform_3(%arg0: i32) -> (i32, i32) {
    %c0_i32 = arith.constant 0 : i32
    %c0_i32_0 = arith.constant 0 : i32
    return %arg0, %c0_i32 : i32, i32
  }
  func.func @transform_4(%arg0: i32) -> (i32, i32) {
    %c0_i32 = arith.constant 0 : i32
    %c0_i32_0 = arith.constant 0 : i32
    %c0_i32_1 = arith.constant 0 : i32
    return %c0_i32, %c0_i32_0 : i32, i32
  }
  func.func @transform_5(%arg0: i32) -> (i32, i32) {
    %c0_i32 = arith.constant 0 : i32
    %c0_i32_0 = arith.constant 0 : i32
    %c0_i32_1 = arith.constant 0 : i32
    return %c0_i32, %c0_i32_0 : i32, i32
  }
  func.func @transform_6(%arg0: i32) -> (i32, i32) {
    %c0_i32 = arith.constant 0 : i32
    %c0_i32_0 = arith.constant 0 : i32
    return %arg0, %c0_i32 : i32, i32
  }
  func.func @transform_7(%arg0: i32) -> (i32, i32) {
    %c0_i32 = arith.constant 0 : i32
    %c0_i32_0 = arith.constant 0 : i32
    %c0_i32_1 = arith.constant 0 : i32
    return %c0_i32, %c0_i32_0 : i32, i32
  }
  func.func @transform_8(%arg0: i32) -> (i32, i32) {
    %c0_i32 = arith.constant 0 : i32
    %c0_i32_0 = arith.constant 0 : i32
    %c0_i32_1 = arith.constant 0 : i32
    return %c0_i32, %c0_i32_0 : i32, i32
  }
  func.func @transform_9(%arg0: i32) -> (i32, i32) {
    %c0_i32 = arith.constant 0 : i32
    %c0_i32_0 = arith.constant 0 : i32
    return %arg0, %c0_i32 : i32, i32
  }
  func.func @transform_10(%arg0: i32) -> (i32, i32) {
    %c0_i32 = arith.constant 0 : i32
    %c0_i32_0 = arith.constant 0 : i32
    %c0_i32_1 = arith.constant 0 : i32
    return %c0_i32, %c0_i32_0 : i32, i32
  }
  func.func @transform_11(%arg0: i32) -> (i32, i32) {
    %c0_i32 = arith.constant 0 : i32
    %c0_i32_0 = arith.constant 0 : i32
    %c0_i32_1 = arith.constant 0 : i32
    return %c0_i32, %c0_i32_0 : i32, i32
  }
  func.func @transform_12(%arg0: i32) -> (i32, i32) {
    %c0_i32 = arith.constant 0 : i32
    %c0_i32_0 = arith.constant 0 : i32
    return %arg0, %c0_i32 : i32, i32
  }
  func.func @transform_13(%arg0: i32) -> (i32, i32) {
    %c0_i32 = arith.constant 0 : i32
    %c0_i32_0 = arith.constant 0 : i32
    %c0_i32_1 = arith.constant 0 : i32
    return %c0_i32, %c0_i32_0 : i32, i32
  }
  func.func @transform_14(%arg0: i32) -> (i32, i32) {
    %c0_i32 = arith.constant 0 : i32
    %c0_i32_0 = arith.constant 0 : i32
    %c0_i32_1 = arith.constant 0 : i32
    return %c0_i32, %c0_i32_0 : i32, i32
  }
  func.func @transform_15(%arg0: i32) -> (i32, i32) {
    %c0_i32 = arith.constant 0 : i32
    %c0_i32_0 = arith.constant 0 : i32
    return %arg0, %c0_i32 : i32, i32
  }
  func.func @transform_16(%arg0: i32) -> (i32, i32) {
    %c0_i32 = arith.constant 0 : i32
    %c0_i32_0 = arith.constant 0 : i32
    return %arg0, %c0_i32 : i32, i32
  }
}

module attributes {stable_mosaic.version = 11 : i64} {
  func.func @_stream_linear_kernel(%arg0: i32, %arg1: i32, %arg2: memref<8x256xbf16, #tpu.memory_space<vmem>>, %arg3: memref<256x512xbf16, #tpu.memory_space<vmem>>, %arg4: memref<1x512xf32, #tpu.memory_space<vmem>>, %arg5: memref<8x512xf32, #tpu.memory_space<vmem>>, %arg6: memref<8x512xbf16, #tpu.memory_space<vmem>>) attributes {dimension_semantics = [#tpu.dimension_semantics<parallel>, #tpu.dimension_semantics<parallel>], iteration_bounds = array<i64: 1, 1>, scalar_prefetch = 0 : i64, scratch_operands = 0 : i64, tpu.core_type = #tpu.core_type<tc>, window_params = [{transform_indices = @transform_0, window_bounds = array<i64: 8, 256>}, {transform_indices = @transform_1, window_bounds = array<i64: 256, 512>}, {transform_indices = @transform_2, window_bounds = array<i64: 1, 512>}, {transform_indices = @transform_3, window_bounds = array<i64: 8, 512>}, {transform_indices = @transform_4, window_bounds = array<i64: 8, 512>}]} {
    %c0 = arith.constant 0 : index
    %c0_0 = arith.constant 0 : index
    %0 = vector.load %arg2[%c0, %c0_0] : memref<8x256xbf16, #tpu.memory_space<vmem>>, vector<8x256xbf16>
    %c0_1 = arith.constant 0 : index
    %c0_2 = arith.constant 0 : index
    %1 = vector.load %arg3[%c0_1, %c0_2] : memref<256x512xbf16, #tpu.memory_space<vmem>>, vector<256x512xbf16>
    %cst = arith.constant dense<0.000000e+00> : vector<8x512xf32>
    %2 = tpu.matmul %0, %1, %cst {dimension_numbers = #tpu.dot_dimension_numbers<[1], [0], [0], [1], [0, 0, 1, 1], [], []>} : vector<8x256xbf16>, vector<256x512xbf16>, vector<8x512xf32> -> vector<8x512xf32>
    %c0_3 = arith.constant 0 : index
    %c0_4 = arith.constant 0 : index
    %3 = vector.load %arg4[%c0_3, %c0_4] : memref<1x512xf32, #tpu.memory_space<vmem>>, vector<1x512xf32>
    %4 = vector.broadcast %3 : vector<1x512xf32> to vector<8x512xf32>
    %5 = arith.addf %2, %4 : vector<8x512xf32>
    %c0_5 = arith.constant 0 : index
    %c0_6 = arith.constant 0 : index
    %6 = vector.load %arg5[%c0_5, %c0_6] : memref<8x512xf32, #tpu.memory_space<vmem>>, vector<8x512xf32>
    %cst_7 = arith.constant 1.000000e-01 : f32
    %7 = vector.broadcast %cst_7 : f32 to vector<8x512xf32>
    %8 = arith.mulf %7, %6 : vector<8x512xf32>
    %9 = arith.addf %5, %8 : vector<8x512xf32>
    %cst_8 = arith.constant 0.000000e+00 : f32
    %10 = vector.broadcast %cst_8 : f32 to vector<8x512xf32>
    %11 = arith.cmpf oge, %9, %10 : vector<8x512xf32>
    %cst_9 = arith.constant 2.000000e-01 : f32
    %12 = vector.broadcast %cst_9 : f32 to vector<8x512xf32>
    %13 = arith.mulf %12, %9 : vector<8x512xf32>
    %14 = arith.select %11, %9, %13 : vector<8x512xi1>, vector<8x512xf32>
    %15 = arith.truncf %14 : vector<8x512xf32> to vector<8x512xbf16>
    %c0_10 = arith.constant 0 : index
    %c0_11 = arith.constant 0 : index
    %16 = vector.load %arg6[%c0_10, %c0_11] : memref<8x512xbf16, #tpu.memory_space<vmem>>, vector<8x512xbf16>
    tpu.vector_store %arg6[%c0_10, %c0_11], %15 {strides = array<i32>} : memref<8x512xbf16, #tpu.memory_space<vmem>>, vector<8x512xbf16>,
    return
  }
  func.func @transform_0(%arg0: i32, %arg1: i32) -> (i32, i32) {
    %c0_i32 = arith.constant 0 : i32
    %c0_i32_0 = arith.constant 0 : i32
    return %arg0, %c0_i32 : i32, i32
  }
  func.func @transform_1(%arg0: i32, %arg1: i32) -> (i32, i32) {
    %c0_i32 = arith.constant 0 : i32
    %c0_i32_0 = arith.constant 0 : i32
    return %c0_i32, %arg1 : i32, i32
  }
  func.func @transform_2(%arg0: i32, %arg1: i32) -> (i32, i32) {
    %c0_i32 = arith.constant 0 : i32
    %c0_i32_0 = arith.constant 0 : i32
    return %c0_i32, %arg1 : i32, i32
  }
  func.func @transform_3(%arg0: i32, %arg1: i32) -> (i32, i32) {
    %c0_i32 = arith.constant 0 : i32
    return %arg0, %arg1 : i32, i32
  }
  func.func @transform_4(%arg0: i32, %arg1: i32) -> (i32, i32) {
    %c0_i32 = arith.constant 0 : i32
    return %arg0, %arg1 : i32, i32
  }
}

module attributes {stable_mosaic.version = 11 : i64} {
  func.func @_stream_linear_kernel(%arg0: i32, %arg1: i32, %arg2: memref<8x512xbf16, #tpu.memory_space<vmem>>, %arg3: memref<512x512xbf16, #tpu.memory_space<vmem>>, %arg4: memref<1x512xf32, #tpu.memory_space<vmem>>, %arg5: memref<8x512xf32, #tpu.memory_space<vmem>>, %arg6: memref<8x512xbf16, #tpu.memory_space<vmem>>) attributes {dimension_semantics = [#tpu.dimension_semantics<parallel>, #tpu.dimension_semantics<parallel>], iteration_bounds = array<i64: 1, 1>, scalar_prefetch = 0 : i64, scratch_operands = 0 : i64, tpu.core_type = #tpu.core_type<tc>, window_params = [{transform_indices = @transform_0, window_bounds = array<i64: 8, 512>}, {transform_indices = @transform_1, window_bounds = array<i64: 512, 512>}, {transform_indices = @transform_2, window_bounds = array<i64: 1, 512>}, {transform_indices = @transform_3, window_bounds = array<i64: 8, 512>}, {transform_indices = @transform_4, window_bounds = array<i64: 8, 512>}]} {
    %c0 = arith.constant 0 : index
    %c0_0 = arith.constant 0 : index
    %0 = vector.load %arg2[%c0, %c0_0] : memref<8x512xbf16, #tpu.memory_space<vmem>>, vector<8x512xbf16>
    %c0_1 = arith.constant 0 : index
    %c0_2 = arith.constant 0 : index
    %1 = vector.load %arg3[%c0_1, %c0_2] : memref<512x512xbf16, #tpu.memory_space<vmem>>, vector<512x512xbf16>
    %cst = arith.constant dense<0.000000e+00> : vector<8x512xf32>
    %2 = tpu.matmul %0, %1, %cst {dimension_numbers = #tpu.dot_dimension_numbers<[1], [0], [0], [1], [0, 0, 1, 1], [], []>} : vector<8x512xbf16>, vector<512x512xbf16>, vector<8x512xf32> -> vector<8x512xf32>
    %c0_3 = arith.constant 0 : index
    %c0_4 = arith.constant 0 : index
    %3 = vector.load %arg4[%c0_3, %c0_4] : memref<1x512xf32, #tpu.memory_space<vmem>>, vector<1x512xf32>
    %4 = vector.broadcast %3 : vector<1x512xf32> to vector<8x512xf32>
    %5 = arith.addf %2, %4 : vector<8x512xf32>
    %c0_5 = arith.constant 0 : index
    %c0_6 = arith.constant 0 : index
    %6 = vector.load %arg5[%c0_5, %c0_6] : memref<8x512xf32, #tpu.memory_space<vmem>>, vector<8x512xf32>
    %cst_7 = arith.constant 1.000000e-01 : f32
    %7 = vector.broadcast %cst_7 : f32 to vector<8x512xf32>
    %8 = arith.mulf %7, %6 : vector<8x512xf32>
    %9 = arith.addf %5, %8 : vector<8x512xf32>
    %cst_8 = arith.constant 0.000000e+00 : f32
    %10 = vector.broadcast %cst_8 : f32 to vector<8x512xf32>
    %11 = arith.cmpf oge, %9, %10 : vector<8x512xf32>
    %cst_9 = arith.constant 2.000000e-01 : f32
    %12 = vector.broadcast %cst_9 : f32 to vector<8x512xf32>
    %13 = arith.mulf %12, %9 : vector<8x512xf32>
    %14 = arith.select %11, %9, %13 : vector<8x512xi1>, vector<8x512xf32>
    %15 = arith.truncf %14 : vector<8x512xf32> to vector<8x512xbf16>
    %c0_10 = arith.constant 0 : index
    %c0_11 = arith.constant 0 : index
    %16 = vector.load %arg6[%c0_10, %c0_11] : memref<8x512xbf16, #tpu.memory_space<vmem>>, vector<8x512xbf16>
    tpu.vector_store %arg6[%c0_10, %c0_11], %15 {strides = array<i32>} : memref<8x512xbf16, #tpu.memory_space<vmem>>, vector<8x512xbf16>,
    return
  }
  func.func @transform_0(%arg0: i32, %arg1: i32) -> (i32, i32) {
    %c0_i32 = arith.constant 0 : i32
    %c0_i32_0 = arith.constant 0 : i32
    return %arg0, %c0_i32 : i32, i32
  }
  func.func @transform_1(%arg0: i32, %arg1: i32) -> (i32, i32) {
    %c0_i32 = arith.constant 0 : i32
    %c0_i32_0 = arith.constant 0 : i32
    return %c0_i32, %arg1 : i32, i32
  }
  func.func @transform_2(%arg0: i32, %arg1: i32) -> (i32, i32) {
    %c0_i32 = arith.constant 0 : i32
    %c0_i32_0 = arith.constant 0 : i32
    return %c0_i32, %arg1 : i32, i32
  }
  func.func @transform_3(%arg0: i32, %arg1: i32) -> (i32, i32) {
    %c0_i32 = arith.constant 0 : i32
    return %arg0, %arg1 : i32, i32
  }
  func.func @transform_4(%arg0: i32, %arg1: i32) -> (i32, i32) {
    %c0_i32 = arith.constant 0 : i32
    return %arg0, %arg1 : i32, i32
  }
}

module attributes {stable_mosaic.version = 11 : i64} {
  func.func @_stream_linear_kernel(%arg0: i32, %arg1: i32, %arg2: memref<8x512xbf16, #tpu.memory_space<vmem>>, %arg3: memref<512x384xbf16, #tpu.memory_space<vmem>>, %arg4: memref<1x384xf32, #tpu.memory_space<vmem>>, %arg5: memref<8x384xf32, #tpu.memory_space<vmem>>) attributes {dimension_semantics = [#tpu.dimension_semantics<parallel>, #tpu.dimension_semantics<parallel>], iteration_bounds = array<i64: 1, 2>, scalar_prefetch = 0 : i64, scratch_operands = 0 : i64, tpu.core_type = #tpu.core_type<tc>, window_params = [{transform_indices = @transform_0, window_bounds = array<i64: 8, 512>}, {transform_indices = @transform_1, window_bounds = array<i64: 512, 384>}, {transform_indices = @transform_2, window_bounds = array<i64: 1, 384>}, {transform_indices = @transform_3, window_bounds = array<i64: 8, 384>}]} {
    %c0 = arith.constant 0 : index
    %c0_0 = arith.constant 0 : index
    %0 = vector.load %arg2[%c0, %c0_0] : memref<8x512xbf16, #tpu.memory_space<vmem>>, vector<8x512xbf16>
    %c0_1 = arith.constant 0 : index
    %c0_2 = arith.constant 0 : index
    %1 = vector.load %arg3[%c0_1, %c0_2] : memref<512x384xbf16, #tpu.memory_space<vmem>>, vector<512x384xbf16>
    %cst = arith.constant dense<0.000000e+00> : vector<8x384xf32>
    %2 = tpu.matmul %0, %1, %cst {dimension_numbers = #tpu.dot_dimension_numbers<[1], [0], [0], [1], [0, 0, 1, 1], [], []>} : vector<8x512xbf16>, vector<512x384xbf16>, vector<8x384xf32> -> vector<8x384xf32>
    %c0_3 = arith.constant 0 : index
    %c0_4 = arith.constant 0 : index
    %3 = vector.load %arg4[%c0_3, %c0_4] : memref<1x384xf32, #tpu.memory_space<vmem>>, vector<1x384xf32>
    %4 = vector.broadcast %3 : vector<1x384xf32> to vector<8x384xf32>
    %5 = arith.addf %2, %4 : vector<8x384xf32>
    %6 = math.tanh %5 : vector<8x384xf32>
    %c0_5 = arith.constant 0 : index
    %c0_6 = arith.constant 0 : index
    %7 = vector.load %arg5[%c0_5, %c0_6] : memref<8x384xf32, #tpu.memory_space<vmem>>, vector<8x384xf32>
    tpu.vector_store %arg5[%c0_5, %c0_6], %6 {strides = array<i32>} : memref<8x384xf32, #tpu.memory_space<vmem>>, vector<8x384xf32>,
    return
  }
  func.func @transform_0(%arg0: i32, %arg1: i32) -> (i32, i32) {
    %c0_i32 = arith.constant 0 : i32
    %c0_i32_0 = arith.constant 0 : i32
    return %arg0, %c0_i32 : i32, i32
  }
  func.func @transform_1(%arg0: i32, %arg1: i32) -> (i32, i32) {
    %c0_i32 = arith.constant 0 : i32
    %c0_i32_0 = arith.constant 0 : i32
    return %c0_i32, %arg1 : i32, i32
  }
  func.func @transform_2(%arg0: i32, %arg1: i32) -> (i32, i32) {
    %c0_i32 = arith.constant 0 : i32
    %c0_i32_0 = arith.constant 0 : i32
    return %c0_i32, %arg1 : i32, i32
  }
  func.func @transform_3(%arg0: i32, %arg1: i32) -> (i32, i32) {
    %c0_i32 = arith.constant 0 : i32
    return %arg0, %arg1 : i32, i32
  }
}

</mosaic_0001>

<bundles_post_ra>
// kernel: forward.7
= control target key start
LH: loop header
LB: loop body
LE: loop exit
PB: predicated region body
PF: predicated region fallthrough
CT: control target
= control target key end

     0   :  { %s968_s1 = inlined_call_operand.vmem [shape: bf16[256,512], index: 1, kind: input, shape index: {}]   ;;  %s969_s0 = inlined_call_operand.vmem [shape: bf16[8,256], index: 0, kind: input, shape index: {}]   ;;  %s970_s2 = inlined_call_operand.vmem [shape: f32[1,512], index: 2, kind: input, shape index: {}]   ;;  %s971_s3 = inlined_call_operand.vmem [shape: f32[8,512], index: 3, kind: input, shape index: {}]   ;;  %s972_s4 = inlined_call_operand.vmem [shape: bf16[8,512], index: 4, kind: output, shape index: {}]  }
   0x1   :  { %v629_v0 = vld [vmem:[%s968_s1 + $0xe4] ss:$16 sps:$4 sm:$0xff]   ;;  %v631_v1 = vld [vmem:[%s968_s1 + $0xec] ss:$16 sps:$4 sm:$0xff]   ;;  %v633_v2 = vld [vmem:[%s968_s1 + $0xe0] ss:$16 sps:$4 sm:$0xff]  }
   0x2   :  { %431 = vmatprep.subr.bf16.mxu0 %v629_v0  ;;  %v634_v3 = vld [vmem:[%s968_s1 + $0xe8] ss:$16 sps:$4 sm:$0xff]   ;;  %472 = vmatprep.subr.bf16.mxu1 %v631_v1  ;;  %v635_v4 = vld [vmem:[%s968_s1 + $0xc4] ss:$16 sps:$4 sm:$0xff]   ;;  %v637_v5 = vld [vmem:[%s968_s1 + $0xcc] ss:$16 sps:$4 sm:$0xff]  }
   0x3   :  { %432 = vmatpush1.bf16.msra.mxu0 %v633_v2  ;;  %473 = vmatpush1.bf16.msra.mxu1 %v634_v3  ;;  %v639_v6 = vld [vmem:[%s968_s1 + $0xc0] ss:$16 sps:$4 sm:$0xff]   ;;  %v640_v7 = vld [vmem:[%s968_s1 + $0xc8] ss:$16 sps:$4 sm:$0xff]   ;;  %v641_v8 = vld [vmem:[%s968_s1 + $0xa4] ss:$16 sps:$4 sm:$0xff]   ;;  %v84_v3 = vlaneseq }
   0x4   :  { %433 = vmatprep.subr.bf16.mxu0 %v635_v4  ;;  %474 = vmatprep.subr.bf16.mxu1 %v637_v5  ;;  %v643_v9 = vld [vmem:[%s968_s1 + $0xac] ss:$16 sps:$4 sm:$0xff]   ;;  %v645_v10 = vld [vmem:[%s968_s1 + $0xa0] ss:$16 sps:$4 sm:$0xff]   ;;  %v646_v11 = vld [vmem:[%s968_s1 + $0xa8] ss:$16 sps:$4 sm:$0xff]  }
   0x5   :  { %v647_v12 = vld [vmem:[%s968_s1 + $0x84] ss:$16 sps:$4 sm:$0xff]   ;;  %v649_v13 = vld [vmem:[%s968_s1 + $0x8c] ss:$16 sps:$4 sm:$0xff]   ;;  %v651_v14 = vld [vmem:[%s968_s1 + $0x80] ss:$16 sps:$4 sm:$0xff]  }
   0x6   :  { %v652_v15 = vld [vmem:[%s968_s1 + $0x88] ss:$16 sps:$4 sm:$0xff]   ;;  %v653_v16 = vld [vmem:[%s968_s1 + $0x64] ss:$16 sps:$4 sm:$0xff]   ;;  %v655_v17 = vld [vmem:[%s968_s1 + $0x6c] ss:$16 sps:$4 sm:$0xff]  }
   0x7   :  { %434 = vmatpush1.bf16.msra.mxu0 %v639_v6  ;;  %475 = vmatpush1.bf16.msra.mxu1 %v640_v7  ;;  %v657_v18 = vld [vmem:[%s968_s1 + $0x60] ss:$16 sps:$4 sm:$0xff]   ;;  %v658_v19 = vld [vmem:[%s968_s1 + $0x68] ss:$16 sps:$4 sm:$0xff]   ;;  %v659_v20 = vld [vmem:[%s968_s1 + $0x44] ss:$16 sps:$4 sm:$0xff]  }
   0x8   :  { %435 = vmatprep.subr.bf16.mxu0 %v641_v8  ;;  %476 = vmatprep.subr.bf16.mxu1 %v643_v9  ;;  %v661_v21 = vld [vmem:[%s968_s1 + $0x4c] ss:$16 sps:$4 sm:$0xff]   ;;  %v663_v22 = vld [vmem:[%s968_s1 + $0x40] ss:$16 sps:$4 sm:$0xff]   ;;  %v664_v23 = vld [vmem:[%s968_s1 + $0x48] ss:$16 sps:$4 sm:$0xff]  }
   0x9   :  { %v665_v24 = vld [vmem:[%s968_s1 + $0x24] ss:$16 sps:$4 sm:$0xff]   ;;  %v667_v25 = vld [vmem:[%s968_s1 + $0x2c] ss:$16 sps:$4 sm:$0xff]   ;;  %v669_v26 = vld [vmem:[%s968_s1 + $0x20] ss:$16 sps:$4 sm:$0xff]  }
   0xa   :  { %v670_v27 = vld [vmem:[%s968_s1 + $0x28] ss:$16 sps:$4 sm:$0xff]   ;;  %v671_v28 = vld [vmem:[%s968_s1 + $0x4] ss:$16 sps:$4 sm:$0xff]   ;;  %v673_v29 = vld [vmem:[%s968_s1 + $0xc] ss:$16 sps:$4 sm:$0xff]  }
   0xb   :  { %436 = vmatpush1.bf16.msra.mxu0 %v645_v10  ;;  %477 = vmatpush1.bf16.msra.mxu1 %v646_v11  ;;  %v675_v30 = vld [vmem:[%s968_s1] ss:$16 sps:$4 sm:$0xff]   ;;  %v676_v31 = vld [vmem:[%s968_s1 + $0x8] ss:$16 sps:$4 sm:$0xff]   ;;  %v677_v32 = vld [vmem:[%s968_s1 + $0x1e4] ss:$16 sps:$4 sm:$0xff]  }
   0xc   :  { %437 = vmatprep.subr.bf16.mxu0 %v647_v12  ;;  %478 = vmatprep.subr.bf16.mxu1 %v649_v13  ;;  %v679_v33 = vld [vmem:[%s968_s1 + $0x1ec] ss:$16 sps:$4 sm:$0xff]   ;;  %v681_v34 = vld [vmem:[%s968_s1 + $0x1e0] ss:$16 sps:$4 sm:$0xff]   ;;  %v682_v35 = vld [vmem:[%s968_s1 + $0x1e8] ss:$16 sps:$4 sm:$0xff]  }
   0xd   :  { %v683_v36 = vld [vmem:[%s968_s1 + $0x1c4] ss:$16 sps:$4 sm:$0xff]   ;;  %v685_v37 = vld [vmem:[%s968_s1 + $0x1cc] ss:$16 sps:$4 sm:$0xff]   ;;  %v687_v38 = vld [vmem:[%s968_s1 + $0x1c0] ss:$16 sps:$4 sm:$0xff]  }
   0xe   :  { %v688_v39 = vld [vmem:[%s968_s1 + $0x1c8] ss:$16 sps:$4 sm:$0xff]   ;;  %v689_v40 = vld [vmem:[%s968_s1 + $0x1a4] ss:$16 sps:$4 sm:$0xff]   ;;  %v691_v41 = vld [vmem:[%s968_s1 + $0x1ac] ss:$16 sps:$4 sm:$0xff]  }
   0xf   :  { %438 = vmatpush1.bf16.msra.mxu0 %v651_v14  ;;  %479 = vmatpush1.bf16.msra.mxu1 %v652_v15  ;;  %v693_v42 = vld [vmem:[%s968_s1 + $0x1a0] ss:$16 sps:$4 sm:$0xff]   ;;  %v694_v43 = vld [vmem:[%s968_s1 + $0x1a8] ss:$16 sps:$4 sm:$0xff]   ;;  %v695_v44 = vld [vmem:[%s968_s1 + $0x184] ss:$16 sps:$4 sm:$0xff]  }
  0x10   :  { %439 = vmatprep.subr.bf16.mxu0 %v653_v16  ;;  %480 = vmatprep.subr.bf16.mxu1 %v655_v17  ;;  %v697_v45 = vld [vmem:[%s968_s1 + $0x18c] ss:$16 sps:$4 sm:$0xff]   ;;  %v17_v46 = vld [vmem:[%s969_s0] sm:$0xff]  ;;  %v700_v49 = vld [vmem:[%s968_s1 + $0x188] ss:$16 sps:$4 sm:$0xff]   ;;  %v85_v4 = vshrl.u32 %v84_v3, 7 }
  0x11   :  { %v560_v47 = vcombine.high %v17_v46, %v17_v46  ;;  %v699_v48 = vld [vmem:[%s968_s1 + $0x180] ss:$16 sps:$4 sm:$0xff]   ;;  %v701_v50 = vld [vmem:[%s968_s1 + $0x164] ss:$16 sps:$4 sm:$0xff]   ;;  %v703_v51 = vld [vmem:[%s968_s1 + $0x16c] ss:$16 sps:$4 sm:$0xff]   ;;  %v559_v2 = vcombine.low %v17_v46, %v17_v46 }
  0x12   :  { %v705_v52 = vld [vmem:[%s968_s1 + $0x160] ss:$16 sps:$4 sm:$0xff]   ;;  %v706_v53 = vld [vmem:[%s968_s1 + $0x168] ss:$16 sps:$4 sm:$0xff]   ;;  %v707_v54 = vld [vmem:[%s968_s1 + $0x144] ss:$16 sps:$4 sm:$0xff]  }
  0x13   :  { %440 = vmatpush1.bf16.msra.mxu0 %v657_v18  ;;  %481 = vmatpush1.bf16.msra.mxu1 %v658_v19  ;;  %v709_v55 = vld [vmem:[%s968_s1 + $0x14c] ss:$16 sps:$4 sm:$0xff]   ;;  %v711_v56 = vld [vmem:[%s968_s1 + $0x140] ss:$16 sps:$4 sm:$0xff]   ;;  %v712_v57 = vld [vmem:[%s968_s1 + $0x148] ss:$16 sps:$4 sm:$0xff]  }
  0x14   :  { %441 = vmatprep.subr.bf16.mxu0 %v659_v20  ;;  %482 = vmatprep.subr.bf16.mxu1 %v661_v21  ;;  %v713_v58 = vld [vmem:[%s968_s1 + $0x124] ss:$16 sps:$4 sm:$0xff]   ;;  %v715_v59 = vld [vmem:[%s968_s1 + $0x12c] ss:$16 sps:$4 sm:$0xff]   ;;  %v717_v60 = vld [vmem:[%s968_s1 + $0x120] ss:$16 sps:$4 sm:$0xff]  }
  0x15   :  { %463 = vmatprep.mubr.bf16.mxu0 %v560_v47  ;;  %504 = vmatprep.mubr.bf16.mxu1 %v560_v47  ;;  %v718_v61 = vld [vmem:[%s968_s1 + $0x128] ss:$16 sps:$4 sm:$0xff]   ;;  %v719_v62 = vld [vmem:[%s968_s1 + $0x104] ss:$16 sps:$4 sm:$0xff]   ;;  %v721_v63 = vld [vmem:[%s968_s1 + $0x10c] ss:$16 sps:$4 sm:$0xff]  }
  0x16   :  { %v723_v0 = vld [vmem:[%s968_s1 + $0x100] ss:$16 sps:$4 sm:$0xff]   ;;  %v724_v1 = vld [vmem:[%s968_s1 + $0x108] ss:$16 sps:$4 sm:$0xff]   ;;  %v86_v5 = vsub.s32 0, %v85_v4  ;;  %v94_v6 = vsub.s32 2, %v85_v4 }
  0x17   :  { %442 = vmatpush1.bf16.msra.mxu0 %v663_v22  ;;  %483 = vmatpush1.bf16.msra.mxu1 %v664_v23  ;;  %v82_v7 = vld [vmem:[%s970_s2] sm:$0xf]  ;;  %v90_v8 = vsub.s32 1, %v85_v4  ;;  %v98_v9 = vsub.s32 3, %v85_v4  ;;  %v515_v11 = vld [vmem:[%s971_s3 + $0x10] sm:$0xff]  ;;  %v514_v17 = vld [vmem:[%s971_s3 + $0x8] sm:$0xff] }
  0x18   :  { %443 = vmatprep.subr.bf16.mxu0 %v665_v24  ;;  %484 = vmatprep.subr.bf16.mxu1 %v667_v25  ;;  %v513_v10 = vld [vmem:[%s971_s3] sm:$0xff]  ;;  %v87_v12 = vrot.slane %v82_v7, %v86_v5  ;;  %v95_v13 = vrot.slane %v82_v7, %v94_v6  ;;  %v519_v15 = vmul.f32 0.1, %v515_v11  ;;  %v516_v19 = vld [vmem:[%s971_s3 + $0x18] sm:$0xff]  ;;  %v518_v25 = vmul.f32 0.1, %v514_v17 }
  0x19   :  { %v517_v14 = vmul.f32 0.1, %v513_v10  ;;  %v91_v16 = vrot.slane %v82_v7, %v90_v8  ;;  %v99_v18 = vrot.slane %v82_v7, %v98_v9 }
  0x1b   :  { %444 = vmatpush1.bf16.msra.mxu0 %v669_v26  ;;  %485 = vmatpush1.bf16.msra.mxu1 %v670_v27  ;;  %v520_v27 = vmul.f32 0.1, %v516_v19 }
  0x1c   :  { %445 = vmatprep.subr.bf16.mxu0 %v671_v28  ;;  %486 = vmatprep.subr.bf16.mxu1 %v673_v29 }
  0x1f   :  { %446 = vmatpush1.bf16.msra.mxu0 %v675_v30  ;;  %487 = vmatpush1.bf16.msra.mxu1 %v676_v31 }
  0x20   :  { %447 = vmatprep.subr.bf16.mxu0 %v677_v32  ;;  %488 = vmatprep.subr.bf16.mxu1 %v679_v33 }
  0x23   :  { %448 = vmatpush2.bf16.msra.mxu0 %v681_v34  ;;  %489 = vmatpush2.bf16.msra.mxu1 %v682_v35 }
  0x24   :  { %449 = vmatprep.subr.bf16.mxu0 %v683_v36  ;;  %490 = vmatprep.subr.bf16.mxu1 %v685_v37 }
  0x27   :  { %450 = vmatpush2.bf16.msra.mxu0 %v687_v38  ;;  %491 = vmatpush2.bf16.msra.mxu1 %v688_v39 }
  0x28   :  { %451 = vmatprep.subr.bf16.mxu0 %v689_v40  ;;  %492 = vmatprep.subr.bf16.mxu1 %v691_v41 }
  0x2b   :  { %452 = vmatpush2.bf16.msra.mxu0 %v693_v42  ;;  %493 = vmatpush2.bf16.msra.mxu1 %v694_v43 }
  0x2c   :  { %453 = vmatprep.subr.bf16.mxu0 %v695_v44  ;;  %494 = vmatprep.subr.bf16.mxu1 %v697_v45 }
  0x2f   :  { %454 = vmatpush2.bf16.msra.mxu0 %v699_v48  ;;  %495 = vmatpush2.bf16.msra.mxu1 %v700_v49 }
  0x30   :  { %455 = vmatprep.subr.bf16.mxu0 %v701_v50  ;;  %496 = vmatprep.subr.bf16.mxu1 %v703_v51 }
  0x33   :  { %456 = vmatpush2.bf16.msra.mxu0 %v705_v52  ;;  %497 = vmatpush2.bf16.msra.mxu1 %v706_v53 }
  0x34   :  { %457 = vmatprep.subr.bf16.mxu0 %v707_v54  ;;  %498 = vmatprep.subr.bf16.mxu1 %v709_v55 }
  0x37   :  { %458 = vmatpush2.bf16.msra.mxu0 %v711_v56  ;;  %499 = vmatpush2.bf16.msra.mxu1 %v712_v57 }
  0x38   :  { %459 = vmatprep.subr.bf16.mxu0 %v713_v58  ;;  %500 = vmatprep.subr.bf16.mxu1 %v715_v59 }
  0x3b   :  { %460 = vmatpush2.bf16.msra.mxu0 %v717_v60  ;;  %501 = vmatpush2.bf16.msra.mxu1 %v718_v61 }
  0x3c   :  { %461 = vmatprep.subr.bf16.mxu0 %v719_v62  ;;  %502 = vmatprep.subr.bf16.mxu1 %v721_v63 }
  0x3f   :  { %462 = vmatpush2.bf16.msra.mxu0 %v723_v0  ;;  %503 = vmatpush2.bf16.msra.mxu1 %v724_v1 }
  0x42   :  { %464 = vmatmul.mubr.bf16.vlgmr.msra.gmra.mxu0 %v559_v2  ;;  %505 = vmatmul.mubr.bf16.vlgmr.msra.gmra.mxu1 %v559_v2 }
 0x102   :  { %v465_v20 = vpop.f32.mrf.mxu0  ;;  %v506_v21 = vpop.f32.mrf.mxu1 }
 0x103   :  { %v466_v22 = vadd.f32 %v465_v20, %v87_v12  ;;  %v507_v23 = vadd.f32 %v506_v21, %v95_v13 }
 0x104   :  { %v467_v24 = vpop.f32.mrf.mxu0  ;;  %v508_v26 = vpop.f32.mrf.mxu1 }
 0x105   :  { %v521_v28 = vadd.f32 %v517_v14, %v466_v22  ;;  %v523_v29 = vadd.f32 %v519_v15, %v507_v23  ;;  %v468_v30 = vadd.f32 %v467_v24, %v91_v16  ;;  %v509_v31 = vadd.f32 %v508_v26, %v99_v18 }
 0x106   :  { %v469_v32 = vpop.f32.mrf.mxu0  ;;  %v510_v33 = vpop.f32.mrf.mxu1 }
 0x107   :  { %v529_v34 = vmul.f32 0.2, %v521_v28  ;;  %v531_v35 = vmul.f32 0.2, %v523_v29  ;;  %v522_v36 = vadd.f32 %v518_v25, %v468_v30  ;;  %v524_v37 = vadd.f32 %v520_v27, %v509_v31 }
 0x108   :  { %v470_v38 = vpop.f32.mrf.mxu0  ;;  %v511_v39 = vpop.f32.mrf.mxu1  ;;  %vm525_vm0 = vcmp.ge.f32.partialorder %v521_v28, 0.0  ;;  %vm527_vm1 = vcmp.ge.f32.partialorder %v523_v29, 0.0 }
 0x109   :  { %vm526_vm2 = vcmp.ge.f32.partialorder %v522_v36, 0.0  ;;  %v530_v40 = vmul.f32 0.2, %v522_v36  ;;  %vm528_vm3 = vcmp.ge.f32.partialorder %v524_v37, 0.0  ;;  %v532_v41 = vmul.f32 0.2, %v524_v37 }
 0x10a   :  { %v533_v42 = vsel %vm525_vm0, %v521_v28, %v529_v34  ;;  %v535_v43 = vsel %vm527_vm1, %v523_v29, %v531_v35 }
 0x10b   :  { %v534_v44 = vsel %vm526_vm2, %v522_v36, %v530_v40  ;;  %v536_v45 = vsel %vm528_vm3, %v524_v37, %v532_v41 }
 0x10c   :  { %v627_v46 = vpack.c.bf16 %v534_v44, %v533_v42  ;;  %v628_v47 = vpack.c.bf16 %v536_v45, %v535_v43 }
 0x10e   :  { %553 = vst [vmem:[%s972_s4] sm:$0xff] %v627_v46  ;;  %554 = vst [vmem:[%s972_s4 + $0x8] sm:$0xff] %v628_v47 }

// kernel: forward.6
= control target key start
LH: loop header
LB: loop body
LE: loop exit
PB: predicated region body
PF: predicated region fallthrough
CT: control target
= control target key end

     0   :  { %v1382_v0 = vmov 0.0   ;;  %vm1383_vm0 = vmmov 0   ;;  %vm78_vm1 = vcmask 261120   ;;  %v1384_v20 = vmov 0   ;;  %s1872_s1 = inlined_call_operand.vmem [shape: bf16[32,128], index: 1, kind: input, shape index: {}]   ;;  %s1873_s4 = inlined_call_operand.vmem [shape: bf16[128,256], index: 4, kind: input, shape index: {}]   ;;  %s1874_s0 = inlined_call_operand.vmem [shape: bf16[8,32], index: 0, kind: input, shape index: {}]   ;;  %s1875_s7 = inlined_call_operand.vmem [shape: bf16[256,256], index: 7, kind: input, shape index: {}]   ;;  %s1876_s3 = inlined_call_operand.vmem [shape: f32[8,128], index: 3, kind: input, shape index: {}]   ;;  %s1877_s2 = inlined_call_operand.vmem [shape: f32[1,128], index: 2, kind: input, shape index: {}]   ;;  %s1878_s10 = inlined_call_operand.vmem [shape: bf16[256,256], index: 10, kind: input, shape index: {}]   ;;  %s1879_s5 = inlined_call_operand.vmem [shape: f32[1,256], index: 5, kind: input, shape index: {}]   ;;  %s1880_s6 = inlined_call_operand.vmem [shape: f32[8,256], index: 6, kind: input, shape index: {}]   ;;  %s1881_s13 = inlined_call_operand.vmem [shape: bf16[256,256], index: 13, kind: input, shape index: {}]   ;;  %s1882_s8 = inlined_call_operand.vmem [shape: f32[1,256], index: 8, kind: input, shape index: {}]   ;;  %s1883_s9 = inlined_call_operand.vmem [shape: f32[8,256], index: 9, kind: input, shape index: {}]   ;;  %s1884_s11 = inlined_call_operand.vmem [shape: f32[1,256], index: 11, kind: input, shape index: {}]   ;;  %s1885_s12 = inlined_call_operand.vmem [shape: f32[8,256], index: 12, kind: input, shape index: {}]   ;;  %s1886_s14 = inlined_call_operand.vmem [shape: f32[1,256], index: 14, kind: input, shape index: {}]   ;;  %s1887_s15 = inlined_call_operand.vmem [shape: f32[8,256], index: 15, kind: input, shape index: {}]   ;;  %s1888_s16 = inlined_call_operand.vmem [shape: bf16[8,256], index: 16, kind: output, shape index: {}]  }
   0x1   :  { %1890 = sst [smem:[#allocation2_spill]] %s1872_s1  ;;  %1201 = vmatprep.subr.bf16.mxu1 %v1382_v0  ;;  %1205 = vmatprep.mubr.msk.bf16.mxu1 %vm1383_vm0, %v1382_v0  ;;  %v1216_v3 = vld [vmem:[%s1873_s4 + $0x74] ss:$8 sps:$4 sm:$0xff]   ;;  %v54_v4 = vld [vmem:[%s1874_s0] sm:$0xf] }
   0x2   :  { %s1891_s23 = sld [smem:[#allocation2_spill]]  ;;  %v1214_v5 = vld [vmem:[%s1873_s4 + $0x70] ss:$8 sps:$4 sm:$0xff]   ;;  %v1219_v6 = vld [vmem:[%s1873_s4 + $0x64] ss:$8 sps:$4 sm:$0xff]  }
   0x3   :  { %v1217_v7 = vld [vmem:[%s1873_s4 + $0x60] ss:$8 sps:$4 sm:$0xff]   ;;  %v1222_v8 = vld [vmem:[%s1873_s4 + $0x54] ss:$8 sps:$4 sm:$0xff]   ;;  %v1220_v9 = vld [vmem:[%s1873_s4 + $0x50] ss:$8 sps:$4 sm:$0xff]  }
   0x4   :  { %v1225_v10 = vld [vmem:[%s1873_s4 + $0x44] ss:$8 sps:$4 sm:$0xff]   ;;  %v1223_v11 = vld [vmem:[%s1873_s4 + $0x40] ss:$8 sps:$4 sm:$0xff]   ;;  %v1228_v12 = vld [vmem:[%s1873_s4 + $0x34] ss:$8 sps:$4 sm:$0xff]  }
   0x5   :  { %v1226_v13 = vld [vmem:[%s1873_s4 + $0x30] ss:$8 sps:$4 sm:$0xff]   ;;  %v1231_v14 = vld [vmem:[%s1873_s4 + $0x24] ss:$8 sps:$4 sm:$0xff]   ;;  %v1229_v15 = vld [vmem:[%s1873_s4 + $0x20] ss:$8 sps:$4 sm:$0xff]  }
   0x6   :  { %v1234_v16 = vld [vmem:[%s1873_s4 + $0x14] ss:$8 sps:$4 sm:$0xff]   ;;  %v1232_v17 = vld [vmem:[%s1873_s4 + $0x10] ss:$8 sps:$4 sm:$0xff]   ;;  %v1237_v18 = vld [vmem:[%s1873_s4 + $0x4] ss:$8 sps:$4 sm:$0xff]  }
   0x7   :  { %v1235_v19 = vld [vmem:[%s1873_s4] ss:$8 sps:$4 sm:$0xff]   ;;  %v1238_v21 = vld [vmem:[%s1875_s7 + $0x74] ss:$8 sps:$4 sm:$0xff]   ;;  %v1240_v22 = vld [vmem:[%s1875_s7 + $0x70] ss:$8 sps:$4 sm:$0xff]  }
   0x8   :  { %v1212_v1 = vld [vmem:[%s1891_s23 + $0x8] sm:$0xff]   ;;  %v1213_v2 = vld [vmem:[%s1891_s23] sm:$0xff]   ;;  %496 = vmatprep.subr.bf16.mxu0 %v1238_v21  ;;  %v1244_v25 = vld [vmem:[%s1875_s7 + $0x54] ss:$8 sps:$4 sm:$0xff]  }
   0x9   :  { %1202 = vmatpush3.bf16.msra.mxu1 %v1212_v1  ;;  %v1241_v23 = vld [vmem:[%s1875_s7 + $0x64] ss:$8 sps:$4 sm:$0xff]   ;;  %497 = vmatpush1.bf16.msra.mxu0 %v1240_v22  ;;  %v1243_v24 = vld [vmem:[%s1875_s7 + $0x60] ss:$8 sps:$4 sm:$0xff]   ;;  %v1246_v26 = vld [vmem:[%s1875_s7 + $0x50] ss:$8 sps:$4 sm:$0xff]  }
   0xa   :  { %1203 = vmatprep.subr.bf16.mxu1 %v1382_v0  ;;  %498 = vmatprep.subr.bf16.mxu0 %v1241_v23  ;;  %v1247_v27 = vld [vmem:[%s1875_s7 + $0x44] ss:$8 sps:$4 sm:$0xff]   ;;  %v1249_v28 = vld [vmem:[%s1875_s7 + $0x40] ss:$8 sps:$4 sm:$0xff]   ;;  %v1250_v29 = vld [vmem:[%s1875_s7 + $0x34] ss:$8 sps:$4 sm:$0xff]  }
   0xb   :  { %v1252_v30 = vld [vmem:[%s1875_s7 + $0x30] ss:$8 sps:$4 sm:$0xff]   ;;  %v1253_v31 = vld [vmem:[%s1875_s7 + $0x24] ss:$8 sps:$4 sm:$0xff]   ;;  %v1255_v32 = vld [vmem:[%s1875_s7 + $0x20] ss:$8 sps:$4 sm:$0xff]  }
   0xc   :  { %v1256_v33 = vld [vmem:[%s1875_s7 + $0x14] ss:$8 sps:$4 sm:$0xff]   ;;  %v1258_v34 = vld [vmem:[%s1875_s7 + $0x10] ss:$8 sps:$4 sm:$0xff]   ;;  %v1259_v35 = vld [vmem:[%s1875_s7 + $0x4] ss:$8 sps:$4 sm:$0xff]  }
   0xd   :  { %1204 = vmatpush3.bf16.msra.mxu1 %v1213_v2  ;;  %499 = vmatpush1.bf16.msra.mxu0 %v1243_v24  ;;  %v1261_v36 = vld [vmem:[%s1875_s7] ss:$8 sps:$4 sm:$0xff]   ;;  %v1262_v37 = vld [vmem:[%s1875_s7 + $0xf4] ss:$8 sps:$4 sm:$0xff]   ;;  %v1264_v38 = vld [vmem:[%s1875_s7 + $0xf0] ss:$8 sps:$4 sm:$0xff]  }
   0xe   :  { %237 = vmatprep.subr.bf16.mxu1 %v1216_v3  ;;  %500 = vmatprep.subr.bf16.mxu0 %v1244_v25  ;;  %v1265_v39 = vld [vmem:[%s1875_s7 + $0xe4] ss:$8 sps:$4 sm:$0xff]   ;;  %v1267_v40 = vld [vmem:[%s1875_s7 + $0xe0] ss:$8 sps:$4 sm:$0xff]   ;;  %v1268_v41 = vld [vmem:[%s1875_s7 + $0xd4] ss:$8 sps:$4 sm:$0xff]  }
   0xf   :  { %v1270_v42 = vld [vmem:[%s1875_s7 + $0xd0] ss:$8 sps:$4 sm:$0xff]   ;;  %v1271_v43 = vld [vmem:[%s1875_s7 + $0xc4] ss:$8 sps:$4 sm:$0xff]   ;;  %v1273_v44 = vld [vmem:[%s1875_s7 + $0xc0] ss:$8 sps:$4 sm:$0xff]  }
  0x10   :  { %1206 = vmatmul.mubr.msk.bf16.vlgmr.msra.gmra.mxu1 %vm78_vm1, %v54_v4  ;;  %v1274_v45 = vld [vmem:[%s1875_s7 + $0xb4] ss:$8 sps:$4 sm:$0xff]   ;;  %v1276_v46 = vld [vmem:[%s1875_s7 + $0xb0] ss:$8 sps:$4 sm:$0xff]   ;;  %v122_v47 = vld [vmem:[%s1876_s3] sm:$0xff] }
  0x11   :  { %238 = vmatpush1.bf16.msra.mxu1 %v1214_v5  ;;  %269 = vmatprep.mubr.bf16.mxu1 %v1384_v20  ;;  %v1080_v48 = vld [vmem:[%s1877_s2] ss:$0 sm:$0xff]  ;;  %v123_v49 = vmul.f32 0.1, %v122_v47  ;;  %v1277_v59 = vld [vmem:[%s1875_s7 + $0xa4] ss:$8 sps:$4 sm:$0xff]  }
  0x12   :  { %239 = vmatprep.subr.bf16.mxu1 %v1219_v6  ;;  %501 = vmatpush1.bf16.msra.mxu0 %v1246_v26  ;;  %v1279_v60 = vld [vmem:[%s1875_s7 + $0xa0] ss:$8 sps:$4 sm:$0xff]   ;;  %v1280_v61 = vld [vmem:[%s1875_s7 + $0x94] ss:$8 sps:$4 sm:$0xff]   ;;  %v1282_v62 = vld [vmem:[%s1875_s7 + $0x90] ss:$8 sps:$4 sm:$0xff]  }
  0x13   :  { %502 = vmatprep.subr.bf16.mxu0 %v1247_v27  ;;  %v1283_v63 = vld [vmem:[%s1875_s7 + $0x84] ss:$8 sps:$4 sm:$0xff]   ;;  %v1285_v0 = vld [vmem:[%s1875_s7 + $0x80] ss:$8 sps:$4 sm:$0xff]   ;;  %v1286_v1 = vld [vmem:[%s1878_s10 + $0x70] ss:$8 sps:$4 sm:$0xff]   ;;  %v147_v27 = vlaneseq }
  0x14   :  { %v1288_v2 = vld [vmem:[%s1878_s10 + $0x74] ss:$8 sps:$4 sm:$0xff]   ;;  %v1291_v3 = vld [vmem:[%s1878_s10 + $0x64] ss:$8 sps:$4 sm:$0xff]   ;;  %v1289_v4 = vld [vmem:[%s1878_s10 + $0x60] ss:$8 sps:$4 sm:$0xff]  }
  0x15   :  { %240 = vmatpush1.bf16.msra.mxu1 %v1217_v7  ;;  %v1294_v5 = vld [vmem:[%s1878_s10 + $0x54] ss:$8 sps:$4 sm:$0xff]   ;;  %v1292_v6 = vld [vmem:[%s1878_s10 + $0x50] ss:$8 sps:$4 sm:$0xff]   ;;  %v1297_v7 = vld [vmem:[%s1878_s10 + $0x44] ss:$8 sps:$4 sm:$0xff]  }
  0x16   :  { %241 = vmatprep.subr.bf16.mxu1 %v1222_v8  ;;  %503 = vmatpush1.bf16.msra.mxu0 %v1249_v28  ;;  %v1295_v8 = vld [vmem:[%s1878_s10 + $0x40] ss:$8 sps:$4 sm:$0xff]   ;;  %v1318_v21 = vld [vmem:[%s1878_s10 + $0xd4] ss:$8 sps:$4 sm:$0xff]   ;;  %v1316_v22 = vld [vmem:[%s1878_s10 + $0xd0] ss:$8 sps:$4 sm:$0xff]  }
  0x17   :  { %504 = vmatprep.subr.bf16.mxu0 %v1250_v29  ;;  %v1313_v20 = vld [vmem:[%s1878_s10 + $0xe0] ss:$8 sps:$4 sm:$0xff]   ;;  %v1321_v23 = vld [vmem:[%s1878_s10 + $0xc4] ss:$8 sps:$4 sm:$0xff]   ;;  %v1324_v25 = vld [vmem:[%s1878_s10 + $0xb4] ss:$8 sps:$4 sm:$0xff]  }
  0x18   :  { %v1319_v24 = vld [vmem:[%s1878_s10 + $0xc0] ss:$8 sps:$4 sm:$0xff]   ;;  %v1322_v26 = vld [vmem:[%s1878_s10 + $0xb0] ss:$8 sps:$4 sm:$0xff]   ;;  %v148_v28 = vshrl.u32 %v147_v27, 7 }
  0x19   :  { %242 = vmatpush1.bf16.msra.mxu1 %v1220_v9  ;;  %v1300_v9 = vld [vmem:[%s1878_s10 + $0x34] ss:$8 sps:$4 sm:$0xff]  }
  0x1a   :  { %243 = vmatprep.subr.bf16.mxu1 %v1225_v10  ;;  %505 = vmatpush1.bf16.msra.mxu0 %v1252_v30  ;;  %v1298_v10 = vld [vmem:[%s1878_s10 + $0x30] ss:$8 sps:$4 sm:$0xff]   ;;  %v1707_v29 = vsub.s32 0, %v148_v28  ;;  %v144_v30 = vld [vmem:[%s1879_s5] sm:$0x3] }
  0x1b   :  { %506 = vmatprep.subr.bf16.mxu0 %v1253_v31  ;;  %v1712_v31 = vsub.s32 1, %v148_v28 }
  0x1d   :  { %244 = vmatpush1.bf16.msra.mxu1 %v1223_v11  ;;  %v1303_v11 = vld [vmem:[%s1878_s10 + $0x24] ss:$8 sps:$4 sm:$0xff]  }
  0x1e   :  { %245 = vmatprep.subr.bf16.mxu1 %v1228_v12  ;;  %507 = vmatpush1.bf16.msra.mxu0 %v1255_v32  ;;  %v1301_v12 = vld [vmem:[%s1878_s10 + $0x20] ss:$8 sps:$4 sm:$0xff]  }
  0x1f   :  { %508 = vmatprep.subr.bf16.mxu0 %v1256_v33  ;;  %v278_v32 = vld [vmem:[%s1880_s6] sm:$0xff]  ;;  %v150_v33 = vrot.slane %v144_v30, %v1707_v29 }
  0x21   :  { %246 = vmatpush1.bf16.msra.mxu1 %v1226_v13  ;;  %v1306_v13 = vld [vmem:[%s1878_s10 + $0x14] ss:$8 sps:$4 sm:$0xff]  }
  0x22   :  { %247 = vmatprep.subr.bf16.mxu1 %v1231_v14  ;;  %509 = vmatpush1.bf16.msra.mxu0 %v1258_v34  ;;  %v1304_v14 = vld [vmem:[%s1878_s10 + $0x10] ss:$8 sps:$4 sm:$0xff]   ;;  %v279_v34 = vld [vmem:[%s1880_s6 + $0x8] sm:$0xff] }
  0x23   :  { %510 = vmatprep.subr.bf16.mxu0 %v1259_v35  ;;  %v280_v35 = vmul.f32 0.1, %v278_v32 }
  0x25   :  { %248 = vmatpush1.bf16.msra.mxu1 %v1229_v15  ;;  %v1309_v15 = vld [vmem:[%s1878_s10 + $0x4] ss:$8 sps:$4 sm:$0xff]  }
  0x26   :  { %249 = vmatprep.subr.bf16.mxu1 %v1234_v16  ;;  %511 = vmatpush1.bf16.msra.mxu0 %v1261_v36  ;;  %v1307_v16 = vld [vmem:[%s1878_s10] ss:$8 sps:$4 sm:$0xff]   ;;  %v154_v36 = vrot.slane %v144_v30, %v1712_v31 }
  0x27   :  { %512 = vmatprep.subr.bf16.mxu0 %v1262_v37 }
  0x29   :  { %250 = vmatpush1.bf16.msra.mxu1 %v1232_v17  ;;  %v1312_v17 = vld [vmem:[%s1878_s10 + $0xf4] ss:$8 sps:$4 sm:$0xff]  }
  0x2a   :  { %251 = vmatprep.subr.bf16.mxu1 %v1237_v18  ;;  %513 = vmatpush2.bf16.msra.mxu0 %v1264_v38  ;;  %v1310_v18 = vld [vmem:[%s1878_s10 + $0xf0] ss:$8 sps:$4 sm:$0xff]  }
  0x2b   :  { %514 = vmatprep.subr.bf16.mxu0 %v1265_v39  ;;  %v281_v39 = vmul.f32 0.1, %v279_v34 }
  0x2d   :  { %252 = vmatpush1.bf16.msra.mxu1 %v1235_v19  ;;  %v1315_v19 = vld [vmem:[%s1878_s10 + $0xe4] ss:$8 sps:$4 sm:$0xff]  }
  0x2e   :  { %515 = vmatpush2.bf16.msra.mxu0 %v1267_v40  ;;  %755 = vmatprep.subr.bf16.mxu1 %v1288_v2  ;;  %v1348_v2 = vld [vmem:[%s1881_s13 + $0x34] ss:$8 sps:$4 sm:$0xff]  }
  0x2f   :  { %516 = vmatprep.subr.bf16.mxu0 %v1268_v41 }
  0x32   :  { %517 = vmatpush2.bf16.msra.mxu0 %v1270_v42 }
  0x33   :  { %518 = vmatprep.subr.bf16.mxu0 %v1271_v43 }
  0x36   :  { %519 = vmatpush2.bf16.msra.mxu0 %v1273_v44 }
  0x37   :  { %520 = vmatprep.subr.bf16.mxu0 %v1274_v45 }
  0x3a   :  { %521 = vmatpush2.bf16.msra.mxu0 %v1276_v46 }
  0x3b   :  { %522 = vmatprep.subr.bf16.mxu0 %v1277_v59  ;;  %v1336_v59 = vld [vmem:[%s1881_s13 + $0x74] ss:$8 sps:$4 sm:$0xff]  }
  0x3e   :  { %523 = vmatpush2.bf16.msra.mxu0 %v1279_v60  ;;  %v1339_v60 = vld [vmem:[%s1881_s13 + $0x64] ss:$8 sps:$4 sm:$0xff]  }
  0x3f   :  { %524 = vmatprep.subr.bf16.mxu0 %v1280_v61  ;;  %v1337_v61 = vld [vmem:[%s1881_s13 + $0x60] ss:$8 sps:$4 sm:$0xff]  }
  0x42   :  { %525 = vmatpush2.bf16.msra.mxu0 %v1282_v62  ;;  %v1342_v62 = vld [vmem:[%s1881_s13 + $0x54] ss:$8 sps:$4 sm:$0xff]  }
  0x43   :  { %526 = vmatprep.subr.bf16.mxu0 %v1283_v63  ;;  %v1340_v63 = vld [vmem:[%s1881_s13 + $0x50] ss:$8 sps:$4 sm:$0xff]  }
  0x46   :  { %527 = vmatpush2.bf16.msra.mxu0 %v1285_v0  ;;  %v1345_v0 = vld [vmem:[%s1881_s13 + $0x44] ss:$8 sps:$4 sm:$0xff]  }
  0x47   :  { %1014 = vmatprep.subr.bf16.mxu0 %v1336_v59 }
  0xd0   :  { %v116_v50 = vpop.f32.mrf.mxu1 }
  0xd1   :  { %v117_v51 = vadd.f32 %v1080_v48, %v116_v50 }
  0xd2   :  { %v1207_v52 = vpop.f32.mrf.mxu1 }
  0xd3   :  { %v124_v53 = vadd.f32 %v123_v49, %v117_v51  ;;  %v1327_v52 = vld [vmem:[%s1878_s10 + $0xa4] ss:$8 sps:$4 sm:$0xff]  }
  0xd4   :  { %v119_v54 = vpop.f32.mrf.mxu1 }
  0xd5   :  { %vm125_vm2 = vcmp.ge.f32.partialorder %v124_v53, 0.0  ;;  %v126_v55 = vmul.f32 0.2, %v124_v53  ;;  %v1330_v54 = vld [vmem:[%s1878_s10 + $0x94] ss:$8 sps:$4 sm:$0xff]  }
  0xd6   :  { %v1208_v56 = vpop.f32.mrf.mxu1 }
  0xd7   :  { %v127_v57 = vsel %vm125_vm2, %v124_v53, %v126_v55  ;;  %v1325_v53 = vld [vmem:[%s1878_s10 + $0xa0] ss:$8 sps:$4 sm:$0xff]   ;;  %v1328_v55 = vld [vmem:[%s1878_s10 + $0x90] ss:$8 sps:$4 sm:$0xff]   ;;  %v1333_v56 = vld [vmem:[%s1878_s10 + $0x84] ss:$8 sps:$4 sm:$0xff]  }
  0xd8   :  { %v145_v58 = vpack.c.bf16 %v127_v57, %v127_v57  ;;  %v1331_v57 = vld [vmem:[%s1878_s10 + $0x80] ss:$8 sps:$4 sm:$0xff]  }
  0xda   :  { %270 = vmatmul.mubr.bf16.vlgmr.msra.gmra.mxu1 %v145_v58  ;;  %v1334_v58 = vld [vmem:[%s1881_s13 + $0x70] ss:$8 sps:$4 sm:$0xff]  }
  0xdb   :  { %756 = vmatpush1.bf16.msra.mxu1 %v1286_v1  ;;  %v1343_v1 = vld [vmem:[%s1881_s13 + $0x40] ss:$8 sps:$4 sm:$0xff]  }
  0xdc   :  { %757 = vmatprep.subr.bf16.mxu1 %v1291_v3  ;;  %v1346_v3 = vld [vmem:[%s1881_s13 + $0x30] ss:$8 sps:$4 sm:$0xff]  }
  0xdf   :  { %758 = vmatpush1.bf16.msra.mxu1 %v1289_v4  ;;  %v1351_v4 = vld [vmem:[%s1881_s13 + $0x24] ss:$8 sps:$4 sm:$0xff]  }
  0xe0   :  { %759 = vmatprep.subr.bf16.mxu1 %v1294_v5  ;;  %v1349_v5 = vld [vmem:[%s1881_s13 + $0x20] ss:$8 sps:$4 sm:$0xff]  }
  0xe3   :  { %760 = vmatpush1.bf16.msra.mxu1 %v1292_v6  ;;  %v1354_v6 = vld [vmem:[%s1881_s13 + $0x14] ss:$8 sps:$4 sm:$0xff]  }
  0xe4   :  { %761 = vmatprep.subr.bf16.mxu1 %v1297_v7  ;;  %v1352_v7 = vld [vmem:[%s1881_s13 + $0x10] ss:$8 sps:$4 sm:$0xff]  }
  0xe7   :  { %762 = vmatpush1.bf16.msra.mxu1 %v1295_v8  ;;  %v1357_v8 = vld [vmem:[%s1881_s13 + $0x4] ss:$8 sps:$4 sm:$0xff]  }
  0xe8   :  { %763 = vmatprep.subr.bf16.mxu1 %v1300_v9  ;;  %v1355_v9 = vld [vmem:[%s1881_s13] ss:$8 sps:$4 sm:$0xff]  }
  0xeb   :  { %764 = vmatpush1.bf16.msra.mxu1 %v1298_v10  ;;  %v1360_v10 = vld [vmem:[%s1881_s13 + $0xf4] ss:$8 sps:$4 sm:$0xff]  }
  0xec   :  { %765 = vmatprep.subr.bf16.mxu1 %v1303_v11  ;;  %v1358_v11 = vld [vmem:[%s1881_s13 + $0xf0] ss:$8 sps:$4 sm:$0xff]  }
  0xef   :  { %766 = vmatpush1.bf16.msra.mxu1 %v1301_v12  ;;  %v1363_v12 = vld [vmem:[%s1881_s13 + $0xe4] ss:$8 sps:$4 sm:$0xff]  }
  0xf0   :  { %767 = vmatprep.subr.bf16.mxu1 %v1306_v13  ;;  %v1361_v13 = vld [vmem:[%s1881_s13 + $0xe0] ss:$8 sps:$4 sm:$0xff]  }
  0xf3   :  { %768 = vmatpush1.bf16.msra.mxu1 %v1304_v14  ;;  %v1366_v14 = vld [vmem:[%s1881_s13 + $0xd4] ss:$8 sps:$4 sm:$0xff]  }
  0xf4   :  { %769 = vmatprep.subr.bf16.mxu1 %v1309_v15  ;;  %v1364_v15 = vld [vmem:[%s1881_s13 + $0xd0] ss:$8 sps:$4 sm:$0xff]  }
  0xf7   :  { %770 = vmatpush1.bf16.msra.mxu1 %v1307_v16  ;;  %v1369_v16 = vld [vmem:[%s1881_s13 + $0xc4] ss:$8 sps:$4 sm:$0xff]  }
  0xf8   :  { %771 = vmatprep.subr.bf16.mxu1 %v1312_v17  ;;  %v1367_v17 = vld [vmem:[%s1881_s13 + $0xc0] ss:$8 sps:$4 sm:$0xff]  }
  0xfb   :  { %772 = vmatpush2.bf16.msra.mxu1 %v1310_v18  ;;  %v1372_v18 = vld [vmem:[%s1881_s13 + $0xb4] ss:$8 sps:$4 sm:$0xff]  }
  0xfc   :  { %773 = vmatprep.subr.bf16.mxu1 %v1315_v19  ;;  %v1370_v19 = vld [vmem:[%s1881_s13 + $0xb0] ss:$8 sps:$4 sm:$0xff]  }
  0xff   :  { %774 = vmatpush2.bf16.msra.mxu1 %v1313_v20  ;;  %v322_v20 = vld [vmem:[%s1882_s8] sm:$0x3] }
 0x100   :  { %775 = vmatprep.subr.bf16.mxu1 %v1318_v21  ;;  %v537_v21 = vld [vmem:[%s1883_s9] sm:$0xff] }
 0x103   :  { %776 = vmatpush2.bf16.msra.mxu1 %v1316_v22  ;;  %v329_v22 = vrot.slane %v322_v20, %v1707_v29 }
 0x104   :  { %777 = vmatprep.subr.bf16.mxu1 %v1321_v23  ;;  %v538_v23 = vld [vmem:[%s1883_s9 + $0x8] sm:$0xff] }
 0x105   :  { %v540_v28 = vmul.f32 0.1, %v538_v23 }
 0x107   :  { %778 = vmatpush2.bf16.msra.mxu1 %v1319_v24  ;;  %v539_v24 = vmul.f32 0.1, %v537_v21 }
 0x108   :  { %779 = vmatprep.subr.bf16.mxu1 %v1324_v25  ;;  %v333_v25 = vrot.slane %v322_v20, %v1712_v31 }
 0x10b   :  { %780 = vmatpush2.bf16.msra.mxu1 %v1322_v26 }
 0x10c   :  { %781 = vmatprep.subr.bf16.mxu1 %v1327_v52  ;;  %v797_v52 = vld [vmem:[%s1885_s12 + $0x8] sm:$0xff] }
 0x10f   :  { %782 = vmatpush2.bf16.msra.mxu1 %v1325_v53 }
 0x110   :  { %783 = vmatprep.subr.bf16.mxu1 %v1330_v54 }
 0x113   :  { %784 = vmatpush2.bf16.msra.mxu1 %v1328_v55 }
 0x114   :  { %785 = vmatprep.subr.bf16.mxu1 %v1333_v56 }
 0x117   :  { %786 = vmatpush2.bf16.msra.mxu1 %v1331_v57  ;;  %v799_v57 = vmul.f32 0.1, %v797_v52 }
 0x19a   :  { %v271_v37 = vpop.f32.mrf.mxu1 }
 0x19b   :  { %v272_v38 = vadd.f32 %v271_v37, %v150_v33 }
 0x19c   :  { %v273_v40 = vpop.f32.mrf.mxu1 }
 0x19d   :  { %v282_v41 = vadd.f32 %v280_v35, %v272_v38  ;;  %v274_v42 = vadd.f32 %v273_v40, %v154_v36 }
 0x19e   :  { %v275_v43 = vpop.f32.mrf.mxu1 }
 0x19f   :  { %v286_v44 = vmul.f32 0.2, %v282_v41  ;;  %v283_v45 = vadd.f32 %v281_v39, %v274_v42  ;;  %vm284_vm3 = vcmp.ge.f32.partialorder %v282_v41, 0.0  ;;  %v1375_v43 = vld [vmem:[%s1881_s13 + $0xa4] ss:$8 sps:$4 sm:$0xff]  }
 0x1a0   :  { %v276_v46 = vpop.f32.mrf.mxu1 }
 0x1a1   :  { %vm285_vm4 = vcmp.ge.f32.partialorder %v283_v45, 0.0  ;;  %v287_v47 = vmul.f32 0.2, %v283_v45  ;;  %v288_v48 = vsel %vm284_vm3, %v282_v41, %v286_v44  ;;  %v1373_v44 = vld [vmem:[%s1881_s13 + $0xa0] ss:$8 sps:$4 sm:$0xff]  }
 0x1a2   :  { %v323_v51 = vpack.c.bf16 %v288_v48, %v288_v48  ;;  %v1376_v46 = vld [vmem:[%s1881_s13 + $0x90] ss:$8 sps:$4 sm:$0xff]   ;;  %v1379_v48 = vld [vmem:[%s1881_s13 + $0x80] ss:$8 sps:$4 sm:$0xff]  }
 0x1a3   :  { %v289_v49 = vsel %vm285_vm4, %v283_v45, %v287_v47  ;;  %v1378_v45 = vld [vmem:[%s1881_s13 + $0x94] ss:$8 sps:$4 sm:$0xff]   ;;  %v1381_v47 = vld [vmem:[%s1881_s13 + $0x84] ss:$8 sps:$4 sm:$0xff]  }
 0x1a4   :  { %v324_v50 = vpack.c.bf16 %v289_v49, %v289_v49  ;;  %v581_v49 = vld [vmem:[%s1884_s11] sm:$0x3] }
 0x1a5   :  { %v592_v54 = vrot.slane %v581_v49, %v1712_v31 }
 0x1a6   :  { %528 = vmatprep.mubr.bf16.mxu0 %v324_v50  ;;  %v796_v50 = vld [vmem:[%s1885_s12] sm:$0xff] }
 0x1a7   :  { %529 = vmatmul.mubr.bf16.vlgmr.msra.gmra.mxu0 %v323_v51  ;;  %v588_v51 = vrot.slane %v581_v49, %v1707_v29  ;;  %v798_v53 = vmul.f32 0.1, %v796_v50 }
 0x1a8   :  { %1015 = vmatpush1.bf16.msra.mxu0 %v1334_v58 }
 0x1a9   :  { %1016 = vmatprep.subr.bf16.mxu0 %v1339_v60 }
 0x1ac   :  { %1017 = vmatpush1.bf16.msra.mxu0 %v1337_v61 }
 0x1ad   :  { %1018 = vmatprep.subr.bf16.mxu0 %v1342_v62 }
 0x1b0   :  { %1019 = vmatpush1.bf16.msra.mxu0 %v1340_v63 }
 0x1b1   :  { %1020 = vmatprep.subr.bf16.mxu0 %v1345_v0 }
 0x1b4   :  { %1021 = vmatpush1.bf16.msra.mxu0 %v1343_v1 }
 0x1b5   :  { %1022 = vmatprep.subr.bf16.mxu0 %v1348_v2 }
 0x1b8   :  { %1023 = vmatpush1.bf16.msra.mxu0 %v1346_v3 }
 0x1b9   :  { %1024 = vmatprep.subr.bf16.mxu0 %v1351_v4 }
 0x1bc   :  { %1025 = vmatpush1.bf16.msra.mxu0 %v1349_v5 }
 0x1bd   :  { %1026 = vmatprep.subr.bf16.mxu0 %v1354_v6  ;;  %v840_v6 = vld [vmem:[%s1886_s14] sm:$0x3] }
 0x1c0   :  { %1027 = vmatpush1.bf16.msra.mxu0 %v1352_v7  ;;  %v1055_v7 = vld [vmem:[%s1887_s15] sm:$0xff] }
 0x1c1   :  { %1028 = vmatprep.subr.bf16.mxu0 %v1357_v8  ;;  %v847_v8 = vrot.slane %v840_v6, %v1707_v29 }
 0x1c4   :  { %1029 = vmatpush1.bf16.msra.mxu0 %v1355_v9  ;;  %v1056_v9 = vld [vmem:[%s1887_s15 + $0x8] sm:$0xff] }
 0x1c5   :  { %1030 = vmatprep.subr.bf16.mxu0 %v1360_v10  ;;  %v1057_v10 = vmul.f32 0.1, %v1055_v7 }
 0x1c8   :  { %1031 = vmatpush2.bf16.msra.mxu0 %v1358_v11  ;;  %v851_v11 = vrot.slane %v840_v6, %v1712_v31 }
 0x1c9   :  { %1032 = vmatprep.subr.bf16.mxu0 %v1363_v12 }
 0x1cc   :  { %1033 = vmatpush2.bf16.msra.mxu0 %v1361_v13 }
 0x1cd   :  { %1034 = vmatprep.subr.bf16.mxu0 %v1366_v14  ;;  %v1058_v14 = vmul.f32 0.1, %v1056_v9 }
 0x1d0   :  { %1035 = vmatpush2.bf16.msra.mxu0 %v1364_v15 }
 0x1d1   :  { %1036 = vmatprep.subr.bf16.mxu0 %v1369_v16 }
 0x1d4   :  { %1037 = vmatpush2.bf16.msra.mxu0 %v1367_v17 }
 0x1d5   :  { %1038 = vmatprep.subr.bf16.mxu0 %v1372_v18 }
 0x1d8   :  { %1039 = vmatpush2.bf16.msra.mxu0 %v1370_v19 }
 0x1d9   :  { %1040 = vmatprep.subr.bf16.mxu0 %v1375_v43 }
 0x1dc   :  { %1041 = vmatpush2.bf16.msra.mxu0 %v1373_v44 }
 0x1dd   :  { %1042 = vmatprep.subr.bf16.mxu0 %v1378_v45 }
 0x1e0   :  { %1043 = vmatpush2.bf16.msra.mxu0 %v1376_v46 }
 0x1e1   :  { %1044 = vmatprep.subr.bf16.mxu0 %v1381_v47 }
 0x1e4   :  { %1045 = vmatpush2.bf16.msra.mxu0 %v1379_v48 }
 0x267   :  { %v530_v26 = vpop.f32.mrf.mxu0 }
 0x268   :  { %v531_v27 = vadd.f32 %v530_v26, %v329_v22 }
 0x269   :  { %v532_v30 = vpop.f32.mrf.mxu0 }
 0x26a   :  { %v541_v32 = vadd.f32 %v539_v24, %v531_v27  ;;  %v533_v33 = vadd.f32 %v532_v30, %v333_v25 }
 0x26b   :  { %v534_v34 = vpop.f32.mrf.mxu0 }
 0x26c   :  { %vm543_vm5 = vcmp.ge.f32.partialorder %v541_v32, 0.0  ;;  %v545_v35 = vmul.f32 0.2, %v541_v32  ;;  %v542_v36 = vadd.f32 %v540_v28, %v533_v33 }
 0x26d   :  { %v535_v37 = vpop.f32.mrf.mxu0 }
 0x26e   :  { %v546_v38 = vmul.f32 0.2, %v542_v36  ;;  %vm544_vm6 = vcmp.ge.f32.partialorder %v542_v36, 0.0  ;;  %v547_v39 = vsel %vm543_vm5, %v541_v32, %v545_v35 }
 0x26f   :  { %v582_v42 = vpack.c.bf16 %v547_v39, %v547_v39 }
 0x270   :  { %v548_v40 = vsel %vm544_vm6, %v542_v36, %v546_v38 }
 0x271   :  { %v583_v41 = vpack.c.bf16 %v548_v40, %v548_v40 }
 0x273   :  { %787 = vmatprep.mubr.bf16.mxu1 %v583_v41 }
 0x274   :  { %788 = vmatmul.mubr.bf16.vlgmr.msra.gmra.mxu1 %v582_v42 }
 0x334   :  { %v789_v55 = vpop.f32.mrf.mxu1 }
 0x335   :  { %v790_v56 = vadd.f32 %v789_v55, %v588_v51 }
 0x336   :  { %v791_v58 = vpop.f32.mrf.mxu1 }
 0x337   :  { %v800_v59 = vadd.f32 %v798_v53, %v790_v56  ;;  %v792_v60 = vadd.f32 %v791_v58, %v592_v54 }
 0x338   :  { %v793_v61 = vpop.f32.mrf.mxu1 }
 0x339   :  { %vm802_vm7 = vcmp.ge.f32.partialorder %v800_v59, 0.0  ;;  %v804_v62 = vmul.f32 0.2, %v800_v59  ;;  %v801_v63 = vadd.f32 %v799_v57, %v792_v60 }
 0x33a   :  { %v794_v0 = vpop.f32.mrf.mxu1 }
 0x33b   :  { %v805_v1 = vmul.f32 0.2, %v801_v63  ;;  %vm803_vm8 = vcmp.ge.f32.partialorder %v801_v63, 0.0  ;;  %v806_v2 = vsel %vm802_vm7, %v800_v59, %v804_v62 }
 0x33c   :  { %v841_v5 = vpack.c.bf16 %v806_v2, %v806_v2 }
 0x33d   :  { %v807_v3 = vsel %vm803_vm8, %v801_v63, %v805_v1 }
 0x33e   :  { %v842_v4 = vpack.c.bf16 %v807_v3, %v807_v3 }
 0x340   :  { %1046 = vmatprep.mubr.bf16.mxu0 %v842_v4 }
 0x341   :  { %1047 = vmatmul.mubr.bf16.vlgmr.msra.gmra.mxu0 %v841_v5 }
 0x401   :  { %v1048_v12 = vpop.f32.mrf.mxu0 }
 0x402   :  { %v1049_v13 = vadd.f32 %v1048_v12, %v847_v8 }
 0x403   :  { %v1050_v15 = vpop.f32.mrf.mxu0 }
 0x404   :  { %v1059_v16 = vadd.f32 %v1057_v10, %v1049_v13  ;;  %v1051_v17 = vadd.f32 %v1050_v15, %v851_v11 }
 0x405   :  { %v1052_v18 = vpop.f32.mrf.mxu0 }
 0x406   :  { %v1063_v19 = vmul.f32 0.2, %v1059_v16  ;;  %v1060_v20 = vadd.f32 %v1058_v14, %v1051_v17  ;;  %vm1061_vm9 = vcmp.ge.f32.partialorder %v1059_v16, 0.0 }
 0x407   :  { %v1053_v21 = vpop.f32.mrf.mxu0 }
 0x408   :  { %vm1062_vm10 = vcmp.ge.f32.partialorder %v1060_v20, 0.0  ;;  %v1064_v29 = vmul.f32 0.2, %v1060_v20  ;;  %v1065_v22 = vsel %vm1061_vm9, %v1059_v16, %v1063_v19 }
 0x40a   :  { %v1066_v23 = vsel %vm1062_vm10, %v1060_v20, %v1064_v29 }
 0x40b   :  { %v1197_v24 = vpack.c.bf16 %v1066_v23, %v1065_v22 }
 0x40d   :  { %1075 = vst [vmem:[%s1888_s16] sm:$0xff] %v1197_v24 }

// kernel: forward.8
= control target key start
LH: loop header
LB: loop body
LE: loop exit
PB: predicated region body
PF: predicated region fallthrough
CT: control target
= control target key end

     0   :  { %s1813_s1 = inlined_call_operand.vmem [shape: bf16[512,512], index: 1, kind: input, shape index: {}]   ;;  %s1814_s0 = inlined_call_operand.vmem [shape: bf16[8,512], index: 0, kind: input, shape index: {}]   ;;  %s1815_s2 = inlined_call_operand.vmem [shape: f32[1,512], index: 2, kind: input, shape index: {}]   ;;  %s1816_s3 = inlined_call_operand.vmem [shape: f32[8,512], index: 3, kind: input, shape index: {}]   ;;  %s1817_s4 = inlined_call_operand.vmem [shape: bf16[8,512], index: 4, kind: output, shape index: {}]  }
   0x1   :  { %v1169_v0 = vld [vmem:[%s1813_s1 + $0xe4] ss:$16 sps:$4 sm:$0xff]   ;;  %v1173_v2 = vld [vmem:[%s1813_s1 + $0xe0] ss:$16 sps:$4 sm:$0xff]   ;;  %v18_v48 = vld [vmem:[%s1814_s0 + $0x8] sm:$0xff] }
   0x2   :  { %v1171_v1 = vld [vmem:[%s1813_s1 + $0x2e4] ss:$16 sps:$4 sm:$0xff]   ;;  %823 = vmatprep.subr.bf16.mxu0 %v1169_v0  ;;  %v1174_v3 = vld [vmem:[%s1813_s1 + $0x2e0] ss:$16 sps:$4 sm:$0xff]   ;;  %v1036_v51 = vcombine.high %v18_v48, %v18_v48 }
   0x3   :  { %864 = vmatprep.subr.bf16.mxu1 %v1171_v1  ;;  %v1175_v4 = vld [vmem:[%s1813_s1 + $0xc4] ss:$16 sps:$4 sm:$0xff]   ;;  %824 = vmatpush1.bf16.msra.mxu0 %v1173_v2  ;;  %v1179_v6 = vld [vmem:[%s1813_s1 + $0xc0] ss:$16 sps:$4 sm:$0xff]  }
   0x4   :  { %865 = vmatpush1.bf16.msra.mxu1 %v1174_v3  ;;  %v1177_v5 = vld [vmem:[%s1813_s1 + $0x2c4] ss:$16 sps:$4 sm:$0xff]   ;;  %825 = vmatprep.subr.bf16.mxu0 %v1175_v4  ;;  %v1180_v7 = vld [vmem:[%s1813_s1 + $0x2c0] ss:$16 sps:$4 sm:$0xff]   ;;  %v1271_v4 = vld [vmem:[%s1813_s1 + $0xec] ss:$16 sps:$4 sm:$0xff]  }
   0x5   :  { %866 = vmatprep.subr.bf16.mxu1 %v1177_v5  ;;  %v1181_v8 = vld [vmem:[%s1813_s1 + $0xa4] ss:$16 sps:$4 sm:$0xff]   ;;  %v1185_v10 = vld [vmem:[%s1813_s1 + $0xa0] ss:$16 sps:$4 sm:$0xff]   ;;  %896 = vmatprep.mubr.bf16.mxu1 %v1036_v51  ;;  %v1274_v5 = vld [vmem:[%s1813_s1 + $0x2ec] ss:$16 sps:$4 sm:$0xff]  }
   0x6   :  { %v1183_v9 = vld [vmem:[%s1813_s1 + $0x2a4] ss:$16 sps:$4 sm:$0xff]   ;;  %v1186_v11 = vld [vmem:[%s1813_s1 + $0x2a0] ss:$16 sps:$4 sm:$0xff]  }
   0x7   :  { %826 = vmatpush1.bf16.msra.mxu0 %v1179_v6  ;;  %v1187_v12 = vld [vmem:[%s1813_s1 + $0x84] ss:$16 sps:$4 sm:$0xff]   ;;  %v1191_v14 = vld [vmem:[%s1813_s1 + $0x80] ss:$16 sps:$4 sm:$0xff]  }
   0x8   :  { %867 = vmatpush1.bf16.msra.mxu1 %v1180_v7  ;;  %827 = vmatprep.subr.bf16.mxu0 %v1181_v8  ;;  %v1189_v13 = vld [vmem:[%s1813_s1 + $0x284] ss:$16 sps:$4 sm:$0xff]   ;;  %v1192_v15 = vld [vmem:[%s1813_s1 + $0x280] ss:$16 sps:$4 sm:$0xff]   ;;  %v1599_v7 = vcombine.low %v18_v48, %v18_v48  ;;  %v1269_v8 = vld [vmem:[%s1813_s1 + $0xe8] ss:$16 sps:$4 sm:$0xff]  }
   0x9   :  { %868 = vmatprep.subr.bf16.mxu1 %v1183_v9  ;;  %v1193_v16 = vld [vmem:[%s1813_s1 + $0x64] ss:$16 sps:$4 sm:$0xff]   ;;  %v1197_v18 = vld [vmem:[%s1813_s1 + $0x60] ss:$16 sps:$4 sm:$0xff]   ;;  %v1272_v9 = vld [vmem:[%s1813_s1 + $0x2e8] ss:$16 sps:$4 sm:$0xff]  }
   0xa   :  { %v1195_v17 = vld [vmem:[%s1813_s1 + $0x264] ss:$16 sps:$4 sm:$0xff]   ;;  %v1198_v19 = vld [vmem:[%s1813_s1 + $0x260] ss:$16 sps:$4 sm:$0xff]   ;;  %v1329_v48 = vld [vmem:[%s1813_s1 + $0x1a8] ss:$16 sps:$4 sm:$0xff]  }
   0xb   :  { %828 = vmatpush1.bf16.msra.mxu0 %v1185_v10  ;;  %v1199_v20 = vld [vmem:[%s1813_s1 + $0x44] ss:$16 sps:$4 sm:$0xff]   ;;  %v1203_v22 = vld [vmem:[%s1813_s1 + $0x40] ss:$16 sps:$4 sm:$0xff]   ;;  %v1277_v10 = vld [vmem:[%s1813_s1 + $0xcc] ss:$16 sps:$4 sm:$0xff]  }
   0xc   :  { %869 = vmatpush1.bf16.msra.mxu1 %v1186_v11  ;;  %829 = vmatprep.subr.bf16.mxu0 %v1187_v12  ;;  %v1201_v21 = vld [vmem:[%s1813_s1 + $0x244] ss:$16 sps:$4 sm:$0xff]   ;;  %v1204_v23 = vld [vmem:[%s1813_s1 + $0x240] ss:$16 sps:$4 sm:$0xff]   ;;  %v1280_v11 = vld [vmem:[%s1813_s1 + $0x2cc] ss:$16 sps:$4 sm:$0xff]  }
   0xd   :  { %870 = vmatprep.subr.bf16.mxu1 %v1189_v13  ;;  %v1205_v24 = vld [vmem:[%s1813_s1 + $0x24] ss:$16 sps:$4 sm:$0xff]   ;;  %v1209_v26 = vld [vmem:[%s1813_s1 + $0x20] ss:$16 sps:$4 sm:$0xff]   ;;  %v1275_v12 = vld [vmem:[%s1813_s1 + $0xc8] ss:$16 sps:$4 sm:$0xff]  }
   0xe   :  { %v1207_v25 = vld [vmem:[%s1813_s1 + $0x224] ss:$16 sps:$4 sm:$0xff]   ;;  %v1210_v27 = vld [vmem:[%s1813_s1 + $0x220] ss:$16 sps:$4 sm:$0xff]   ;;  %v1278_v13 = vld [vmem:[%s1813_s1 + $0x2c8] ss:$16 sps:$4 sm:$0xff]  }
   0xf   :  { %830 = vmatpush1.bf16.msra.mxu0 %v1191_v14  ;;  %v1211_v28 = vld [vmem:[%s1813_s1 + $0x4] ss:$16 sps:$4 sm:$0xff]   ;;  %v1215_v30 = vld [vmem:[%s1813_s1] ss:$16 sps:$4 sm:$0xff]   ;;  %v1283_v14 = vld [vmem:[%s1813_s1 + $0xac] ss:$16 sps:$4 sm:$0xff]  }
  0x10   :  { %871 = vmatpush1.bf16.msra.mxu1 %v1192_v15  ;;  %831 = vmatprep.subr.bf16.mxu0 %v1193_v16  ;;  %v1213_v29 = vld [vmem:[%s1813_s1 + $0x204] ss:$16 sps:$4 sm:$0xff]   ;;  %v1216_v31 = vld [vmem:[%s1813_s1 + $0x200] ss:$16 sps:$4 sm:$0xff]   ;;  %v1286_v15 = vld [vmem:[%s1813_s1 + $0x2ac] ss:$16 sps:$4 sm:$0xff]  }
  0x11   :  { %872 = vmatprep.subr.bf16.mxu1 %v1195_v17  ;;  %v1217_v32 = vld [vmem:[%s1813_s1 + $0x1e4] ss:$16 sps:$4 sm:$0xff]   ;;  %v1221_v34 = vld [vmem:[%s1813_s1 + $0x1e0] ss:$16 sps:$4 sm:$0xff]   ;;  %v1281_v16 = vld [vmem:[%s1813_s1 + $0xa8] ss:$16 sps:$4 sm:$0xff]  }
  0x12   :  { %v1219_v33 = vld [vmem:[%s1813_s1 + $0x3e4] ss:$16 sps:$4 sm:$0xff]   ;;  %v1222_v35 = vld [vmem:[%s1813_s1 + $0x3e0] ss:$16 sps:$4 sm:$0xff]   ;;  %v1284_v17 = vld [vmem:[%s1813_s1 + $0x2a8] ss:$16 sps:$4 sm:$0xff]  }
  0x13   :  { %832 = vmatpush1.bf16.msra.mxu0 %v1197_v18  ;;  %v1223_v36 = vld [vmem:[%s1813_s1 + $0x1c4] ss:$16 sps:$4 sm:$0xff]   ;;  %v1227_v38 = vld [vmem:[%s1813_s1 + $0x1c0] ss:$16 sps:$4 sm:$0xff]   ;;  %v1289_v18 = vld [vmem:[%s1813_s1 + $0x8c] ss:$16 sps:$4 sm:$0xff]  }
  0x14   :  { %873 = vmatpush1.bf16.msra.mxu1 %v1198_v19  ;;  %833 = vmatprep.subr.bf16.mxu0 %v1199_v20  ;;  %v1225_v37 = vld [vmem:[%s1813_s1 + $0x3c4] ss:$16 sps:$4 sm:$0xff]   ;;  %v1228_v39 = vld [vmem:[%s1813_s1 + $0x3c0] ss:$16 sps:$4 sm:$0xff]   ;;  %v1292_v19 = vld [vmem:[%s1813_s1 + $0x28c] ss:$16 sps:$4 sm:$0xff]  }
  0x15   :  { %874 = vmatprep.subr.bf16.mxu1 %v1201_v21  ;;  %v1229_v40 = vld [vmem:[%s1813_s1 + $0x1a4] ss:$16 sps:$4 sm:$0xff]   ;;  %v1233_v42 = vld [vmem:[%s1813_s1 + $0x1a0] ss:$16 sps:$4 sm:$0xff]   ;;  %v1287_v20 = vld [vmem:[%s1813_s1 + $0x88] ss:$16 sps:$4 sm:$0xff]  }
  0x16   :  { %v1231_v41 = vld [vmem:[%s1813_s1 + $0x3a4] ss:$16 sps:$4 sm:$0xff]   ;;  %v1234_v43 = vld [vmem:[%s1813_s1 + $0x3a0] ss:$16 sps:$4 sm:$0xff]   ;;  %v1290_v21 = vld [vmem:[%s1813_s1 + $0x288] ss:$16 sps:$4 sm:$0xff]  }
  0x17   :  { %834 = vmatpush1.bf16.msra.mxu0 %v1203_v22  ;;  %v1235_v44 = vld [vmem:[%s1813_s1 + $0x184] ss:$16 sps:$4 sm:$0xff]   ;;  %v1239_v49 = vld [vmem:[%s1813_s1 + $0x180] ss:$16 sps:$4 sm:$0xff]   ;;  %v1295_v22 = vld [vmem:[%s1813_s1 + $0x6c] ss:$16 sps:$4 sm:$0xff]  }
  0x18   :  { %875 = vmatpush1.bf16.msra.mxu1 %v1204_v23  ;;  %835 = vmatprep.subr.bf16.mxu0 %v1205_v24  ;;  %v1237_v45 = vld [vmem:[%s1813_s1 + $0x384] ss:$16 sps:$4 sm:$0xff]   ;;  %v1240_v50 = vld [vmem:[%s1813_s1 + $0x380] ss:$16 sps:$4 sm:$0xff]   ;;  %v1298_v23 = vld [vmem:[%s1813_s1 + $0x26c] ss:$16 sps:$4 sm:$0xff]  }
  0x19   :  { %876 = vmatprep.subr.bf16.mxu1 %v1207_v25  ;;  %v17_v46 = vld [vmem:[%s1814_s0] sm:$0xff]  ;;  %v1293_v24 = vld [vmem:[%s1813_s1 + $0x68] ss:$16 sps:$4 sm:$0xff]  }
  0x1a   :  { %v1531_v47 = vcombine.high %v17_v46, %v17_v46  ;;  %v1241_v52 = vld [vmem:[%s1813_s1 + $0x164] ss:$16 sps:$4 sm:$0xff]   ;;  %v1245_v54 = vld [vmem:[%s1813_s1 + $0x160] ss:$16 sps:$4 sm:$0xff]   ;;  %v1597_v6 = vcombine.low %v17_v46, %v17_v46  ;;  %v1296_v25 = vld [vmem:[%s1813_s1 + $0x268] ss:$16 sps:$4 sm:$0xff]  }
  0x1b   :  { %836 = vmatpush1.bf16.msra.mxu0 %v1209_v26  ;;  %v1243_v53 = vld [vmem:[%s1813_s1 + $0x364] ss:$16 sps:$4 sm:$0xff]   ;;  %v1246_v55 = vld [vmem:[%s1813_s1 + $0x360] ss:$16 sps:$4 sm:$0xff]   ;;  %v1301_v26 = vld [vmem:[%s1813_s1 + $0x4c] ss:$16 sps:$4 sm:$0xff]  }
  0x1c   :  { %877 = vmatpush1.bf16.msra.mxu1 %v1210_v27  ;;  %837 = vmatprep.subr.bf16.mxu0 %v1211_v28  ;;  %v1247_v56 = vld [vmem:[%s1813_s1 + $0x144] ss:$16 sps:$4 sm:$0xff]   ;;  %v1251_v58 = vld [vmem:[%s1813_s1 + $0x140] ss:$16 sps:$4 sm:$0xff]   ;;  %v1304_v27 = vld [vmem:[%s1813_s1 + $0x24c] ss:$16 sps:$4 sm:$0xff]  }
  0x1d   :  { %878 = vmatprep.subr.bf16.mxu1 %v1213_v29  ;;  %855 = vmatprep.mubr.bf16.mxu0 %v1531_v47  ;;  %v1249_v57 = vld [vmem:[%s1813_s1 + $0x344] ss:$16 sps:$4 sm:$0xff]   ;;  %v1252_v59 = vld [vmem:[%s1813_s1 + $0x340] ss:$16 sps:$4 sm:$0xff]   ;;  %v1299_v28 = vld [vmem:[%s1813_s1 + $0x48] ss:$16 sps:$4 sm:$0xff]  }
  0x1e   :  { %v1253_v60 = vld [vmem:[%s1813_s1 + $0x124] ss:$16 sps:$4 sm:$0xff]   ;;  %v1257_v62 = vld [vmem:[%s1813_s1 + $0x120] ss:$16 sps:$4 sm:$0xff]   ;;  %v1302_v29 = vld [vmem:[%s1813_s1 + $0x248] ss:$16 sps:$4 sm:$0xff]  }
  0x1f   :  { %838 = vmatpush1.bf16.msra.mxu0 %v1215_v30  ;;  %v1255_v61 = vld [vmem:[%s1813_s1 + $0x324] ss:$16 sps:$4 sm:$0xff]   ;;  %v1258_v63 = vld [vmem:[%s1813_s1 + $0x320] ss:$16 sps:$4 sm:$0xff]   ;;  %v1307_v30 = vld [vmem:[%s1813_s1 + $0x2c] ss:$16 sps:$4 sm:$0xff]  }
  0x20   :  { %879 = vmatpush1.bf16.msra.mxu1 %v1216_v31  ;;  %839 = vmatprep.subr.bf16.mxu0 %v1217_v32  ;;  %v1259_v0 = vld [vmem:[%s1813_s1 + $0x104] ss:$16 sps:$4 sm:$0xff]   ;;  %v1263_v2 = vld [vmem:[%s1813_s1 + $0x100] ss:$16 sps:$4 sm:$0xff]   ;;  %v1310_v31 = vld [vmem:[%s1813_s1 + $0x22c] ss:$16 sps:$4 sm:$0xff]  }
  0x21   :  { %880 = vmatprep.subr.bf16.mxu1 %v1219_v33  ;;  %v1261_v1 = vld [vmem:[%s1813_s1 + $0x304] ss:$16 sps:$4 sm:$0xff]   ;;  %v1264_v3 = vld [vmem:[%s1813_s1 + $0x300] ss:$16 sps:$4 sm:$0xff]   ;;  %v1305_v32 = vld [vmem:[%s1813_s1 + $0x28] ss:$16 sps:$4 sm:$0xff]  }
  0x22   :  { %v1308_v33 = vld [vmem:[%s1813_s1 + $0x228] ss:$16 sps:$4 sm:$0xff]   ;;  %v1331_v46 = vld [vmem:[%s1813_s1 + $0x1ac] ss:$16 sps:$4 sm:$0xff]  }
  0x23   :  { %840 = vmatpush2.bf16.msra.mxu0 %v1221_v34  ;;  %v1313_v34 = vld [vmem:[%s1813_s1 + $0xc] ss:$16 sps:$4 sm:$0xff]  }
  0x24   :  { %881 = vmatpush2.bf16.msra.mxu1 %v1222_v35  ;;  %841 = vmatprep.subr.bf16.mxu0 %v1223_v36  ;;  %v1316_v35 = vld [vmem:[%s1813_s1 + $0x20c] ss:$16 sps:$4 sm:$0xff]   ;;  %v1311_v36 = vld [vmem:[%s1813_s1 + $0x8] ss:$16 sps:$4 sm:$0xff]  }
  0x25   :  { %882 = vmatprep.subr.bf16.mxu1 %v1225_v37  ;;  %v1314_v37 = vld [vmem:[%s1813_s1 + $0x208] ss:$16 sps:$4 sm:$0xff]  }
  0x27   :  { %842 = vmatpush2.bf16.msra.mxu0 %v1227_v38  ;;  %v1319_v38 = vld [vmem:[%s1813_s1 + $0x1ec] ss:$16 sps:$4 sm:$0xff]  }
  0x28   :  { %883 = vmatpush2.bf16.msra.mxu1 %v1228_v39  ;;  %843 = vmatprep.subr.bf16.mxu0 %v1229_v40  ;;  %v1322_v39 = vld [vmem:[%s1813_s1 + $0x3ec] ss:$16 sps:$4 sm:$0xff]   ;;  %v1317_v40 = vld [vmem:[%s1813_s1 + $0x1e8] ss:$16 sps:$4 sm:$0xff]  }
  0x29   :  { %884 = vmatprep.subr.bf16.mxu1 %v1231_v41  ;;  %v1320_v41 = vld [vmem:[%s1813_s1 + $0x3e8] ss:$16 sps:$4 sm:$0xff]  }
  0x2b   :  { %844 = vmatpush2.bf16.msra.mxu0 %v1233_v42  ;;  %v1325_v42 = vld [vmem:[%s1813_s1 + $0x1cc] ss:$16 sps:$4 sm:$0xff]  }
  0x2c   :  { %885 = vmatpush2.bf16.msra.mxu1 %v1234_v43  ;;  %845 = vmatprep.subr.bf16.mxu0 %v1235_v44  ;;  %v1328_v43 = vld [vmem:[%s1813_s1 + $0x3cc] ss:$16 sps:$4 sm:$0xff]   ;;  %v1323_v44 = vld [vmem:[%s1813_s1 + $0x1c8] ss:$16 sps:$4 sm:$0xff]  }
  0x2d   :  { %886 = vmatprep.subr.bf16.mxu1 %v1237_v45  ;;  %v1326_v45 = vld [vmem:[%s1813_s1 + $0x3c8] ss:$16 sps:$4 sm:$0xff]  }
  0x2f   :  { %846 = vmatpush2.bf16.msra.mxu0 %v1239_v49  ;;  %v1332_v49 = vld [vmem:[%s1813_s1 + $0x3a8] ss:$16 sps:$4 sm:$0xff]  }
  0x30   :  { %887 = vmatpush2.bf16.msra.mxu1 %v1240_v50  ;;  %847 = vmatprep.subr.bf16.mxu0 %v1241_v52  ;;  %v1337_v50 = vld [vmem:[%s1813_s1 + $0x18c] ss:$16 sps:$4 sm:$0xff]   ;;  %v1335_v52 = vld [vmem:[%s1813_s1 + $0x188] ss:$16 sps:$4 sm:$0xff]  }
  0x31   :  { %888 = vmatprep.subr.bf16.mxu1 %v1243_v53  ;;  %v1338_v53 = vld [vmem:[%s1813_s1 + $0x388] ss:$16 sps:$4 sm:$0xff]  }
  0x33   :  { %848 = vmatpush2.bf16.msra.mxu0 %v1245_v54  ;;  %v1343_v54 = vld [vmem:[%s1813_s1 + $0x16c] ss:$16 sps:$4 sm:$0xff]  }
  0x34   :  { %889 = vmatpush2.bf16.msra.mxu1 %v1246_v55  ;;  %849 = vmatprep.subr.bf16.mxu0 %v1247_v56  ;;  %v1346_v55 = vld [vmem:[%s1813_s1 + $0x36c] ss:$16 sps:$4 sm:$0xff]   ;;  %v1341_v56 = vld [vmem:[%s1813_s1 + $0x168] ss:$16 sps:$4 sm:$0xff]  }
  0x35   :  { %890 = vmatprep.subr.bf16.mxu1 %v1249_v57  ;;  %v1344_v57 = vld [vmem:[%s1813_s1 + $0x368] ss:$16 sps:$4 sm:$0xff]  }
  0x37   :  { %850 = vmatpush2.bf16.msra.mxu0 %v1251_v58  ;;  %v1349_v58 = vld [vmem:[%s1813_s1 + $0x14c] ss:$16 sps:$4 sm:$0xff]  }
  0x38   :  { %891 = vmatpush2.bf16.msra.mxu1 %v1252_v59  ;;  %851 = vmatprep.subr.bf16.mxu0 %v1253_v60  ;;  %v1352_v59 = vld [vmem:[%s1813_s1 + $0x34c] ss:$16 sps:$4 sm:$0xff]   ;;  %v1347_v60 = vld [vmem:[%s1813_s1 + $0x148] ss:$16 sps:$4 sm:$0xff]  }
  0x39   :  { %892 = vmatprep.subr.bf16.mxu1 %v1255_v61  ;;  %v1350_v61 = vld [vmem:[%s1813_s1 + $0x348] ss:$16 sps:$4 sm:$0xff]  }
  0x3b   :  { %852 = vmatpush2.bf16.msra.mxu0 %v1257_v62  ;;  %v1355_v62 = vld [vmem:[%s1813_s1 + $0x12c] ss:$16 sps:$4 sm:$0xff]  }
  0x3c   :  { %893 = vmatpush2.bf16.msra.mxu1 %v1258_v63  ;;  %853 = vmatprep.subr.bf16.mxu0 %v1259_v0  ;;  %v1358_v63 = vld [vmem:[%s1813_s1 + $0x32c] ss:$16 sps:$4 sm:$0xff]   ;;  %v1353_v0 = vld [vmem:[%s1813_s1 + $0x128] ss:$16 sps:$4 sm:$0xff]  }
  0x3d   :  { %894 = vmatprep.subr.bf16.mxu1 %v1261_v1  ;;  %v1356_v1 = vld [vmem:[%s1813_s1 + $0x328] ss:$16 sps:$4 sm:$0xff]  }
  0x3f   :  { %854 = vmatpush2.bf16.msra.mxu0 %v1263_v2  ;;  %v1361_v2 = vld [vmem:[%s1813_s1 + $0x10c] ss:$16 sps:$4 sm:$0xff]  }
  0x40   :  { %895 = vmatpush2.bf16.msra.mxu1 %v1264_v3  ;;  %905 = vmatprep.subr.bf16.mxu0 %v1271_v4  ;;  %v1364_v3 = vld [vmem:[%s1813_s1 + $0x30c] ss:$16 sps:$4 sm:$0xff]   ;;  %v1359_v4 = vld [vmem:[%s1813_s1 + $0x108] ss:$16 sps:$4 sm:$0xff]  }
  0x41   :  { %946 = vmatprep.subr.bf16.mxu1 %v1274_v5  ;;  %v1362_v5 = vld [vmem:[%s1813_s1 + $0x308] ss:$16 sps:$4 sm:$0xff]  }
  0x42   :  { %856 = vmatmul.mubr.bf16.vlgmr.msra.gmra.mxu0 %v1597_v6 }
  0x43   :  { %897 = vmatmul.mubr.bf16.vlgmr.msra.gmra.mxu1 %v1599_v7  ;;  %906 = vmatpush1.bf16.msra.mxu0 %v1269_v8  ;;  %v149_v8 = vlaneseq }
  0x44   :  { %947 = vmatpush1.bf16.msra.mxu1 %v1272_v9  ;;  %907 = vmatprep.subr.bf16.mxu0 %v1277_v10 }
  0x45   :  { %948 = vmatprep.subr.bf16.mxu1 %v1280_v11  ;;  %937 = vmatprep.mubr.bf16.mxu0 %v1531_v47  ;;  %v1334_v47 = vld [vmem:[%s1813_s1 + $0x3ac] ss:$16 sps:$4 sm:$0xff]   ;;  %v150_v9 = vshrl.u32 %v149_v8, 7  ;;  %v147_v11 = vld [vmem:[%s1815_s2] sm:$0xf] }
  0x46   :  { %978 = vmatprep.mubr.bf16.mxu1 %v1036_v51  ;;  %v1340_v51 = vld [vmem:[%s1813_s1 + $0x38c] ss:$16 sps:$4 sm:$0xff]  }
  0x47   :  { %908 = vmatpush1.bf16.msra.mxu0 %v1275_v12  ;;  %v159_v10 = vsub.s32 2, %v150_v9 }
  0x48   :  { %949 = vmatpush1.bf16.msra.mxu1 %v1278_v13  ;;  %909 = vmatprep.subr.bf16.mxu0 %v1283_v14  ;;  %v163_v13 = vsub.s32 3, %v150_v9 }
  0x49   :  { %950 = vmatprep.subr.bf16.mxu1 %v1286_v15  ;;  %v160_v12 = vrot.slane %v147_v11, %v159_v10  ;;  %v151_v15 = vsub.s32 0, %v150_v9 }
  0x4a   :  { %v164_v14 = vrot.slane %v147_v11, %v163_v13 }
  0x4b   :  { %910 = vmatpush1.bf16.msra.mxu0 %v1281_v16  ;;  %v155_v16 = vsub.s32 1, %v150_v9 }
  0x4c   :  { %951 = vmatpush1.bf16.msra.mxu1 %v1284_v17  ;;  %911 = vmatprep.subr.bf16.mxu0 %v1289_v18  ;;  %v152_v17 = vrot.slane %v147_v11, %v151_v15  ;;  %v987_v18 = vld [vmem:[%s1816_s3] sm:$0xff] }
  0x4d   :  { %952 = vmatprep.subr.bf16.mxu1 %v1292_v19 }
  0x4f   :  { %912 = vmatpush1.bf16.msra.mxu0 %v1287_v20  ;;  %v988_v20 = vld [vmem:[%s1816_s3 + $0x8] sm:$0xff] }
  0x50   :  { %953 = vmatpush1.bf16.msra.mxu1 %v1290_v21  ;;  %913 = vmatprep.subr.bf16.mxu0 %v1295_v22  ;;  %v991_v22 = vmul.f32 0.1, %v987_v18 }
  0x51   :  { %954 = vmatprep.subr.bf16.mxu1 %v1298_v23 }
  0x53   :  { %914 = vmatpush1.bf16.msra.mxu0 %v1293_v24 }
  0x54   :  { %955 = vmatpush1.bf16.msra.mxu1 %v1296_v25  ;;  %915 = vmatprep.subr.bf16.mxu0 %v1301_v26 }
  0x55   :  { %956 = vmatprep.subr.bf16.mxu1 %v1304_v27  ;;  %v992_v27 = vmul.f32 0.1, %v988_v20 }
  0x57   :  { %916 = vmatpush1.bf16.msra.mxu0 %v1299_v28 }
  0x58   :  { %957 = vmatpush1.bf16.msra.mxu1 %v1302_v29  ;;  %917 = vmatprep.subr.bf16.mxu0 %v1307_v30 }
  0x59   :  { %958 = vmatprep.subr.bf16.mxu1 %v1310_v31 }
  0x5b   :  { %918 = vmatpush1.bf16.msra.mxu0 %v1305_v32 }
  0x5c   :  { %959 = vmatpush1.bf16.msra.mxu1 %v1308_v33  ;;  %919 = vmatprep.subr.bf16.mxu0 %v1313_v34 }
  0x5d   :  { %960 = vmatprep.subr.bf16.mxu1 %v1316_v35 }
  0x5f   :  { %920 = vmatpush1.bf16.msra.mxu0 %v1311_v36 }
  0x60   :  { %961 = vmatpush1.bf16.msra.mxu1 %v1314_v37  ;;  %921 = vmatprep.subr.bf16.mxu0 %v1319_v38 }
  0x61   :  { %962 = vmatprep.subr.bf16.mxu1 %v1322_v39 }
  0x63   :  { %922 = vmatpush2.bf16.msra.mxu0 %v1317_v40  ;;  %v989_v40 = vld [vmem:[%s1816_s3 + $0x10] sm:$0xff] }
  0x64   :  { %963 = vmatpush2.bf16.msra.mxu1 %v1320_v41  ;;  %923 = vmatprep.subr.bf16.mxu0 %v1325_v42 }
  0x65   :  { %964 = vmatprep.subr.bf16.mxu1 %v1328_v43  ;;  %v990_v43 = vld [vmem:[%s1816_s3 + $0x18] sm:$0xff] }
  0x67   :  { %924 = vmatpush2.bf16.msra.mxu0 %v1323_v44 }
  0x68   :  { %965 = vmatpush2.bf16.msra.mxu1 %v1326_v45  ;;  %925 = vmatprep.subr.bf16.mxu0 %v1331_v46  ;;  %v993_v45 = vmul.f32 0.1, %v989_v40 }
  0x69   :  { %966 = vmatprep.subr.bf16.mxu1 %v1334_v47 }
  0x6b   :  { %926 = vmatpush2.bf16.msra.mxu0 %v1329_v48 }
  0x6c   :  { %967 = vmatpush2.bf16.msra.mxu1 %v1332_v49  ;;  %927 = vmatprep.subr.bf16.mxu0 %v1337_v50  ;;  %v994_v50 = vmul.f32 0.1, %v990_v43 }
  0x6d   :  { %968 = vmatprep.subr.bf16.mxu1 %v1340_v51 }
  0x6f   :  { %928 = vmatpush2.bf16.msra.mxu0 %v1335_v52 }
  0x70   :  { %969 = vmatpush2.bf16.msra.mxu1 %v1338_v53  ;;  %929 = vmatprep.subr.bf16.mxu0 %v1343_v54 }
  0x71   :  { %970 = vmatprep.subr.bf16.mxu1 %v1346_v55 }
  0x73   :  { %930 = vmatpush2.bf16.msra.mxu0 %v1341_v56 }
  0x74   :  { %971 = vmatpush2.bf16.msra.mxu1 %v1344_v57  ;;  %931 = vmatprep.subr.bf16.mxu0 %v1349_v58 }
  0x75   :  { %972 = vmatprep.subr.bf16.mxu1 %v1352_v59 }
  0x77   :  { %932 = vmatpush2.bf16.msra.mxu0 %v1347_v60 }
  0x78   :  { %973 = vmatpush2.bf16.msra.mxu1 %v1350_v61  ;;  %933 = vmatprep.subr.bf16.mxu0 %v1355_v62 }
  0x79   :  { %974 = vmatprep.subr.bf16.mxu1 %v1358_v63 }
  0x7b   :  { %934 = vmatpush2.bf16.msra.mxu0 %v1353_v0 }
  0x7c   :  { %975 = vmatpush2.bf16.msra.mxu1 %v1356_v1  ;;  %935 = vmatprep.subr.bf16.mxu0 %v1361_v2 }
  0x7d   :  { %976 = vmatprep.subr.bf16.mxu1 %v1364_v3 }
  0x7f   :  { %936 = vmatpush2.bf16.msra.mxu0 %v1359_v4 }
  0x80   :  { %977 = vmatpush2.bf16.msra.mxu1 %v1362_v5 }
  0x82   :  { %938 = vmatmul.mubr.bf16.vlgmr.msra.gmra.mxu0 %v1597_v6  ;;  %v156_v6 = vrot.slane %v147_v11, %v155_v16 }
  0x83   :  { %979 = vmatmul.mubr.bf16.vlgmr.msra.gmra.mxu1 %v1599_v7 }
 0x102   :  { %v857_v19 = vpop.f32.mrf.mxu0 }
 0x103   :  { %v898_v7 = vpop.f32.mrf.mxu1  ;;  %v858_v21 = vadd.f32 %v857_v19, %v152_v17 }
 0x104   :  { %v859_v23 = vpop.f32.mrf.mxu0 }
 0x105   :  { %v900_v24 = vpop.f32.mrf.mxu1  ;;  %v899_v25 = vadd.f32 %v898_v7, %v858_v21  ;;  %v860_v26 = vadd.f32 %v859_v23, %v156_v6 }
 0x106   :  { %v861_v28 = vpop.f32.mrf.mxu0 }
 0x107   :  { %v902_v29 = vpop.f32.mrf.mxu1  ;;  %v995_v30 = vadd.f32 %v991_v22, %v899_v25  ;;  %v901_v31 = vadd.f32 %v900_v24, %v860_v26 }
 0x108   :  { %v862_v32 = vpop.f32.mrf.mxu0 }
 0x109   :  { %v903_v33 = vpop.f32.mrf.mxu1  ;;  %v1003_v34 = vmul.f32 0.2, %v995_v30  ;;  %v996_v35 = vadd.f32 %v992_v27, %v901_v31  ;;  %vm999_vm0 = vcmp.ge.f32.partialorder %v995_v30, 0.0 }
 0x10b   :  { %vm1000_vm1 = vcmp.ge.f32.partialorder %v996_v35, 0.0  ;;  %v1004_v36 = vmul.f32 0.2, %v996_v35  ;;  %v1007_v37 = vsel %vm999_vm0, %v995_v30, %v1003_v34 }
 0x10d   :  { %v1008_v38 = vsel %vm1000_vm1, %v996_v35, %v1004_v36 }
 0x10e   :  { %v1167_v39 = vpack.c.bf16 %v1008_v38, %v1007_v37 }
 0x110   :  { %1027 = vst [vmem:[%s1817_s4] sm:$0xff] %v1167_v39 }
 0x142   :  { %v939_v41 = vpop.f32.mrf.mxu0 }
 0x143   :  { %v980_v42 = vpop.f32.mrf.mxu1  ;;  %v940_v44 = vadd.f32 %v939_v41, %v160_v12 }
 0x144   :  { %v941_v46 = vpop.f32.mrf.mxu0 }
 0x145   :  { %v982_v47 = vpop.f32.mrf.mxu1  ;;  %v981_v48 = vadd.f32 %v980_v42, %v940_v44  ;;  %v942_v49 = vadd.f32 %v941_v46, %v164_v14 }
 0x146   :  { %v943_v51 = vpop.f32.mrf.mxu0 }
 0x147   :  { %v984_v52 = vpop.f32.mrf.mxu1  ;;  %v997_v53 = vadd.f32 %v993_v45, %v981_v48  ;;  %v983_v54 = vadd.f32 %v982_v47, %v942_v49 }
 0x148   :  { %v944_v55 = vpop.f32.mrf.mxu0 }
 0x149   :  { %v985_v56 = vpop.f32.mrf.mxu1  ;;  %v1005_v57 = vmul.f32 0.2, %v997_v53  ;;  %v998_v58 = vadd.f32 %v994_v50, %v983_v54  ;;  %vm1001_vm2 = vcmp.ge.f32.partialorder %v997_v53, 0.0 }
 0x14b   :  { %vm1002_vm3 = vcmp.ge.f32.partialorder %v998_v58, 0.0  ;;  %v1006_v59 = vmul.f32 0.2, %v998_v58  ;;  %v1009_v60 = vsel %vm1001_vm2, %v997_v53, %v1005_v57 }
 0x14d   :  { %v1010_v61 = vsel %vm1002_vm3, %v998_v58, %v1006_v59 }
 0x14e   :  { %v1168_v62 = vpack.c.bf16 %v1010_v61, %v1009_v60 }
 0x150   :  { %1028 = vst [vmem:[%s1817_s4 + $0x8] sm:$0xff] %v1168_v62 }

// kernel: forward.11
= control target key start
LH: loop header
LB: loop body
LE: loop exit
PB: predicated region body
PF: predicated region fallthrough
CT: control target
= control target key end

     0   :  { %s1998_s12 = smov 0   ;;  %s2000_s13 = smov 0   ;;  %s2458_s0 = inlined_call_operand.vmem [shape: bf16[8,512], index: 0, kind: input, shape index: {}]   ;;  %s2459_s1 = inlined_call_operand.vmem [shape: bf16[512,768], index: 1, kind: input, shape index: {}]   ;;  %s2460_s2 = inlined_call_operand.vmem [shape: f32[1,768], index: 2, kind: input, shape index: {}]   ;;  %s2461_s3 = inlined_call_operand.vmem [shape: f32[8,768], index: 3, kind: output, shape index: {}]  }
   0x1   :  { %s2002_s14 = smov 0   ;;  %s2004_s15 = smov 0  }
   0x2   :  { %s2006_s16 = smov 0  }
   0x3 LB: > { %s22_s17 = sadd.s32 1, %s1972_s15  ;;  %p65_p1 = scmp.ne.s32.totalorder %s1964_s13, %s1960_s12  ;;  %s1976_s16 = sphi %s2006_s16, %s13_s16   ;;  %s1972_s15 = sphi %s2004_s15, %s2465_s15   ;;  %s1968_s14 = sphi %s2002_s14, %s2464_s14   ;;  %s1964_s13 = sphi %s2000_s13, %s2463_s13   ;;  %s1960_s12 = sphi %s1998_s12, %s2462_s12  }
   0x4   : > { %p23_p0 = scmp.ge.s32.totalorder %s22_s17, 2  ;;  %p66_p2 = scmp.eq.s32.totalorder %s1976_s16, 0 }
   0x5   : > { %s58_s19 = sadd.s32 1, %s1964_s13  ;;  %p1479_p5 = scmp.ge.s32.totalorder %s1976_s16, 2 }
   0x6   : > { %s2467_s17 = smov (%p23_p0, %s22_s17), 0  ;;  %p67_p3 = por %p66_p2, %p65_p1 }
   0x7   : > { %s55_s18 = ssub.s32 %s1972_s15, %s2467_s17  ;;  %153 = sbr.rel (%p1479_p5) target bundleno = 91 (0x5b), region = 20 }
   0x8   : > { %p56_p4 = scmp.eq.s32.totalorder %s55_s18, 0 }
   0xa   : > { %s2033_s20 = scalar_select %p56_p4, %s1964_s13, %s58_s19  }
   0xc   : > { %156 = sbr.rel (!%p67_p3) target bundleno = 91 (0x5b), region = 24  ;;  %s158_s21 = sand.u32 (%p67_p3), 1, %s1964_s13  }
   0xd   : > { %s1713_s22 = smul.u32 (%p67_p3), 12, %s1972_s15 }
   0xe   : > { %s1758_s23 = smul.u32 (%p67_p3), 768, %s158_s21 }
   0xf   : > { %s2041_s26 = scalar_lea.vmem (%p67_p3), %s2459_s1, %s1713_s22 }
  0x10   : > { %v178_v0 = vld [vmem:[%s2041_s26] sm:$0xff] (%p67_p3)  ;;  %v180_v1 = vld [vmem:[%s2041_s26 + $0x18] sm:$0xff] (%p67_p3)  ;;  %v182_v2 = vld [vmem:[%s2041_s26 + $0x30] sm:$0xff] (%p67_p3)  ;;  %s2046_s27 = scalar_lea.vmem (%p67_p3), [#allocation2], %s1758_s23 }
  0x11   : > { %179 = vst [vmem:[%s2046_s27] sm:$0xff] %v178_v0  ;;  %181 = vst [vmem:[%s2046_s27 + $0xc] sm:$0xff] %v180_v1  ;;  %v184_v3 = vld [vmem:[%s2041_s26 + $0x48] sm:$0xff]  ;;  %v186_v4 = vld [vmem:[%s2041_s26 + $0x60] sm:$0xff] }
  0x12   : > { %183 = vst [vmem:[%s2046_s27 + $0x18] sm:$0xff] %v182_v2  ;;  %v188_v5 = vld [vmem:[%s2041_s26 + $0x78] sm:$0xff]  ;;  %185 = vst [vmem:[%s2046_s27 + $0x24] sm:$0xff] %v184_v3  ;;  %v190_v6 = vld [vmem:[%s2041_s26 + $0x90] sm:$0xff] }
  0x13   : > { %187 = vst [vmem:[%s2046_s27 + $0x30] sm:$0xff] %v186_v4  ;;  %189 = vst [vmem:[%s2046_s27 + $0x3c] sm:$0xff] %v188_v5  ;;  %v192_v7 = vld [vmem:[%s2041_s26 + $0xa8] sm:$0xff]  ;;  %v194_v8 = vld [vmem:[%s2041_s26 + $0xc0] sm:$0xff] }
  0x14   : > { %191 = vst [vmem:[%s2046_s27 + $0x48] sm:$0xff] %v190_v6  ;;  %193 = vst [vmem:[%s2046_s27 + $0x54] sm:$0xff] %v192_v7  ;;  %v196_v9 = vld [vmem:[%s2041_s26 + $0xd8] sm:$0xff]  ;;  %v198_v10 = vld [vmem:[%s2041_s26 + $0xf0] sm:$0xff] }
  0x15   : > { %195 = vst [vmem:[%s2046_s27 + $0x60] sm:$0xff] %v194_v8  ;;  %v200_v11 = vld [vmem:[%s2041_s26 + $0x108] sm:$0xff]  ;;  %197 = vst [vmem:[%s2046_s27 + $0x6c] sm:$0xff] %v196_v9  ;;  %v202_v12 = vld [vmem:[%s2041_s26 + $0x120] sm:$0xff] }
  0x16   : > { %199 = vst [vmem:[%s2046_s27 + $0x78] sm:$0xff] %v198_v10  ;;  %201 = vst [vmem:[%s2046_s27 + $0x84] sm:$0xff] %v200_v11  ;;  %v204_v13 = vld [vmem:[%s2041_s26 + $0x138] sm:$0xff]  ;;  %v206_v14 = vld [vmem:[%s2041_s26 + $0x150] sm:$0xff] }
  0x17   : > { %203 = vst [vmem:[%s2046_s27 + $0x90] sm:$0xff] %v202_v12  ;;  %205 = vst [vmem:[%s2046_s27 + $0x9c] sm:$0xff] %v204_v13  ;;  %v208_v15 = vld [vmem:[%s2041_s26 + $0x168] sm:$0xff]  ;;  %v210_v16 = vld [vmem:[%s2041_s26 + $0x180] sm:$0xff] }
  0x18   : > { %207 = vst [vmem:[%s2046_s27 + $0xa8] sm:$0xff] %v206_v14  ;;  %v212_v17 = vld [vmem:[%s2041_s26 + $0x198] sm:$0xff]  ;;  %209 = vst [vmem:[%s2046_s27 + $0xb4] sm:$0xff] %v208_v15  ;;  %v214_v18 = vld [vmem:[%s2041_s26 + $0x1b0] sm:$0xff] }
  0x19   : > { %211 = vst [vmem:[%s2046_s27 + $0xc0] sm:$0xff] %v210_v16  ;;  %213 = vst [vmem:[%s2046_s27 + $0xcc] sm:$0xff] %v212_v17  ;;  %v216_v19 = vld [vmem:[%s2041_s26 + $0x1c8] sm:$0xff]  ;;  %v218_v20 = vld [vmem:[%s2041_s26 + $0x1e0] sm:$0xff] }
  0x1a   : > { %215 = vst [vmem:[%s2046_s27 + $0xd8] sm:$0xff] %v214_v18  ;;  %217 = vst [vmem:[%s2046_s27 + $0xe4] sm:$0xff] %v216_v19  ;;  %v220_v21 = vld [vmem:[%s2041_s26 + $0x1f8] sm:$0xff]  ;;  %v222_v22 = vld [vmem:[%s2041_s26 + $0x210] sm:$0xff] }
  0x1b   : > { %219 = vst [vmem:[%s2046_s27 + $0xf0] sm:$0xff] %v218_v20  ;;  %v224_v23 = vld [vmem:[%s2041_s26 + $0x228] sm:$0xff]  ;;  %221 = vst [vmem:[%s2046_s27 + $0xfc] sm:$0xff] %v220_v21  ;;  %v226_v24 = vld [vmem:[%s2041_s26 + $0x240] sm:$0xff] }
  0x1c   : > { %223 = vst [vmem:[%s2046_s27 + $0x108] sm:$0xff] %v222_v22  ;;  %225 = vst [vmem:[%s2046_s27 + $0x114] sm:$0xff] %v224_v23  ;;  %v228_v25 = vld [vmem:[%s2041_s26 + $0x258] sm:$0xff]  ;;  %v230_v26 = vld [vmem:[%s2041_s26 + $0x270] sm:$0xff] }
  0x1d   : > { %227 = vst [vmem:[%s2046_s27 + $0x120] sm:$0xff] %v226_v24  ;;  %229 = vst [vmem:[%s2046_s27 + $0x12c] sm:$0xff] %v228_v25  ;;  %v232_v27 = vld [vmem:[%s2041_s26 + $0x288] sm:$0xff]  ;;  %v234_v28 = vld [vmem:[%s2041_s26 + $0x2a0] sm:$0xff] }
  0x1e   : > { %231 = vst [vmem:[%s2046_s27 + $0x138] sm:$0xff] %v230_v26  ;;  %v236_v29 = vld [vmem:[%s2041_s26 + $0x2b8] sm:$0xff]  ;;  %233 = vst [vmem:[%s2046_s27 + $0x144] sm:$0xff] %v232_v27  ;;  %v238_v30 = vld [vmem:[%s2041_s26 + $0x2d0] sm:$0xff] }
  0x1f   : > { %235 = vst [vmem:[%s2046_s27 + $0x150] sm:$0xff] %v234_v28  ;;  %237 = vst [vmem:[%s2046_s27 + $0x15c] sm:$0xff] %v236_v29  ;;  %v240_v31 = vld [vmem:[%s2041_s26 + $0x2e8] sm:$0xff]  ;;  %v242_v32 = vld [vmem:[%s2041_s26 + $0x300] sm:$0xff] }
  0x20   : > { %239 = vst [vmem:[%s2046_s27 + $0x168] sm:$0xff] %v238_v30  ;;  %241 = vst [vmem:[%s2046_s27 + $0x174] sm:$0xff] %v240_v31  ;;  %v244_v33 = vld [vmem:[%s2041_s26 + $0x318] sm:$0xff]  ;;  %v246_v34 = vld [vmem:[%s2041_s26 + $0x330] sm:$0xff] }
  0x21   : > { %243 = vst [vmem:[%s2046_s27 + $0x180] sm:$0xff] %v242_v32  ;;  %v248_v35 = vld [vmem:[%s2041_s26 + $0x348] sm:$0xff]  ;;  %245 = vst [vmem:[%s2046_s27 + $0x18c] sm:$0xff] %v244_v33  ;;  %v250_v36 = vld [vmem:[%s2041_s26 + $0x360] sm:$0xff] }
  0x22   : > { %247 = vst [vmem:[%s2046_s27 + $0x198] sm:$0xff] %v246_v34  ;;  %249 = vst [vmem:[%s2046_s27 + $0x1a4] sm:$0xff] %v248_v35  ;;  %v252_v37 = vld [vmem:[%s2041_s26 + $0x378] sm:$0xff]  ;;  %v254_v38 = vld [vmem:[%s2041_s26 + $0x390] sm:$0xff] }
  0x23   : > { %251 = vst [vmem:[%s2046_s27 + $0x1b0] sm:$0xff] %v250_v36  ;;  %253 = vst [vmem:[%s2046_s27 + $0x1bc] sm:$0xff] %v252_v37  ;;  %v256_v39 = vld [vmem:[%s2041_s26 + $0x3a8] sm:$0xff]  ;;  %v258_v40 = vld [vmem:[%s2041_s26 + $0x3c0] sm:$0xff] }
  0x24   : > { %255 = vst [vmem:[%s2046_s27 + $0x1c8] sm:$0xff] %v254_v38  ;;  %v260_v41 = vld [vmem:[%s2041_s26 + $0x3d8] sm:$0xff]  ;;  %257 = vst [vmem:[%s2046_s27 + $0x1d4] sm:$0xff] %v256_v39  ;;  %v262_v42 = vld [vmem:[%s2041_s26 + $0x3f0] sm:$0xff] }
  0x25   : > { %259 = vst [vmem:[%s2046_s27 + $0x1e0] sm:$0xff] %v258_v40  ;;  %261 = vst [vmem:[%s2046_s27 + $0x1ec] sm:$0xff] %v260_v41  ;;  %v264_v43 = vld [vmem:[%s2041_s26 + $0x408] sm:$0xff]  ;;  %v266_v44 = vld [vmem:[%s2041_s26 + $0x420] sm:$0xff] }
  0x26   : > { %263 = vst [vmem:[%s2046_s27 + $0x1f8] sm:$0xff] %v262_v42  ;;  %265 = vst [vmem:[%s2046_s27 + $0x204] sm:$0xff] %v264_v43  ;;  %v268_v45 = vld [vmem:[%s2041_s26 + $0x438] sm:$0xff]  ;;  %v270_v46 = vld [vmem:[%s2041_s26 + $0x450] sm:$0xff] }
  0x27   : > { %267 = vst [vmem:[%s2046_s27 + $0x210] sm:$0xff] %v266_v44  ;;  %v272_v47 = vld [vmem:[%s2041_s26 + $0x468] sm:$0xff]  ;;  %269 = vst [vmem:[%s2046_s27 + $0x21c] sm:$0xff] %v268_v45  ;;  %v274_v48 = vld [vmem:[%s2041_s26 + $0x480] sm:$0xff] }
  0x28   : > { %271 = vst [vmem:[%s2046_s27 + $0x228] sm:$0xff] %v270_v46  ;;  %273 = vst [vmem:[%s2046_s27 + $0x234] sm:$0xff] %v272_v47  ;;  %v276_v49 = vld [vmem:[%s2041_s26 + $0x498] sm:$0xff]  ;;  %v278_v50 = vld [vmem:[%s2041_s26 + $0x4b0] sm:$0xff] }
  0x29   : > { %275 = vst [vmem:[%s2046_s27 + $0x240] sm:$0xff] %v274_v48  ;;  %277 = vst [vmem:[%s2046_s27 + $0x24c] sm:$0xff] %v276_v49  ;;  %v280_v51 = vld [vmem:[%s2041_s26 + $0x4c8] sm:$0xff]  ;;  %v282_v52 = vld [vmem:[%s2041_s26 + $0x4e0] sm:$0xff] }
  0x2a   : > { %279 = vst [vmem:[%s2046_s27 + $0x258] sm:$0xff] %v278_v50  ;;  %v284_v53 = vld [vmem:[%s2041_s26 + $0x4f8] sm:$0xff]  ;;  %281 = vst [vmem:[%s2046_s27 + $0x264] sm:$0xff] %v280_v51  ;;  %v286_v54 = vld [vmem:[%s2041_s26 + $0x510] sm:$0xff] }
  0x2b   : > { %283 = vst [vmem:[%s2046_s27 + $0x270] sm:$0xff] %v282_v52  ;;  %285 = vst [vmem:[%s2046_s27 + $0x27c] sm:$0xff] %v284_v53  ;;  %v288_v55 = vld [vmem:[%s2041_s26 + $0x528] sm:$0xff]  ;;  %v290_v56 = vld [vmem:[%s2041_s26 + $0x540] sm:$0xff] }
  0x2c   : > { %287 = vst [vmem:[%s2046_s27 + $0x288] sm:$0xff] %v286_v54  ;;  %289 = vst [vmem:[%s2046_s27 + $0x294] sm:$0xff] %v288_v55  ;;  %v292_v57 = vld [vmem:[%s2041_s26 + $0x558] sm:$0xff]  ;;  %v294_v58 = vld [vmem:[%s2041_s26 + $0x570] sm:$0xff] }
  0x2d   : > { %291 = vst [vmem:[%s2046_s27 + $0x2a0] sm:$0xff] %v290_v56  ;;  %v296_v59 = vld [vmem:[%s2041_s26 + $0x588] sm:$0xff]  ;;  %293 = vst [vmem:[%s2046_s27 + $0x2ac] sm:$0xff] %v292_v57  ;;  %v298_v60 = vld [vmem:[%s2041_s26 + $0x5a0] sm:$0xff] }
  0x2e   : > { %295 = vst [vmem:[%s2046_s27 + $0x2b8] sm:$0xff] %v294_v58  ;;  %297 = vst [vmem:[%s2046_s27 + $0x2c4] sm:$0xff] %v296_v59  ;;  %v300_v61 = vld [vmem:[%s2041_s26 + $0x5b8] sm:$0xff]  ;;  %v302_v62 = vld [vmem:[%s2041_s26 + $0x5d0] sm:$0xff] }
  0x2f   : > { %299 = vst [vmem:[%s2046_s27 + $0x2d0] sm:$0xff] %v298_v60  ;;  %301 = vst [vmem:[%s2046_s27 + $0x2dc] sm:$0xff] %v300_v61  ;;  %v304_v63 = vld [vmem:[%s2041_s26 + $0x5e8] sm:$0xff]  ;;  %v1483_v1 = vld [vmem:[%s2041_s26 + $0x20] sm:$0xf] }
  0x30   : > { %303 = vst [vmem:[%s2046_s27 + $0x2e8] sm:$0xff] %v302_v62  ;;  %v1481_v0 = vld [vmem:[%s2041_s26 + $0x8] sm:$0xf]  ;;  %305 = vst [vmem:[%s2046_s27 + $0x2f4] sm:$0xff] %v304_v63  ;;  %v1485_v2 = vld [vmem:[%s2041_s26 + $0x38] sm:$0xf] }
  0x31   : > { %1482 = vst [vmem:[%s2046_s27 + $0x8] sm:$0xf] %v1481_v0  ;;  %1484 = vst [vmem:[%s2046_s27 + $0x14] sm:$0xf] %v1483_v1  ;;  %v1487_v3 = vld [vmem:[%s2041_s26 + $0x50] sm:$0xf] }
  0x32   : > { %v1489_v4 = vld [vmem:[%s2041_s26 + $0x68] sm:$0xf]  ;;  %1486 = vst [vmem:[%s2046_s27 + $0x20] sm:$0xf] %v1485_v2  ;;  %1488 = vst [vmem:[%s2046_s27 + $0x2c] sm:$0xf] %v1487_v3 }
  0x33   : > { %1490 = vst [vmem:[%s2046_s27 + $0x38] sm:$0xf] %v1489_v4  ;;  %v1491_v5 = vld [vmem:[%s2041_s26 + $0x80] sm:$0xf]  ;;  %v1493_v6 = vld [vmem:[%s2041_s26 + $0x98] sm:$0xf] }
  0x34   : > { %v1495_v7 = vld [vmem:[%s2041_s26 + $0xb0] sm:$0xf]  ;;  %1492 = vst [vmem:[%s2046_s27 + $0x44] sm:$0xf] %v1491_v5  ;;  %1494 = vst [vmem:[%s2046_s27 + $0x50] sm:$0xf] %v1493_v6 }
  0x35   : > { %1496 = vst [vmem:[%s2046_s27 + $0x5c] sm:$0xf] %v1495_v7  ;;  %v1497_v8 = vld [vmem:[%s2041_s26 + $0xc8] sm:$0xf]  ;;  %v1499_v9 = vld [vmem:[%s2041_s26 + $0xe0] sm:$0xf] }
  0x36   : > { %v1501_v10 = vld [vmem:[%s2041_s26 + $0xf8] sm:$0xf]  ;;  %1498 = vst [vmem:[%s2046_s27 + $0x68] sm:$0xf] %v1497_v8  ;;  %1500 = vst [vmem:[%s2046_s27 + $0x74] sm:$0xf] %v1499_v9 }
  0x37   : > { %1502 = vst [vmem:[%s2046_s27 + $0x80] sm:$0xf] %v1501_v10  ;;  %v1503_v11 = vld [vmem:[%s2041_s26 + $0x110] sm:$0xf]  ;;  %v1505_v12 = vld [vmem:[%s2041_s26 + $0x128] sm:$0xf] }
  0x38   : > { %v1507_v13 = vld [vmem:[%s2041_s26 + $0x140] sm:$0xf]  ;;  %1504 = vst [vmem:[%s2046_s27 + $0x8c] sm:$0xf] %v1503_v11  ;;  %1506 = vst [vmem:[%s2046_s27 + $0x98] sm:$0xf] %v1505_v12 }
  0x39   : > { %1508 = vst [vmem:[%s2046_s27 + $0xa4] sm:$0xf] %v1507_v13  ;;  %v1509_v14 = vld [vmem:[%s2041_s26 + $0x158] sm:$0xf]  ;;  %v1511_v15 = vld [vmem:[%s2041_s26 + $0x170] sm:$0xf] }
  0x3a   : > { %v1513_v16 = vld [vmem:[%s2041_s26 + $0x188] sm:$0xf]  ;;  %1510 = vst [vmem:[%s2046_s27 + $0xb0] sm:$0xf] %v1509_v14  ;;  %1512 = vst [vmem:[%s2046_s27 + $0xbc] sm:$0xf] %v1511_v15 }
  0x3b   : > { %1514 = vst [vmem:[%s2046_s27 + $0xc8] sm:$0xf] %v1513_v16  ;;  %v1515_v17 = vld [vmem:[%s2041_s26 + $0x1a0] sm:$0xf]  ;;  %v1517_v18 = vld [vmem:[%s2041_s26 + $0x1b8] sm:$0xf] }
  0x3c   : > { %v1519_v19 = vld [vmem:[%s2041_s26 + $0x1d0] sm:$0xf]  ;;  %1516 = vst [vmem:[%s2046_s27 + $0xd4] sm:$0xf] %v1515_v17  ;;  %1518 = vst [vmem:[%s2046_s27 + $0xe0] sm:$0xf] %v1517_v18 }
  0x3d   : > { %1520 = vst [vmem:[%s2046_s27 + $0xec] sm:$0xf] %v1519_v19  ;;  %v1521_v20 = vld [vmem:[%s2041_s26 + $0x1e8] sm:$0xf]  ;;  %v1523_v21 = vld [vmem:[%s2041_s26 + $0x200] sm:$0xf] }
  0x3e   : > { %v1525_v22 = vld [vmem:[%s2041_s26 + $0x218] sm:$0xf]  ;;  %1522 = vst [vmem:[%s2046_s27 + $0xf8] sm:$0xf] %v1521_v20  ;;  %1524 = vst [vmem:[%s2046_s27 + $0x104] sm:$0xf] %v1523_v21 }
  0x3f   : > { %1526 = vst [vmem:[%s2046_s27 + $0x110] sm:$0xf] %v1525_v22  ;;  %v1527_v23 = vld [vmem:[%s2041_s26 + $0x230] sm:$0xf]  ;;  %v1529_v24 = vld [vmem:[%s2041_s26 + $0x248] sm:$0xf] }
  0x40   : > { %v1531_v25 = vld [vmem:[%s2041_s26 + $0x260] sm:$0xf]  ;;  %1528 = vst [vmem:[%s2046_s27 + $0x11c] sm:$0xf] %v1527_v23  ;;  %1530 = vst [vmem:[%s2046_s27 + $0x128] sm:$0xf] %v1529_v24 }
  0x41   : > { %1532 = vst [vmem:[%s2046_s27 + $0x134] sm:$0xf] %v1531_v25  ;;  %v1533_v26 = vld [vmem:[%s2041_s26 + $0x278] sm:$0xf]  ;;  %v1535_v27 = vld [vmem:[%s2041_s26 + $0x290] sm:$0xf] }
  0x42   : > { %v1537_v28 = vld [vmem:[%s2041_s26 + $0x2a8] sm:$0xf]  ;;  %1534 = vst [vmem:[%s2046_s27 + $0x140] sm:$0xf] %v1533_v26  ;;  %1536 = vst [vmem:[%s2046_s27 + $0x14c] sm:$0xf] %v1535_v27 }
  0x43   : > { %1538 = vst [vmem:[%s2046_s27 + $0x158] sm:$0xf] %v1537_v28  ;;  %v1539_v29 = vld [vmem:[%s2041_s26 + $0x2c0] sm:$0xf]  ;;  %v1541_v30 = vld [vmem:[%s2041_s26 + $0x2d8] sm:$0xf] }
  0x44   : > { %v1543_v31 = vld [vmem:[%s2041_s26 + $0x2f0] sm:$0xf]  ;;  %1540 = vst [vmem:[%s2046_s27 + $0x164] sm:$0xf] %v1539_v29  ;;  %1542 = vst [vmem:[%s2046_s27 + $0x170] sm:$0xf] %v1541_v30 }
  0x45   : > { %1544 = vst [vmem:[%s2046_s27 + $0x17c] sm:$0xf] %v1543_v31  ;;  %v1545_v32 = vld [vmem:[%s2041_s26 + $0x308] sm:$0xf]  ;;  %v1547_v33 = vld [vmem:[%s2041_s26 + $0x320] sm:$0xf] }
  0x46   : > { %v1549_v34 = vld [vmem:[%s2041_s26 + $0x338] sm:$0xf]  ;;  %1546 = vst [vmem:[%s2046_s27 + $0x188] sm:$0xf] %v1545_v32  ;;  %1548 = vst [vmem:[%s2046_s27 + $0x194] sm:$0xf] %v1547_v33 }
  0x47   : > { %1550 = vst [vmem:[%s2046_s27 + $0x1a0] sm:$0xf] %v1549_v34  ;;  %v1551_v35 = vld [vmem:[%s2041_s26 + $0x350] sm:$0xf]  ;;  %v1553_v36 = vld [vmem:[%s2041_s26 + $0x368] sm:$0xf] }
  0x48   : > { %v1555_v37 = vld [vmem:[%s2041_s26 + $0x380] sm:$0xf]  ;;  %1552 = vst [vmem:[%s2046_s27 + $0x1ac] sm:$0xf] %v1551_v35  ;;  %1554 = vst [vmem:[%s2046_s27 + $0x1b8] sm:$0xf] %v1553_v36 }
  0x49   : > { %1556 = vst [vmem:[%s2046_s27 + $0x1c4] sm:$0xf] %v1555_v37  ;;  %v1557_v38 = vld [vmem:[%s2041_s26 + $0x398] sm:$0xf]  ;;  %v1559_v39 = vld [vmem:[%s2041_s26 + $0x3b0] sm:$0xf] }
  0x4a   : > { %v1561_v40 = vld [vmem:[%s2041_s26 + $0x3c8] sm:$0xf]  ;;  %1558 = vst [vmem:[%s2046_s27 + $0x1d0] sm:$0xf] %v1557_v38  ;;  %1560 = vst [vmem:[%s2046_s27 + $0x1dc] sm:$0xf] %v1559_v39 }
  0x4b   : > { %1562 = vst [vmem:[%s2046_s27 + $0x1e8] sm:$0xf] %v1561_v40  ;;  %v1563_v41 = vld [vmem:[%s2041_s26 + $0x3e0] sm:$0xf]  ;;  %v1565_v42 = vld [vmem:[%s2041_s26 + $0x3f8] sm:$0xf] }
  0x4c   : > { %v1567_v43 = vld [vmem:[%s2041_s26 + $0x410] sm:$0xf]  ;;  %1564 = vst [vmem:[%s2046_s27 + $0x1f4] sm:$0xf] %v1563_v41  ;;  %1566 = vst [vmem:[%s2046_s27 + $0x200] sm:$0xf] %v1565_v42 }
  0x4d   : > { %1568 = vst [vmem:[%s2046_s27 + $0x20c] sm:$0xf] %v1567_v43  ;;  %v1569_v44 = vld [vmem:[%s2041_s26 + $0x428] sm:$0xf]  ;;  %v1571_v45 = vld [vmem:[%s2041_s26 + $0x440] sm:$0xf] }
  0x4e   : > { %v1573_v46 = vld [vmem:[%s2041_s26 + $0x458] sm:$0xf]  ;;  %1570 = vst [vmem:[%s2046_s27 + $0x218] sm:$0xf] %v1569_v44  ;;  %1572 = vst [vmem:[%s2046_s27 + $0x224] sm:$0xf] %v1571_v45 }
  0x4f   : > { %1574 = vst [vmem:[%s2046_s27 + $0x230] sm:$0xf] %v1573_v46  ;;  %v1575_v47 = vld [vmem:[%s2041_s26 + $0x470] sm:$0xf]  ;;  %v1577_v48 = vld [vmem:[%s2041_s26 + $0x488] sm:$0xf] }
  0x50   : > { %v1579_v49 = vld [vmem:[%s2041_s26 + $0x4a0] sm:$0xf]  ;;  %1576 = vst [vmem:[%s2046_s27 + $0x23c] sm:$0xf] %v1575_v47  ;;  %1578 = vst [vmem:[%s2046_s27 + $0x248] sm:$0xf] %v1577_v48 }
  0x51   : > { %1580 = vst [vmem:[%s2046_s27 + $0x254] sm:$0xf] %v1579_v49  ;;  %v1581_v50 = vld [vmem:[%s2041_s26 + $0x4b8] sm:$0xf]  ;;  %v1583_v51 = vld [vmem:[%s2041_s26 + $0x4d0] sm:$0xf] }
  0x52   : > { %v1585_v52 = vld [vmem:[%s2041_s26 + $0x4e8] sm:$0xf]  ;;  %1582 = vst [vmem:[%s2046_s27 + $0x260] sm:$0xf] %v1581_v50  ;;  %1584 = vst [vmem:[%s2046_s27 + $0x26c] sm:$0xf] %v1583_v51 }
  0x53   : > { %1586 = vst [vmem:[%s2046_s27 + $0x278] sm:$0xf] %v1585_v52  ;;  %v1587_v53 = vld [vmem:[%s2041_s26 + $0x500] sm:$0xf]  ;;  %v1589_v54 = vld [vmem:[%s2041_s26 + $0x518] sm:$0xf] }
  0x54   : > { %v1591_v55 = vld [vmem:[%s2041_s26 + $0x530] sm:$0xf]  ;;  %1588 = vst [vmem:[%s2046_s27 + $0x284] sm:$0xf] %v1587_v53  ;;  %1590 = vst [vmem:[%s2046_s27 + $0x290] sm:$0xf] %v1589_v54 }
  0x55   : > { %1592 = vst [vmem:[%s2046_s27 + $0x29c] sm:$0xf] %v1591_v55  ;;  %v1593_v56 = vld [vmem:[%s2041_s26 + $0x548] sm:$0xf]  ;;  %v1595_v57 = vld [vmem:[%s2041_s26 + $0x560] sm:$0xf] }
  0x56   : > { %v1597_v58 = vld [vmem:[%s2041_s26 + $0x578] sm:$0xf]  ;;  %1594 = vst [vmem:[%s2046_s27 + $0x2a8] sm:$0xf] %v1593_v56  ;;  %1596 = vst [vmem:[%s2046_s27 + $0x2b4] sm:$0xf] %v1595_v57 }
  0x57   : > { %1598 = vst [vmem:[%s2046_s27 + $0x2c0] sm:$0xf] %v1597_v58  ;;  %v1599_v59 = vld [vmem:[%s2041_s26 + $0x590] sm:$0xf]  ;;  %v1601_v60 = vld [vmem:[%s2041_s26 + $0x5a8] sm:$0xf] }
  0x58   : > { %v1603_v61 = vld [vmem:[%s2041_s26 + $0x5c0] sm:$0xf]  ;;  %1600 = vst [vmem:[%s2046_s27 + $0x2cc] sm:$0xf] %v1599_v59  ;;  %1602 = vst [vmem:[%s2046_s27 + $0x2d8] sm:$0xf] %v1601_v60 }
  0x59   : > { %1604 = vst [vmem:[%s2046_s27 + $0x2e4] sm:$0xf] %v1603_v61  ;;  %v1605_v62 = vld [vmem:[%s2041_s26 + $0x5d8] sm:$0xf]  ;;  %v1607_v63 = vld [vmem:[%s2041_s26 + $0x5f0] sm:$0xf] }
  0x5a   : > { %1606 = vst [vmem:[%s2046_s27 + $0x2f0] sm:$0xf] %v1605_v62  ;;  %1608 = vst [vmem:[%s2046_s27 + $0x2fc] sm:$0xf] %v1607_v63 }
  0x5b PF: > { %p1609_p6 = scmp.ge.s32.totalorder %s1976_s16, 1  ;;  %p454_p7 = scmp.lt.s32.totalorder %s1976_s16, 3 }
  0x5d   : > { %p455_p8 = pnand %p1609_p6, %p454_p7 }
  0x5e   : > { %s461_s28 = sand.u32 (!%p455_p8), 1, %s1960_s12   ;;  %s503_s8 = smul.u32 (!%p455_p8), 3, %s1968_s14 }
  0x5f   : > { %458 = sbr.rel (%p455_p8) target bundleno = 415 (0x19f), region = 54 }
  0x60   : > { %s1759_s6 = smul.u32 (!%p455_p8), 768, %s461_s28  ;;  %p504_p9 = scmp.lt.s32.totalorder (!%p455_p8), %s503_s8, 5 }
  0x62   : > { %s2324_s7 = scalar_lea.vmem (!%p455_p8), [#allocation2], %s1759_s6 }
  0x64   : > { %v2307_v0 = vld [vmem:[%s2458_s0] sm:$0xff]  ;;  %v2312_v1 = vld [vmem:[%s2458_s0 + $0x8] sm:$0xff]  ;;  %v1810_v10 = vld [vmem:[%s2324_s7 + $0x90] ss:$12 sps:$4 sm:$0xff]   ;;  %s2469_s8 = smov (!%p504_p9, %s503_s8), 5 }
  0x65   : > { %v2316_v2 = vcombine.high %v2307_v0, %v2307_v0  ;;  %v2320_v3 = vcombine.high %v2312_v1, %v2312_v1  ;;  %v1800_v4 = vld [vmem:[%s2324_s7 + $0xac] ss:$12 sps:$4 sm:$0xff]   ;;  %v1804_v6 = vld [vmem:[%s2324_s7 + $0xa8] ss:$12 sps:$4 sm:$0xff]   ;;  %v1811_v11 = vld [vmem:[%s2324_s7 + $0x210] ss:$12 sps:$4 sm:$0xff]   ;;  %s506_s11 = scalar_lea.vmem %s2460_s2, %s2469_s8 }
  0x66   : > { %v1802_v5 = vld [vmem:[%s2324_s7 + $0x22c] ss:$12 sps:$4 sm:$0xff]   ;;  %1192 = vmatprep.subr.bf16.mxu0 %v1800_v4  ;;  %v1805_v7 = vld [vmem:[%s2324_s7 + $0x228] ss:$12 sps:$4 sm:$0xff]   ;;  %v1818_v16 = vld [vmem:[%s2324_s7 + $0x64] ss:$12 sps:$4 sm:$0xff]  }
  0x67   : > { %1224 = vmatprep.mubr.bf16.mxu0 %v2316_v2  ;;  %1265 = vmatprep.mubr.bf16.mxu1 %v2320_v3  ;;  %v1806_v8 = vld [vmem:[%s2324_s7 + $0x94] ss:$12 sps:$4 sm:$0xff]   ;;  %v1812_v12 = vld [vmem:[%s2324_s7 + $0x7c] ss:$12 sps:$4 sm:$0xff]   ;;  %v1816_v14 = vld [vmem:[%s2324_s7 + $0x78] ss:$12 sps:$4 sm:$0xff]  }
  0x68   : > { %1233 = vmatprep.subr.bf16.mxu1 %v1802_v5  ;;  %1193 = vmatpush1.bf16.msra.mxu0 %v1804_v6  ;;  %v1808_v9 = vld [vmem:[%s2324_s7 + $0x214] ss:$12 sps:$4 sm:$0xff]   ;;  %v1814_v13 = vld [vmem:[%s2324_s7 + $0x1fc] ss:$12 sps:$4 sm:$0xff]   ;;  %v1817_v15 = vld [vmem:[%s2324_s7 + $0x1f8] ss:$12 sps:$4 sm:$0xff]  }
  0x69   : > { %1234 = vmatpush1.bf16.msra.mxu1 %v1805_v7  ;;  %1194 = vmatprep.subr.bf16.mxu0 %v1806_v8  ;;  %v1820_v17 = vld [vmem:[%s2324_s7 + $0x1e4] ss:$12 sps:$4 sm:$0xff]   ;;  %v1822_v18 = vld [vmem:[%s2324_s7 + $0x60] ss:$12 sps:$4 sm:$0xff]   ;;  %v1828_v22 = vld [vmem:[%s2324_s7 + $0x48] ss:$12 sps:$4 sm:$0xff]  }
  0x6a   : > { %1235 = vmatprep.subr.bf16.mxu1 %v1808_v9  ;;  %v1823_v19 = vld [vmem:[%s2324_s7 + $0x1e0] ss:$12 sps:$4 sm:$0xff]   ;;  %v1829_v23 = vld [vmem:[%s2324_s7 + $0x1c8] ss:$12 sps:$4 sm:$0xff]   ;;  %v1834_v26 = vld [vmem:[%s2324_s7 + $0x30] ss:$12 sps:$4 sm:$0xff]  }
  0x6b   : > { %v1824_v20 = vld [vmem:[%s2324_s7 + $0x4c] ss:$12 sps:$4 sm:$0xff]   ;;  %v1830_v24 = vld [vmem:[%s2324_s7 + $0x34] ss:$12 sps:$4 sm:$0xff]   ;;  %v1835_v27 = vld [vmem:[%s2324_s7 + $0x1b0] ss:$12 sps:$4 sm:$0xff]  }
  0x6c   : > { %1195 = vmatpush1.bf16.msra.mxu0 %v1810_v10  ;;  %v1826_v21 = vld [vmem:[%s2324_s7 + $0x1cc] ss:$12 sps:$4 sm:$0xff]   ;;  %v1832_v25 = vld [vmem:[%s2324_s7 + $0x1b4] ss:$12 sps:$4 sm:$0xff]   ;;  %v1836_v28 = vld [vmem:[%s2324_s7 + $0x1c] ss:$12 sps:$4 sm:$0xff]  }
  0x6d   : > { %1236 = vmatpush1.bf16.msra.mxu1 %v1811_v11  ;;  %1196 = vmatprep.subr.bf16.mxu0 %v1812_v12  ;;  %v1838_v29 = vld [vmem:[%s2324_s7 + $0x19c] ss:$12 sps:$4 sm:$0xff]   ;;  %v1840_v30 = vld [vmem:[%s2324_s7 + $0x18] ss:$12 sps:$4 sm:$0xff]   ;;  %v1846_v34 = vld [vmem:[%s2324_s7] ss:$12 sps:$4 sm:$0xff]   ;;  %v2395_v11 = vcombine.low %v2307_v0, %v2307_v0  ;;  %v2399_v12 = vcombine.low %v2312_v1, %v2312_v1 }
  0x6e   : > { %1237 = vmatprep.subr.bf16.mxu1 %v1814_v13  ;;  %v1841_v31 = vld [vmem:[%s2324_s7 + $0x198] ss:$12 sps:$4 sm:$0xff]   ;;  %v1847_v35 = vld [vmem:[%s2324_s7 + $0x180] ss:$12 sps:$4 sm:$0xff]   ;;  %v1852_v38 = vld [vmem:[%s2324_s7 + $0x168] ss:$12 sps:$4 sm:$0xff]  }
  0x6f   : > { %v1842_v32 = vld [vmem:[%s2324_s7 + $0x4] ss:$12 sps:$4 sm:$0xff]   ;;  %v1848_v36 = vld [vmem:[%s2324_s7 + $0x16c] ss:$12 sps:$4 sm:$0xff]   ;;  %v1853_v39 = vld [vmem:[%s2324_s7 + $0x2e8] ss:$12 sps:$4 sm:$0xff]  }
  0x70   : > { %1197 = vmatpush1.bf16.msra.mxu0 %v1816_v14  ;;  %v1844_v33 = vld [vmem:[%s2324_s7 + $0x184] ss:$12 sps:$4 sm:$0xff]   ;;  %v1850_v37 = vld [vmem:[%s2324_s7 + $0x2ec] ss:$12 sps:$4 sm:$0xff]   ;;  %v1854_v40 = vld [vmem:[%s2324_s7 + $0x154] ss:$12 sps:$4 sm:$0xff]  }
  0x71   : > { %1238 = vmatpush1.bf16.msra.mxu1 %v1817_v15  ;;  %1198 = vmatprep.subr.bf16.mxu0 %v1818_v16  ;;  %v1856_v41 = vld [vmem:[%s2324_s7 + $0x2d4] ss:$12 sps:$4 sm:$0xff]   ;;  %v1858_v42 = vld [vmem:[%s2324_s7 + $0x150] ss:$12 sps:$4 sm:$0xff]   ;;  %v1864_v46 = vld [vmem:[%s2324_s7 + $0x138] ss:$12 sps:$4 sm:$0xff]  }
  0x72   : > { %1239 = vmatprep.subr.bf16.mxu1 %v1820_v17  ;;  %v1859_v43 = vld [vmem:[%s2324_s7 + $0x2d0] ss:$12 sps:$4 sm:$0xff]   ;;  %v1865_v47 = vld [vmem:[%s2324_s7 + $0x2b8] ss:$12 sps:$4 sm:$0xff]   ;;  %v1870_v50 = vld [vmem:[%s2324_s7 + $0x120] ss:$12 sps:$4 sm:$0xff]  }
  0x73   : > { %v1860_v44 = vld [vmem:[%s2324_s7 + $0x13c] ss:$12 sps:$4 sm:$0xff]   ;;  %v1866_v48 = vld [vmem:[%s2324_s7 + $0x124] ss:$12 sps:$4 sm:$0xff]   ;;  %v1871_v51 = vld [vmem:[%s2324_s7 + $0x2a0] ss:$12 sps:$4 sm:$0xff]  }
  0x74   : > { %1199 = vmatpush1.bf16.msra.mxu0 %v1822_v18  ;;  %v1862_v45 = vld [vmem:[%s2324_s7 + $0x2bc] ss:$12 sps:$4 sm:$0xff]   ;;  %v1868_v49 = vld [vmem:[%s2324_s7 + $0x2a4] ss:$12 sps:$4 sm:$0xff]   ;;  %v1872_v52 = vld [vmem:[%s2324_s7 + $0x10c] ss:$12 sps:$4 sm:$0xff]  }
  0x75   : > { %1240 = vmatpush1.bf16.msra.mxu1 %v1823_v19  ;;  %1200 = vmatprep.subr.bf16.mxu0 %v1824_v20  ;;  %v1874_v53 = vld [vmem:[%s2324_s7 + $0x28c] ss:$12 sps:$4 sm:$0xff]   ;;  %v1876_v54 = vld [vmem:[%s2324_s7 + $0x108] ss:$12 sps:$4 sm:$0xff]   ;;  %v1882_v58 = vld [vmem:[%s2324_s7 + $0xf0] ss:$12 sps:$4 sm:$0xff]  }
  0x76   : > { %1241 = vmatprep.subr.bf16.mxu1 %v1826_v21  ;;  %v1877_v55 = vld [vmem:[%s2324_s7 + $0x288] ss:$12 sps:$4 sm:$0xff]   ;;  %v1883_v59 = vld [vmem:[%s2324_s7 + $0x270] ss:$12 sps:$4 sm:$0xff]   ;;  %v1888_v62 = vld [vmem:[%s2324_s7 + $0xd8] ss:$12 sps:$4 sm:$0xff]  }
  0x77   : > { %v1878_v56 = vld [vmem:[%s2324_s7 + $0xf4] ss:$12 sps:$4 sm:$0xff]   ;;  %v1884_v60 = vld [vmem:[%s2324_s7 + $0xdc] ss:$12 sps:$4 sm:$0xff]   ;;  %v1889_v63 = vld [vmem:[%s2324_s7 + $0x258] ss:$12 sps:$4 sm:$0xff]  }
  0x78   : > { %1201 = vmatpush1.bf16.msra.mxu0 %v1828_v22  ;;  %v1880_v57 = vld [vmem:[%s2324_s7 + $0x274] ss:$12 sps:$4 sm:$0xff]   ;;  %v1886_v61 = vld [vmem:[%s2324_s7 + $0x25c] ss:$12 sps:$4 sm:$0xff]   ;;  %v1890_v4 = vld [vmem:[%s2324_s7 + $0xc4] ss:$12 sps:$4 sm:$0xff]  }
  0x79   : > { %1242 = vmatpush1.bf16.msra.mxu1 %v1829_v23  ;;  %1202 = vmatprep.subr.bf16.mxu0 %v1830_v24  ;;  %v1892_v5 = vld [vmem:[%s2324_s7 + $0x244] ss:$12 sps:$4 sm:$0xff]   ;;  %v1894_v6 = vld [vmem:[%s2324_s7 + $0xc0] ss:$12 sps:$4 sm:$0xff]   ;;  %v1912_v20 = vld [vmem:[%s2324_s7 + $0x128] ss:$12 sps:$4 sm:$0xff]  }
  0x7a   : > { %1243 = vmatprep.subr.bf16.mxu1 %v1832_v25  ;;  %v1895_v7 = vld [vmem:[%s2324_s7 + $0x240] ss:$12 sps:$4 sm:$0xff]   ;;  %v1900_v8 = vld [vmem:[%s2324_s7 + $0x170] ss:$12 sps:$4 sm:$0xff]   ;;  %v1904_v14 = vld [vmem:[%s2324_s7 + $0x158] ss:$12 sps:$4 sm:$0xff]  }
  0x7b   : > { %v1901_v9 = vld [vmem:[%s2324_s7 + $0x2f0] ss:$12 sps:$4 sm:$0xff]   ;;  %v1905_v15 = vld [vmem:[%s2324_s7 + $0x2d8] ss:$12 sps:$4 sm:$0xff]   ;;  %v1908_v1 = vld [vmem:[%s2324_s7 + $0x140] ss:$12 sps:$4 sm:$0xff]  }
  0x7c   : > { %1203 = vmatpush1.bf16.msra.mxu0 %v1834_v26  ;;  %v1902_v10 = vld [vmem:[%s2324_s7 + $0xb0] ss:$12 sps:$4 sm:$0xff]   ;;  %v1906_v16 = vld [vmem:[%s2324_s7 + $0x98] ss:$12 sps:$4 sm:$0xff]   ;;  %v1909_v17 = vld [vmem:[%s2324_s7 + $0x2c0] ss:$12 sps:$4 sm:$0xff]  }
  0x7d   : > { %1244 = vmatpush1.bf16.msra.mxu1 %v1835_v27  ;;  %1204 = vmatprep.subr.bf16.mxu0 %v1836_v28  ;;  %v1903_v13 = vld [vmem:[%s2324_s7 + $0x230] ss:$12 sps:$4 sm:$0xff]   ;;  %v1907_v0 = vld [vmem:[%s2324_s7 + $0x218] ss:$12 sps:$4 sm:$0xff]   ;;  %v1910_v18 = vld [vmem:[%s2324_s7 + $0x80] ss:$12 sps:$4 sm:$0xff]  }
  0x7e   : > { %1245 = vmatprep.subr.bf16.mxu1 %v1838_v29  ;;  %v1911_v19 = vld [vmem:[%s2324_s7 + $0x200] ss:$12 sps:$4 sm:$0xff]   ;;  %v1913_v21 = vld [vmem:[%s2324_s7 + $0x2a8] ss:$12 sps:$4 sm:$0xff]   ;;  %v1918_v24 = vld [vmem:[%s2324_s7 + $0x50] ss:$12 sps:$4 sm:$0xff]  }
  0x7f   : > { %v1914_v22 = vld [vmem:[%s2324_s7 + $0x68] ss:$12 sps:$4 sm:$0xff]   ;;  %v1919_v25 = vld [vmem:[%s2324_s7 + $0x1d0] ss:$12 sps:$4 sm:$0xff]   ;;  %v1920_v26 = vld [vmem:[%s2324_s7 + $0xf8] ss:$12 sps:$4 sm:$0xff]  }
  0x80   : > { %1205 = vmatpush1.bf16.msra.mxu0 %v1840_v30  ;;  %v1915_v23 = vld [vmem:[%s2324_s7 + $0x1e8] ss:$12 sps:$4 sm:$0xff]   ;;  %v1921_v27 = vld [vmem:[%s2324_s7 + $0x278] ss:$12 sps:$4 sm:$0xff]   ;;  %v1924_v30 = vld [vmem:[%s2324_s7 + $0xe0] ss:$12 sps:$4 sm:$0xff]  }
  0x81   : > { %1246 = vmatpush1.bf16.msra.mxu1 %v1841_v31  ;;  %1206 = vmatprep.subr.bf16.mxu0 %v1842_v32  ;;  %v1922_v28 = vld [vmem:[%s2324_s7 + $0x38] ss:$12 sps:$4 sm:$0xff]   ;;  %v1925_v31 = vld [vmem:[%s2324_s7 + $0x260] ss:$12 sps:$4 sm:$0xff]   ;;  %s1610_s12 = sshll.u32 %s2469_s8, 3 }
  0x82   : > { %1247 = vmatprep.subr.bf16.mxu1 %v1844_v33  ;;  %v1923_v29 = vld [vmem:[%s2324_s7 + $0x1b8] ss:$12 sps:$4 sm:$0xff]   ;;  %v1926_v32 = vld [vmem:[%s2324_s7 + $0x20] ss:$12 sps:$4 sm:$0xff]   ;;  %s516_s19 = scalar_lea.vmem %s2461_s3, %s1610_s12 }
  0x83   : > { %v1927_v33 = vld [vmem:[%s2324_s7 + $0x1a0] ss:$12 sps:$4 sm:$0xff]  }
  0x84   : > { %1207 = vmatpush1.bf16.msra.mxu0 %v1846_v34  ;;  %v1928_v34 = vld [vmem:[%s2324_s7 + $0xc8] ss:$12 sps:$4 sm:$0xff]  }
  0x85   : > { %1248 = vmatpush1.bf16.msra.mxu1 %v1847_v35  ;;  %1208 = vmatprep.subr.bf16.mxu0 %v1848_v36  ;;  %v1929_v35 = vld [vmem:[%s2324_s7 + $0x248] ss:$12 sps:$4 sm:$0xff]  }
  0x86   : > { %1249 = vmatprep.subr.bf16.mxu1 %v1850_v37  ;;  %v1930_v36 = vld [vmem:[%s2324_s7 + $0x8] ss:$12 sps:$4 sm:$0xff]  }
  0x87   : > { %v1931_v37 = vld [vmem:[%s2324_s7 + $0x188] ss:$12 sps:$4 sm:$0xff]  }
  0x88   : > { %1209 = vmatpush2.bf16.msra.mxu0 %v1852_v38  ;;  %v651_v38 = vlaneseq }
  0x89   : > { %1250 = vmatpush2.bf16.msra.mxu1 %v1853_v39  ;;  %1210 = vmatprep.subr.bf16.mxu0 %v1854_v40 }
  0x8a   : > { %1251 = vmatprep.subr.bf16.mxu1 %v1856_v41  ;;  %v652_v39 = vshrl.u32 %v651_v38, 7  ;;  %v649_v41 = vld [vmem:[%s506_s11] sm:$0x7] }
  0x8c   : > { %1211 = vmatpush2.bf16.msra.mxu0 %v1858_v42  ;;  %v653_v40 = vsub.s32 0, %v652_v39  ;;  %v657_v42 = vsub.s32 1, %v652_v39 }
  0x8d   : > { %1252 = vmatpush2.bf16.msra.mxu1 %v1859_v43  ;;  %1212 = vmatprep.subr.bf16.mxu0 %v1860_v44 }
  0x8e   : > { %1253 = vmatprep.subr.bf16.mxu1 %v1862_v45  ;;  %v654_v43 = vrot.slane %v649_v41, %v653_v40  ;;  %v658_v44 = vrot.slane %v649_v41, %v657_v42 }
  0x90   : > { %1213 = vmatpush2.bf16.msra.mxu0 %v1864_v46 }
  0x91   : > { %1254 = vmatpush2.bf16.msra.mxu1 %v1865_v47  ;;  %1214 = vmatprep.subr.bf16.mxu0 %v1866_v48 }
  0x92   : > { %1255 = vmatprep.subr.bf16.mxu1 %v1868_v49 }
  0x94   : > { %1215 = vmatpush2.bf16.msra.mxu0 %v1870_v50 }
  0x95   : > { %1256 = vmatpush2.bf16.msra.mxu1 %v1871_v51  ;;  %1216 = vmatprep.subr.bf16.mxu0 %v1872_v52 }
  0x96   : > { %1257 = vmatprep.subr.bf16.mxu1 %v1874_v53 }
  0x98   : > { %1217 = vmatpush2.bf16.msra.mxu0 %v1876_v54 }
  0x99   : > { %1258 = vmatpush2.bf16.msra.mxu1 %v1877_v55  ;;  %1218 = vmatprep.subr.bf16.mxu0 %v1878_v56 }
  0x9a   : > { %1259 = vmatprep.subr.bf16.mxu1 %v1880_v57 }
  0x9c   : > { %1219 = vmatpush2.bf16.msra.mxu0 %v1882_v58 }
  0x9d   : > { %1260 = vmatpush2.bf16.msra.mxu1 %v1883_v59  ;;  %1220 = vmatprep.subr.bf16.mxu0 %v1884_v60  ;;  %v661_v59 = vsub.s32 2, %v652_v39 }
  0x9e   : > { %1261 = vmatprep.subr.bf16.mxu1 %v1886_v61 }
  0xa0   : > { %1221 = vmatpush2.bf16.msra.mxu0 %v1888_v62  ;;  %v662_v62 = vrot.slane %v649_v41, %v661_v59 }
  0xa1   : > { %1262 = vmatpush2.bf16.msra.mxu1 %v1889_v63  ;;  %1222 = vmatprep.subr.bf16.mxu0 %v1890_v4 }
  0xa2   : > { %1263 = vmatprep.subr.bf16.mxu1 %v1892_v5 }
  0xa4   : > { %1223 = vmatpush2.bf16.msra.mxu0 %v1894_v6 }
  0xa5   : > { %1264 = vmatpush2.bf16.msra.mxu1 %v1895_v7  ;;  %1714 = vmatprep.subr.bf16.mxu0 %v1900_v8 }
  0xa6   : > { %1736 = vmatprep.subr.bf16.mxu1 %v1901_v9 }
  0xa7   : > { %1225 = vmatmul.mubr.bf16.vlgmr.msra.gmra.mxu0 %v2395_v11 }
  0xa8   : > { %1266 = vmatmul.mubr.bf16.vlgmr.msra.gmra.mxu1 %v2399_v12  ;;  %1715 = vmatpush3.bf16.msra.mxu0 %v1902_v10 }
  0xa9   : > { %1737 = vmatpush3.bf16.msra.mxu1 %v1903_v13  ;;  %1716 = vmatprep.subr.bf16.mxu0 %v1904_v14 }
  0xaa   : > { %1738 = vmatprep.subr.bf16.mxu1 %v1905_v15  ;;  %1306 = vmatprep.mubr.bf16.mxu0 %v2316_v2  ;;  %v1916_v2 = vld [vmem:[%s2324_s7 + $0x110] ss:$12 sps:$4 sm:$0xff]  }
  0xab   : > { %1346 = vmatprep.mubr.bf16.mxu1 %v2320_v3  ;;  %v1917_v3 = vld [vmem:[%s2324_s7 + $0x290] ss:$12 sps:$4 sm:$0xff]  }
  0xac   : > { %1717 = vmatpush3.bf16.msra.mxu0 %v1906_v16 }
  0xad   : > { %1739 = vmatpush3.bf16.msra.mxu1 %v1907_v0  ;;  %1718 = vmatprep.subr.bf16.mxu0 %v1908_v1 }
  0xae   : > { %1740 = vmatprep.subr.bf16.mxu1 %v1909_v17 }
  0xb0   : > { %1719 = vmatpush3.bf16.msra.mxu0 %v1910_v18 }
  0xb1   : > { %1741 = vmatpush3.bf16.msra.mxu1 %v1911_v19  ;;  %1720 = vmatprep.subr.bf16.mxu0 %v1912_v20 }
  0xb2   : > { %1742 = vmatprep.subr.bf16.mxu1 %v1913_v21 }
  0xb4   : > { %1721 = vmatpush3.bf16.msra.mxu0 %v1914_v22 }
  0xb5   : > { %1743 = vmatpush3.bf16.msra.mxu1 %v1915_v23  ;;  %1722 = vmatprep.subr.bf16.mxu0 %v1916_v2 }
  0xb6   : > { %1744 = vmatprep.subr.bf16.mxu1 %v1917_v3 }
  0xb8   : > { %1723 = vmatpush3.bf16.msra.mxu0 %v1918_v24 }
  0xb9   : > { %1745 = vmatpush3.bf16.msra.mxu1 %v1919_v25  ;;  %1724 = vmatprep.subr.bf16.mxu0 %v1920_v26 }
  0xba   : > { %1746 = vmatprep.subr.bf16.mxu1 %v1921_v27 }
  0xbc   : > { %1725 = vmatpush3.bf16.msra.mxu0 %v1922_v28 }
  0xbd   : > { %1747 = vmatpush3.bf16.msra.mxu1 %v1923_v29  ;;  %1726 = vmatprep.subr.bf16.mxu0 %v1924_v30 }
  0xbe   : > { %1748 = vmatprep.subr.bf16.mxu1 %v1925_v31 }
  0xc0   : > { %1727 = vmatpush3.bf16.msra.mxu0 %v1926_v32 }
  0xc1   : > { %1749 = vmatpush3.bf16.msra.mxu1 %v1927_v33  ;;  %1728 = vmatprep.subr.bf16.mxu0 %v1928_v34 }
  0xc2   : > { %1750 = vmatprep.subr.bf16.mxu1 %v1929_v35 }
  0xc4   : > { %1729 = vmatpush3.bf16.msra.mxu0 %v1930_v36 }
  0xc5   : > { %1751 = vmatpush3.bf16.msra.mxu1 %v1931_v37 }
  0xc7   : > { %1307 = vmatmul.mubr.bf16.vlgmr.msra.gmra.mxu0 %v2395_v11 }
  0xc8   : > { %1347 = vmatmul.mubr.bf16.vlgmr.msra.gmra.mxu1 %v2399_v12 }
 0x167   : > { %v1226_v45 = vpop.f32.mrf.mxu0 }
 0x168   : > { %v1267_v46 = vpop.f32.mrf.mxu1  ;;  %v1227_v47 = vadd.f32 %v1226_v45, %v654_v43 }
 0x169   : > { %v1228_v48 = vpop.f32.mrf.mxu0 }
 0x16a   : > { %v1269_v49 = vpop.f32.mrf.mxu1  ;;  %v1268_v50 = vadd.f32 %v1267_v46, %v1227_v47  ;;  %v1229_v51 = vadd.f32 %v1228_v48, %v658_v44 }
 0x16b   : > { %v1230_v52 = vpop.f32.mrf.mxu0 }
 0x16c   : > { %v1271_v53 = vpop.f32.mrf.mxu1  ;;  %1932 = vtanh.f32 %v1268_v50  ;;  %v1270_v54 = vadd.f32 %v1269_v49, %v1229_v51 }
 0x16d   : > { %v1231_v55 = vpop.f32.mrf.mxu0 }
 0x16e   : > { %v1272_v56 = vpop.f32.mrf.mxu1  ;;  %1934 = vtanh.f32 %v1270_v54 }
 0x179   : > { %v1933_v57 = vpop.eup %1932 }
 0x17a   : > { %1357 = vst [vmem:[%s516_s19] sm:$0xff] %v1933_v57 }
 0x17b   : > { %v1935_v58 = vpop.eup %1934 }
 0x17c   : > { %1358 = vst [vmem:[%s516_s19 + $0x8] sm:$0xff] %v1935_v58 }
 0x187   : > { %v1730_v60 = vpop.f32.mrf.mxu0 }
 0x188   : > { %v1752_v61 = vpop.f32.mrf.mxu1 }
 0x189   : > { %v1731_v63 = vpop.f32.mrf.mxu0 }
 0x18a   : > { %v1753_v4 = vpop.f32.mrf.mxu1  ;;  %v1732_v5 = vadd.f32 %v1731_v63, %v1730_v60 }
 0x18b   : > { %v1733_v6 = vpop.f32.mrf.mxu0  ;;  %v1754_v9 = vadd.f32 %v1753_v4, %v1752_v61 }
 0x18c   : > { %v1755_v7 = vpop.f32.mrf.mxu1  ;;  %v1309_v8 = vadd.f32 %v1732_v5, %v662_v62 }
 0x18d   : > { %v1734_v10 = vpop.f32.mrf.mxu0 }
 0x18e   : > { %v1756_v11 = vpop.f32.mrf.mxu1  ;;  %v1349_v12 = vadd.f32 %v1754_v9, %v1309_v8 }
 0x190   : > { %1936 = vtanh.f32 %v1349_v12 }
 0x19d   : > { %v1937_v13 = vpop.eup %1936 }
 0x19e   : > { %1359 = vst [vmem:[%s516_s19 + $0x10] sm:$0xff] %v1937_v13 }
 0x19f PF: > { %s13_s16 = sadd.s32 1, %s1976_s16   ;;  %s2462_s12 = smov %s1964_s13 }
 0x1a0   : > { %p10_p10 = scmp.ge.s32.totalorder %s13_s16, 4   ;;  %s2463_s13 = smov %s2033_s20 }
 0x1a1   : > { %s2464_s14 = smov %s1972_s15  ;;  %s2465_s15 = smov %s2467_s17 }
 0x1a2   :  { %12 = sbr.rel (!%p10_p10) target bundleno = 3 (0x3), region = 105 }

</bundles_post_ra>
